<compile_context>
chip_gen: v7x
topology: tpu7x:2x2x1
jax: 0.10.0
libtpu: 0.0.40
codegen_flags: <defaults>
</compile_context>

<pallas_src>
import functools

import numpy as np
import jax
import jax.numpy as jnp
from jax.experimental import pallas as pl
from jax.experimental.pallas import tpu as pltpu

BN_EPS = 1e-5


# ---------------------------------------------------------------------------
# In-kernel building blocks.  Only static unit-stride slices, concatenates,
# 2-D matmuls and elementwise ops are used (safe for Mosaic and interpret).
# ---------------------------------------------------------------------------
def _conv3x3_bn_relu(pad_flat, w_ref, s_ref, b_ref, H, W):
    """3x3 / stride-1 / pad-1 conv on a zero-padded, row-flattened activation.

    pad_flat : (Cin, (H+2)*(W+2)) value; spatial flattened row-major with the
               1-pixel zero halo included (row stride Wp = W + 2).
    w_ref    : (Cout, 9*Cin) ref; column index = (dy*3 + dx)*Cin + cin.
    s_ref/b_ref : (Cout, 1) folded BatchNorm scale / shift (conv bias folded).
    Returns  : (Cout, H*Wp - 2) post-BN+ReLU value, flat with row stride Wp.
               Lanes x in {W, W+1} of each row are don't-care garbage that is
               never read downstream.
    """
    Wp = W + 2
    L = H * Wp - 2
    # im2col: 9 contiguous lane-offset slices stacked on sublanes -> ONE matmul.
    patches = jnp.concatenate(
        [pad_flat[:, dy * Wp + dx: dy * Wp + dx + L]
         for dy in range(3) for dx in range(3)],
        axis=0)                                              # (9*Cin, L)
    acc = jnp.dot(w_ref[...], patches,
                  preferred_element_type=jnp.float32)        # (Cout, L) on MXU
    return jnp.maximum(acc * s_ref[...] + b_ref[...], 0.0)   # folded BN + ReLU


def _avg_pool_2x2_rows(y, pw, H, W):
    """2x2 / stride-2 average pool of a flat conv output.

    y  : (C, H*(W+2) - 2) flat post-ReLU activation (row stride Wp = W + 2).
    pw : (W, W//2) constant with 0.25 at [2v, v] and [2v+1, v].
    Returns a list of H//2 values of shape (C, W//2), one per pooled row.
    (Strided ref indexing is not used; the even/odd column selection plus the
    horizontal average is one tiny MXU matmul per pooled row.)
    """
    Wp = W + 2
    n = y.shape[1] - Wp
    yv = y[:, :n] + y[:, Wp:Wp + n]          # vertical pair-sum, whole plane
    return [
        jnp.dot(yv[:, 2 * u * Wp: 2 * u * Wp + W], pw,
                preferred_element_type=jnp.float32)
        for u in range(H // 2)
    ]


def fused_cnn_kernel(x_ref,
                     w1_ref, s1_ref, b1_ref,
                     w2_ref, s2_ref, b2_ref,
                     w3_ref, s3_ref, b3_ref,
                     pw1_ref, pw2_ref, pw3_ref,
                     wf1_ref, s4_ref, b4_ref,
                     wf2_ref, bf2_ref,
                     o_ref,
                     pad2_ref, pad3_ref,
                     *, H, W):
    H2, W2 = H // 2, W // 2
    H3, W3 = H // 4, W // 4
    Wp2, Wp3 = W2 + 2, W3 + 2

    # Zero only the two small padded scratch buffers (~17 KiB total): their
    # 1-pixel halo provides the conv zero padding and the interior is fully
    # overwritten below, so every grid step is independent (megacore-safe).
    pad2_ref[...] = jnp.zeros(pad2_ref.shape, pad2_ref.dtype)
    pad3_ref[...] = jnp.zeros(pad3_ref.shape, pad3_ref.dtype)

    # conv1 + bn1 + relu (input block already carries the zero halo).
    y1 = _conv3x3_bn_relu(x_ref[0], w1_ref, s1_ref, b1_ref, H, W)

    # pool1 -> stage rows into pad2's interior.
    pw1 = pw1_ref[...]
    for u, row in enumerate(_avg_pool_2x2_rows(y1, pw1, H, W)):
        off = (1 + u) * Wp2 + 1
        pad2_ref[:, off:off + W2] = row

    # conv2 + bn2 + relu.
    y2 = _conv3x3_bn_relu(pad2_ref[...], w2_ref, s2_ref, b2_ref, H2, W2)

    # pool2 -> stage rows into pad3's interior.
    pw2 = pw2_ref[...]
    for u, row in enumerate(_avg_pool_2x2_rows(y2, pw2, H2, W2)):
        off = (1 + u) * Wp3 + 1
        pad3_ref[:, off:off + W3] = row

    # conv3 + bn3 + relu.
    y3 = _conv3x3_bn_relu(pad3_ref[...], w3_ref, s3_ref, b3_ref, H3, W3)

    # pool3 kept as a value: (C3, Hf*Wf) with lane index h*Wf + w.
    pw3 = pw3_ref[...]
    pooled = jnp.concatenate(_avg_pool_2x2_rows(y3, pw3, H3, W3), axis=1)

    # Flatten in PyTorch NCHW order (feature = c*Hf*Wf + h*Wf + w), then
    # fc1 + folded bn4 + relu, and fc2.
    C3 = pooled.shape[0]
    flat = jnp.concatenate([pooled[c:c + 1, :] for c in range(C3)], axis=1)
    hid = jnp.dot(flat, wf1_ref[...], preferred_element_type=jnp.float32)
    hid = jnp.maximum(hid * s4_ref[...] + b4_ref[...], 0.0)
    logits = (jnp.dot(hid, wf2_ref[...], preferred_element_type=jnp.float32)
              + bf2_ref[...])
    o_ref[0] = logits


# ---------------------------------------------------------------------------
# Zero-FLOP glue: BN folding, weight re-layout, pallas_call wrapper.
# ---------------------------------------------------------------------------
def _fold_bn(bn, layer_bias, eps=BN_EPS):
    inv = bn["gamma"] / jnp.sqrt(bn["var"] + eps)
    return inv, (layer_bias - bn["mean"]) * inv + bn["beta"]


def _conv_w9(w_hwio, cin_pad=None):
    """(3, 3, Cin, Cout) HWIO -> (Cout, 9*Cin'); column = (dy*3+dx)*Cin' + ci."""
    if cin_pad is not None and cin_pad > w_hwio.shape[2]:
        w_hwio = jnp.pad(
            w_hwio, ((0, 0), (0, 0), (0, cin_pad - w_hwio.shape[2]), (0, 0)))
    cout = w_hwio.shape[3]
    return jnp.transpose(w_hwio, (3, 0, 1, 2)).reshape(cout, -1)


def _pool_matrix(w):
    pw = np.zeros((w, w // 2), np.float32)
    idx = np.arange(w // 2)
    pw[2 * idx, idx] = 0.25
    pw[2 * idx + 1, idx] = 0.25
    return jnp.asarray(pw)


def _const_index_map(ndim):
    return lambda i: (0,) * ndim


def simple_cnn_3ch_forward(x_nchw, params):
    x = x_nchw.astype(jnp.float32)
    N, Cin0, H, W = x.shape
    assert H % 8 == 0 and W % 8 == 0, "three 2x2 pools require H, W % 8 == 0"
    Hp, Wp = H + 2, W + 2
    CinP = ((Cin0 + 7) // 8) * 8          # pad input channels to a sublane tile

    C1 = params["conv1_w"].shape[-1]
    C2 = params["conv2_w"].shape[-1]
    C3 = params["conv3_w"].shape[-1]
    F = params["fc1_w"].shape[-1]
    n_cls = params["fc2_w"].shape[-1]
    Hf, Wf = H // 8, W // 8

    # Input prep (cheap XLA pad + free reshape, NO transpose of the batch):
    # add the layer-1 zero halo, pad C=3 -> 8 sublanes, flatten spatial.
    xp = jnp.pad(x, ((0, 0), (0, CinP - Cin0), (1, 1), (1, 1)))
    xp = xp.reshape(N, CinP, Hp * Wp)

    inputs = [xp]
    for i, cpad in ((1, CinP), (2, None), (3, None)):
        s, b = _fold_bn(params[f"bn{i}"], params[f"conv{i}_b"])
        inputs += [_conv_w9(params[f"conv{i}_w"], cpad),
                   s.reshape(-1, 1), b.reshape(-1, 1)]
    inputs += [_pool_matrix(W), _pool_matrix(W // 2), _pool_matrix(W // 4)]
    s4, b4 = _fold_bn(params["bn4"], params["fc1_b"])
    inputs += [params["fc1_w"], s4.reshape(1, -1), b4.reshape(1, -1),
               params["fc2_w"], params["fc2_b"].reshape(1, -1)]

    in_specs = [pl.BlockSpec((1, CinP, Hp * Wp), lambda i: (i, 0, 0))]
    in_specs += [pl.BlockSpec(a.shape, _const_index_map(a.ndim))
                 for a in inputs[1:]]

    flops_img = (
        2 * C1 * 9 * CinP * (H * Wp - 2)
        + 2 * C2 * 9 * C1 * ((H // 2) * (W // 2 + 2) - 2)
        + 2 * C3 * 9 * C2 * ((H // 4) * (W // 4 + 2) - 2)
        + (H // 2) * 2 * C1 * W * (W // 2)
        + (H // 4) * 2 * C2 * (W // 2) * (W // 4)
        + (H // 8) * 2 * C3 * (W // 4) * (W // 8)
        + 2 * C3 * Hf * Wf * F + 2 * F * n_cls)
    bytes_accessed = 4 * (sum(int(np.prod(a.shape)) for a in inputs)
                          + N * n_cls)

    out = pl.pallas_call(
        functools.partial(fused_cnn_kernel, H=H, W=W),
        out_shape=jax.ShapeDtypeStruct((N, 1, n_cls), jnp.float32),
        grid=(N,),
        in_specs=in_specs,
        out_specs=pl.BlockSpec((1, 1, n_cls), lambda i: (i, 0, 0)),
        scratch_shapes=[
            pltpu.VMEM((C1, (H // 2 + 2) * (W // 2 + 2)), jnp.float32),  # pad2
            pltpu.VMEM((C2, (H // 4 + 2) * (W // 4 + 2)), jnp.float32),  # pad3
        ],
        compiler_params=pltpu.CompilerParams(
            dimension_semantics=("parallel",)),
        cost_estimate=pl.CostEstimate(flops=int(N * flops_img),
                                      transcendentals=0,
                                      bytes_accessed=int(bytes_accessed)),
    )(*inputs)
    return out.reshape(N, n_cls)


# ---------------------------------------------------------------------------
# Pure-JAX reference (same semantics as the PyTorch module, eval-mode BN).
# ---------------------------------------------------------------------------
def reference_forward(x_nchw, params):
    hi = jax.lax.Precision.HIGHEST
    x = x_nchw
    for i in (1, 2, 3):
        w = params[f"conv{i}_w"]
        x = jax.lax.conv_general_dilated(
            x, w, window_strides=(1, 1), padding=((1, 1), (1, 1)),
            dimension_numbers=("NCHW", "HWIO", "NCHW"), precision=hi)
        x = x + params[f"conv{i}_b"][None, :, None, None]
        bn = params[f"bn{i}"]
        x = ((x - bn["mean"][None, :, None, None])
             / jnp.sqrt(bn["var"][None, :, None, None] + BN_EPS)
             * bn["gamma"][None, :, None, None] + bn["beta"][None, :, None, None])
        x = jnp.maximum(x, 0.0)
        x = jax.lax.reduce_window(x, 0.0, jax.lax.add,
                                  (1, 1, 2, 2), (1, 1, 2, 2), "VALID") * 0.25
    xf = x.reshape(x.shape[0], -1)
    h = jnp.dot(xf, params["fc1_w"], precision=hi) + params["fc1_b"]
    bn = params["bn4"]
    h = (h - bn["mean"]) / jnp.sqrt(bn["var"] + BN_EPS) * bn["gamma"] + bn["beta"]
    h = jnp.maximum(h, 0.0)
    return jnp.dot(h, params["fc2_w"], precision=hi) + params["fc2_b"]


# ---------------------------------------------------------------------------
# Deterministic synthetic parameters (no checkpoint loading).
# ---------------------------------------------------------------------------
def init_params(key, cha_input=8, cha_hidden=16, fc_hidden=32):
    keys = iter(jax.random.split(key, 32))   # 26 keys are consumed below

    def nrm(shape, s=0.1):
        return s * jax.random.normal(next(keys), shape, jnp.float32)

    def bn(c):
        return dict(
            gamma=1.0 + 0.1 * jax.random.normal(next(keys), (c,), jnp.float32),
            beta=0.1 * jax.random.normal(next(keys), (c,), jnp.float32),
            mean=0.1 * jax.random.normal(next(keys), (c,), jnp.float32),
            var=jax.random.uniform(next(keys), (c,), jnp.float32, 0.5, 1.5),
        )

    return {
        "conv1_w": nrm((3, 3, 3, cha_input)), "conv1_b": nrm((cha_input,)),
        "bn1": bn(cha_input),
        "conv2_w": nrm((3, 3, cha_input, cha_hidden)), "conv2_b": nrm((cha_hidden,)),
        "bn2": bn(cha_hidden),
        "conv3_w": nrm((3, 3, cha_hidden, cha_hidden)), "conv3_b": nrm((cha_hidden,)),
        "bn3": bn(cha_hidden),
        "fc1_w": nrm((cha_hidden * 4 * 4, fc_hidden)), "fc1_b": nrm((fc_hidden,)),
        "bn4": bn(fc_hidden),
        "fc2_w": nrm((fc_hidden, 10)), "fc2_b": nrm((10,)),
    }


if __name__ == "__main__":
    key = jax.random.PRNGKey(0)
    pkey, xkey = jax.random.split(key)
    params = init_params(pkey, cha_input=8, cha_hidden=16, fc_hidden=32)
    # fc1 expects cha_hidden*4*4 features => 32x32 input (three /2 pools), 3 ch.
    x = jax.random.normal(xkey, (2, 3, 32, 32), jnp.float32)   # NCHW like PyTorch

    out = jax.block_until_ready(jax.jit(simple_cnn_3ch_forward)(x, params))
    assert out.shape == (2, 10) and out.dtype == jnp.float32

    ref = jax.block_until_ready(jax.jit(reference_forward)(x, params))
    np.testing.assert_allclose(np.asarray(out), np.asarray(ref),
                               rtol=1e-2, atol=1e-2)
    print("KERNEL_OK")
</pallas_src>

<mosaic_0001>
module attributes {stable_mosaic.version = 11 : i64} {
  func.func @fused_cnn_kernel(%arg0: i32, %arg1: memref<1x8x1156xf32, #tpu.memory_space<vmem>>, %arg2: memref<8x72xf32, #tpu.memory_space<vmem>>, %arg3: memref<8x1xf32, #tpu.memory_space<vmem>>, %arg4: memref<8x1xf32, #tpu.memory_space<vmem>>, %arg5: memref<16x72xf32, #tpu.memory_space<vmem>>, %arg6: memref<16x1xf32, #tpu.memory_space<vmem>>, %arg7: memref<16x1xf32, #tpu.memory_space<vmem>>, %arg8: memref<16x144xf32, #tpu.memory_space<vmem>>, %arg9: memref<16x1xf32, #tpu.memory_space<vmem>>, %arg10: memref<16x1xf32, #tpu.memory_space<vmem>>, %arg11: memref<32x16xf32, #tpu.memory_space<vmem>>, %arg12: memref<16x8xf32, #tpu.memory_space<vmem>>, %arg13: memref<8x4xf32, #tpu.memory_space<vmem>>, %arg14: memref<256x32xf32, #tpu.memory_space<vmem>>, %arg15: memref<1x32xf32, #tpu.memory_space<vmem>>, %arg16: memref<1x32xf32, #tpu.memory_space<vmem>>, %arg17: memref<32x10xf32, #tpu.memory_space<vmem>>, %arg18: memref<1x10xf32, #tpu.memory_space<vmem>>, %arg19: memref<1x1x10xf32, #tpu.memory_space<vmem>>, %arg20: memref<8x324xf32, #tpu.memory_space<vmem>>, %arg21: memref<16x100xf32, #tpu.memory_space<vmem>>) attributes {dimension_semantics = [#tpu.dimension_semantics<parallel>], iteration_bounds = array<i64: 2>, scalar_prefetch = 0 : i64, scratch_operands = 2 : i64, tpu.core_type = #tpu.core_type<tc>, window_params = [{transform_indices = @transform_0, window_bounds = array<i64: 1, 8, 1156>}, {pipeline_mode = #tpu.pipeline_mode<synchronous>, transform_indices = @transform_1, window_bounds = array<i64: 8, 72>}, {pipeline_mode = #tpu.pipeline_mode<synchronous>, transform_indices = @transform_2, window_bounds = array<i64: 8, 1>}, {pipeline_mode = #tpu.pipeline_mode<synchronous>, transform_indices = @transform_3, window_bounds = array<i64: 8, 1>}, {pipeline_mode = #tpu.pipeline_mode<synchronous>, transform_indices = @transform_4, window_bounds = array<i64: 16, 72>}, {pipeline_mode = #tpu.pipeline_mode<synchronous>, transform_indices = @transform_5, window_bounds = array<i64: 16, 1>}, {pipeline_mode = #tpu.pipeline_mode<synchronous>, transform_indices = @transform_6, window_bounds = array<i64: 16, 1>}, {pipeline_mode = #tpu.pipeline_mode<synchronous>, transform_indices = @transform_7, window_bounds = array<i64: 16, 144>}, {pipeline_mode = #tpu.pipeline_mode<synchronous>, transform_indices = @transform_8, window_bounds = array<i64: 16, 1>}, {pipeline_mode = #tpu.pipeline_mode<synchronous>, transform_indices = @transform_9, window_bounds = array<i64: 16, 1>}, {pipeline_mode = #tpu.pipeline_mode<synchronous>, transform_indices = @transform_10, window_bounds = array<i64: 32, 16>}, {pipeline_mode = #tpu.pipeline_mode<synchronous>, transform_indices = @transform_11, window_bounds = array<i64: 16, 8>}, {pipeline_mode = #tpu.pipeline_mode<synchronous>, transform_indices = @transform_12, window_bounds = array<i64: 8, 4>}, {pipeline_mode = #tpu.pipeline_mode<synchronous>, transform_indices = @transform_13, window_bounds = array<i64: 256, 32>}, {pipeline_mode = #tpu.pipeline_mode<synchronous>, transform_indices = @transform_14, window_bounds = array<i64: 1, 32>}, {pipeline_mode = #tpu.pipeline_mode<synchronous>, transform_indices = @transform_15, window_bounds = array<i64: 1, 32>}, {pipeline_mode = #tpu.pipeline_mode<synchronous>, transform_indices = @transform_16, window_bounds = array<i64: 32, 10>}, {pipeline_mode = #tpu.pipeline_mode<synchronous>, transform_indices = @transform_17, window_bounds = array<i64: 1, 10>}, {transform_indices = @transform_18, window_bounds = array<i64: 1, 1, 10>}]} {
    %cst = arith.constant 0.000000e+00 : f32
    %0 = vector.broadcast %cst : f32 to vector<8x324xf32>
    %c0 = arith.constant 0 : index
    %c0_0 = arith.constant 0 : index
    %1 = vector.load %arg20[%c0, %c0_0] : memref<8x324xf32, #tpu.memory_space<vmem>>, vector<8x324xf32>
    tpu.vector_store %arg20[%c0, %c0_0], %0 {strides = array<i32>} : memref<8x324xf32, #tpu.memory_space<vmem>>, vector<8x324xf32>,
    %cst_1 = arith.constant 0.000000e+00 : f32
    %2 = vector.broadcast %cst_1 : f32 to vector<16x100xf32>
    %c0_2 = arith.constant 0 : index
    %c0_3 = arith.constant 0 : index
    %3 = vector.load %arg21[%c0_2, %c0_3] : memref<16x100xf32, #tpu.memory_space<vmem>>, vector<16x100xf32>
    tpu.vector_store %arg21[%c0_2, %c0_3], %2 {strides = array<i32>} : memref<16x100xf32, #tpu.memory_space<vmem>>, vector<16x100xf32>,
    %c0_4 = arith.constant 0 : index
    %c0_5 = arith.constant 0 : index
    %c0_6 = arith.constant 0 : index
    %4 = vector.load %arg1[%c0_4, %c0_5, %c0_6] : memref<1x8x1156xf32, #tpu.memory_space<vmem>>, vector<1x8x1156xf32>
    %5 = vector.shape_cast %4 : vector<1x8x1156xf32> to vector<8x1156xf32>
    %6 = vector.extract_strided_slice %5 {offsets = [0, 0], sizes = [8, 1086], strides = [1, 1]} : vector<8x1156xf32> to vector<8x1086xf32>
    %7 = vector.extract_strided_slice %5 {offsets = [0, 1], sizes = [8, 1086], strides = [1, 1]} : vector<8x1156xf32> to vector<8x1086xf32>
    %8 = vector.extract_strided_slice %5 {offsets = [0, 2], sizes = [8, 1086], strides = [1, 1]} : vector<8x1156xf32> to vector<8x1086xf32>
    %9 = vector.extract_strided_slice %5 {offsets = [0, 34], sizes = [8, 1086], strides = [1, 1]} : vector<8x1156xf32> to vector<8x1086xf32>
    %10 = vector.extract_strided_slice %5 {offsets = [0, 35], sizes = [8, 1086], strides = [1, 1]} : vector<8x1156xf32> to vector<8x1086xf32>
    %11 = vector.extract_strided_slice %5 {offsets = [0, 36], sizes = [8, 1086], strides = [1, 1]} : vector<8x1156xf32> to vector<8x1086xf32>
    %12 = vector.extract_strided_slice %5 {offsets = [0, 68], sizes = [8, 1086], strides = [1, 1]} : vector<8x1156xf32> to vector<8x1086xf32>
    %13 = vector.extract_strided_slice %5 {offsets = [0, 69], sizes = [8, 1086], strides = [1, 1]} : vector<8x1156xf32> to vector<8x1086xf32>
    %14 = vector.extract_strided_slice %5 {offsets = [0, 70], sizes = [8, 1086], strides = [1, 1]} : vector<8x1156xf32> to vector<8x1086xf32>
    %15 = tpu.concatenate %6, %7, %8, %9, %10, %11, %12, %13, %14 in 0 : vector<8x1086xf32>, vector<8x1086xf32>, vector<8x1086xf32>, vector<8x1086xf32>, vector<8x1086xf32>, vector<8x1086xf32>, vector<8x1086xf32>, vector<8x1086xf32>, vector<8x1086xf32> -> vector<72x1086xf32>
    %c0_7 = arith.constant 0 : index
    %c0_8 = arith.constant 0 : index
    %16 = vector.load %arg2[%c0_7, %c0_8] : memref<8x72xf32, #tpu.memory_space<vmem>>, vector<8x72xf32>
    %cst_9 = arith.constant dense<0.000000e+00> : vector<8x1086xf32>
    %17 = tpu.matmul %16, %15, %cst_9 {dimension_numbers = #tpu.dot_dimension_numbers<[1], [0], [0], [1], [0, 0, 1, 1], [], []>} : vector<8x72xf32>, vector<72x1086xf32>, vector<8x1086xf32> -> vector<8x1086xf32>
    %c0_10 = arith.constant 0 : index
    %c0_11 = arith.constant 0 : index
    %18 = vector.load %arg3[%c0_10, %c0_11] : memref<8x1xf32, #tpu.memory_space<vmem>>, vector<8x1xf32>
    %19 = vector.broadcast %18 : vector<8x1xf32> to vector<8x1086xf32>
    %20 = arith.mulf %17, %19 : vector<8x1086xf32>
    %c0_12 = arith.constant 0 : index
    %c0_13 = arith.constant 0 : index
    %21 = vector.load %arg4[%c0_12, %c0_13] : memref<8x1xf32, #tpu.memory_space<vmem>>, vector<8x1xf32>
    %22 = vector.broadcast %21 : vector<8x1xf32> to vector<8x1086xf32>
    %23 = arith.addf %20, %22 : vector<8x1086xf32>
    %cst_14 = arith.constant 0.000000e+00 : f32
    %24 = vector.broadcast %cst_14 : f32 to vector<8x1086xf32>
    %25 = arith.maximumf %23, %24 : vector<8x1086xf32>
    %c0_15 = arith.constant 0 : index
    %c0_16 = arith.constant 0 : index
    %26 = vector.load %arg11[%c0_15, %c0_16] : memref<32x16xf32, #tpu.memory_space<vmem>>, vector<32x16xf32>
    %27 = vector.extract_strided_slice %25 {offsets = [0, 0], sizes = [8, 1052], strides = [1, 1]} : vector<8x1086xf32> to vector<8x1052xf32>
    %28 = vector.extract_strided_slice %25 {offsets = [0, 34], sizes = [8, 1052], strides = [1, 1]} : vector<8x1086xf32> to vector<8x1052xf32>
    %29 = arith.addf %27, %28 : vector<8x1052xf32>
    %30 = vector.extract_strided_slice %29 {offsets = [0, 0], sizes = [8, 32], strides = [1, 1]} : vector<8x1052xf32> to vector<8x32xf32>
    %cst_17 = arith.constant dense<0.000000e+00> : vector<8x16xf32>
    %31 = tpu.matmul %30, %26, %cst_17 {dimension_numbers = #tpu.dot_dimension_numbers<[1], [0], [0], [1], [0, 0, 1, 1], [], []>} : vector<8x32xf32>, vector<32x16xf32>, vector<8x16xf32> -> vector<8x16xf32>
    %32 = vector.extract_strided_slice %29 {offsets = [0, 68], sizes = [8, 32], strides = [1, 1]} : vector<8x1052xf32> to vector<8x32xf32>
    %cst_18 = arith.constant dense<0.000000e+00> : vector<8x16xf32>
    %33 = tpu.matmul %32, %26, %cst_18 {dimension_numbers = #tpu.dot_dimension_numbers<[1], [0], [0], [1], [0, 0, 1, 1], [], []>} : vector<8x32xf32>, vector<32x16xf32>, vector<8x16xf32> -> vector<8x16xf32>
    %34 = vector.extract_strided_slice %29 {offsets = [0, 136], sizes = [8, 32], strides = [1, 1]} : vector<8x1052xf32> to vector<8x32xf32>
    %cst_19 = arith.constant dense<0.000000e+00> : vector<8x16xf32>
    %35 = tpu.matmul %34, %26, %cst_19 {dimension_numbers = #tpu.dot_dimension_numbers<[1], [0], [0], [1], [0, 0, 1, 1], [], []>} : vector<8x32xf32>, vector<32x16xf32>, vector<8x16xf32> -> vector<8x16xf32>
    %36 = vector.extract_strided_slice %29 {offsets = [0, 204], sizes = [8, 32], strides = [1, 1]} : vector<8x1052xf32> to vector<8x32xf32>
    %cst_20 = arith.constant dense<0.000000e+00> : vector<8x16xf32>
    %37 = tpu.matmul %36, %26, %cst_20 {dimension_numbers = #tpu.dot_dimension_numbers<[1], [0], [0], [1], [0, 0, 1, 1], [], []>} : vector<8x32xf32>, vector<32x16xf32>, vector<8x16xf32> -> vector<8x16xf32>
    %38 = vector.extract_strided_slice %29 {offsets = [0, 272], sizes = [8, 32], strides = [1, 1]} : vector<8x1052xf32> to vector<8x32xf32>
    %cst_21 = arith.constant dense<0.000000e+00> : vector<8x16xf32>
    %39 = tpu.matmul %38, %26, %cst_21 {dimension_numbers = #tpu.dot_dimension_numbers<[1], [0], [0], [1], [0, 0, 1, 1], [], []>} : vector<8x32xf32>, vector<32x16xf32>, vector<8x16xf32> -> vector<8x16xf32>
    %40 = vector.extract_strided_slice %29 {offsets = [0, 340], sizes = [8, 32], strides = [1, 1]} : vector<8x1052xf32> to vector<8x32xf32>
    %cst_22 = arith.constant dense<0.000000e+00> : vector<8x16xf32>
    %41 = tpu.matmul %40, %26, %cst_22 {dimension_numbers = #tpu.dot_dimension_numbers<[1], [0], [0], [1], [0, 0, 1, 1], [], []>} : vector<8x32xf32>, vector<32x16xf32>, vector<8x16xf32> -> vector<8x16xf32>
    %42 = vector.extract_strided_slice %29 {offsets = [0, 408], sizes = [8, 32], strides = [1, 1]} : vector<8x1052xf32> to vector<8x32xf32>
    %cst_23 = arith.constant dense<0.000000e+00> : vector<8x16xf32>
    %43 = tpu.matmul %42, %26, %cst_23 {dimension_numbers = #tpu.dot_dimension_numbers<[1], [0], [0], [1], [0, 0, 1, 1], [], []>} : vector<8x32xf32>, vector<32x16xf32>, vector<8x16xf32> -> vector<8x16xf32>
    %44 = vector.extract_strided_slice %29 {offsets = [0, 476], sizes = [8, 32], strides = [1, 1]} : vector<8x1052xf32> to vector<8x32xf32>
    %cst_24 = arith.constant dense<0.000000e+00> : vector<8x16xf32>
    %45 = tpu.matmul %44, %26, %cst_24 {dimension_numbers = #tpu.dot_dimension_numbers<[1], [0], [0], [1], [0, 0, 1, 1], [], []>} : vector<8x32xf32>, vector<32x16xf32>, vector<8x16xf32> -> vector<8x16xf32>
    %46 = vector.extract_strided_slice %29 {offsets = [0, 544], sizes = [8, 32], strides = [1, 1]} : vector<8x1052xf32> to vector<8x32xf32>
    %cst_25 = arith.constant dense<0.000000e+00> : vector<8x16xf32>
    %47 = tpu.matmul %46, %26, %cst_25 {dimension_numbers = #tpu.dot_dimension_numbers<[1], [0], [0], [1], [0, 0, 1, 1], [], []>} : vector<8x32xf32>, vector<32x16xf32>, vector<8x16xf32> -> vector<8x16xf32>
    %48 = vector.extract_strided_slice %29 {offsets = [0, 612], sizes = [8, 32], strides = [1, 1]} : vector<8x1052xf32> to vector<8x32xf32>
    %cst_26 = arith.constant dense<0.000000e+00> : vector<8x16xf32>
    %49 = tpu.matmul %48, %26, %cst_26 {dimension_numbers = #tpu.dot_dimension_numbers<[1], [0], [0], [1], [0, 0, 1, 1], [], []>} : vector<8x32xf32>, vector<32x16xf32>, vector<8x16xf32> -> vector<8x16xf32>
    %50 = vector.extract_strided_slice %29 {offsets = [0, 680], sizes = [8, 32], strides = [1, 1]} : vector<8x1052xf32> to vector<8x32xf32>
    %cst_27 = arith.constant dense<0.000000e+00> : vector<8x16xf32>
    %51 = tpu.matmul %50, %26, %cst_27 {dimension_numbers = #tpu.dot_dimension_numbers<[1], [0], [0], [1], [0, 0, 1, 1], [], []>} : vector<8x32xf32>, vector<32x16xf32>, vector<8x16xf32> -> vector<8x16xf32>
    %52 = vector.extract_strided_slice %29 {offsets = [0, 748], sizes = [8, 32], strides = [1, 1]} : vector<8x1052xf32> to vector<8x32xf32>
    %cst_28 = arith.constant dense<0.000000e+00> : vector<8x16xf32>
    %53 = tpu.matmul %52, %26, %cst_28 {dimension_numbers = #tpu.dot_dimension_numbers<[1], [0], [0], [1], [0, 0, 1, 1], [], []>} : vector<8x32xf32>, vector<32x16xf32>, vector<8x16xf32> -> vector<8x16xf32>
    %54 = vector.extract_strided_slice %29 {offsets = [0, 816], sizes = [8, 32], strides = [1, 1]} : vector<8x1052xf32> to vector<8x32xf32>
    %cst_29 = arith.constant dense<0.000000e+00> : vector<8x16xf32>
    %55 = tpu.matmul %54, %26, %cst_29 {dimension_numbers = #tpu.dot_dimension_numbers<[1], [0], [0], [1], [0, 0, 1, 1], [], []>} : vector<8x32xf32>, vector<32x16xf32>, vector<8x16xf32> -> vector<8x16xf32>
    %56 = vector.extract_strided_slice %29 {offsets = [0, 884], sizes = [8, 32], strides = [1, 1]} : vector<8x1052xf32> to vector<8x32xf32>
    %cst_30 = arith.constant dense<0.000000e+00> : vector<8x16xf32>
    %57 = tpu.matmul %56, %26, %cst_30 {dimension_numbers = #tpu.dot_dimension_numbers<[1], [0], [0], [1], [0, 0, 1, 1], [], []>} : vector<8x32xf32>, vector<32x16xf32>, vector<8x16xf32> -> vector<8x16xf32>
    %58 = vector.extract_strided_slice %29 {offsets = [0, 952], sizes = [8, 32], strides = [1, 1]} : vector<8x1052xf32> to vector<8x32xf32>
    %cst_31 = arith.constant dense<0.000000e+00> : vector<8x16xf32>
    %59 = tpu.matmul %58, %26, %cst_31 {dimension_numbers = #tpu.dot_dimension_numbers<[1], [0], [0], [1], [0, 0, 1, 1], [], []>} : vector<8x32xf32>, vector<32x16xf32>, vector<8x16xf32> -> vector<8x16xf32>
    %60 = vector.extract_strided_slice %29 {offsets = [0, 1020], sizes = [8, 32], strides = [1, 1]} : vector<8x1052xf32> to vector<8x32xf32>
    %cst_32 = arith.constant dense<0.000000e+00> : vector<8x16xf32>
    %61 = tpu.matmul %60, %26, %cst_32 {dimension_numbers = #tpu.dot_dimension_numbers<[1], [0], [0], [1], [0, 0, 1, 1], [], []>} : vector<8x32xf32>, vector<32x16xf32>, vector<8x16xf32> -> vector<8x16xf32>
    %c0_33 = arith.constant 0 : index
    %c19 = arith.constant 19 : index
    %62 = vector.load %arg20[%c0_33, %c19] : memref<8x324xf32, #tpu.memory_space<vmem>>, vector<8x16xf32>
    tpu.vector_store %arg20[%c0_33, %c19], %31 {strides = array<i32>} : memref<8x324xf32, #tpu.memory_space<vmem>>, vector<8x16xf32>,
    %c0_34 = arith.constant 0 : index
    %c37 = arith.constant 37 : index
    %63 = vector.load %arg20[%c0_34, %c37] : memref<8x324xf32, #tpu.memory_space<vmem>>, vector<8x16xf32>
    tpu.vector_store %arg20[%c0_34, %c37], %33 {strides = array<i32>} : memref<8x324xf32, #tpu.memory_space<vmem>>, vector<8x16xf32>,
    %c0_35 = arith.constant 0 : index
    %c55 = arith.constant 55 : index
    %64 = vector.load %arg20[%c0_35, %c55] : memref<8x324xf32, #tpu.memory_space<vmem>>, vector<8x16xf32>
    tpu.vector_store %arg20[%c0_35, %c55], %35 {strides = array<i32>} : memref<8x324xf32, #tpu.memory_space<vmem>>, vector<8x16xf32>,
    %c0_36 = arith.constant 0 : index
    %c73 = arith.constant 73 : index
    %65 = vector.load %arg20[%c0_36, %c73] : memref<8x324xf32, #tpu.memory_space<vmem>>, vector<8x16xf32>
    tpu.vector_store %arg20[%c0_36, %c73], %37 {strides = array<i32>} : memref<8x324xf32, #tpu.memory_space<vmem>>, vector<8x16xf32>,
    %c0_37 = arith.constant 0 : index
    %c91 = arith.constant 91 : index
    %66 = vector.load %arg20[%c0_37, %c91] : memref<8x324xf32, #tpu.memory_space<vmem>>, vector<8x16xf32>
    tpu.vector_store %arg20[%c0_37, %c91], %39 {strides = array<i32>} : memref<8x324xf32, #tpu.memory_space<vmem>>, vector<8x16xf32>,
    %c0_38 = arith.constant 0 : index
    %c109 = arith.constant 109 : index
    %67 = vector.load %arg20[%c0_38, %c109] : memref<8x324xf32, #tpu.memory_space<vmem>>, vector<8x16xf32>
    tpu.vector_store %arg20[%c0_38, %c109], %41 {strides = array<i32>} : memref<8x324xf32, #tpu.memory_space<vmem>>, vector<8x16xf32>,
    %c0_39 = arith.constant 0 : index
    %c127 = arith.constant 127 : index
    %68 = vector.load %arg20[%c0_39, %c127] : memref<8x324xf32, #tpu.memory_space<vmem>>, vector<8x16xf32>
    tpu.vector_store %arg20[%c0_39, %c127], %43 {strides = array<i32>} : memref<8x324xf32, #tpu.memory_space<vmem>>, vector<8x16xf32>,
    %c0_40 = arith.constant 0 : index
    %c145 = arith.constant 145 : index
    %69 = vector.load %arg20[%c0_40, %c145] : memref<8x324xf32, #tpu.memory_space<vmem>>, vector<8x16xf32>
    tpu.vector_store %arg20[%c0_40, %c145], %45 {strides = array<i32>} : memref<8x324xf32, #tpu.memory_space<vmem>>, vector<8x16xf32>,
    %c0_41 = arith.constant 0 : index
    %c163 = arith.constant 163 : index
    %70 = vector.load %arg20[%c0_41, %c163] : memref<8x324xf32, #tpu.memory_space<vmem>>, vector<8x16xf32>
    tpu.vector_store %arg20[%c0_41, %c163], %47 {strides = array<i32>} : memref<8x324xf32, #tpu.memory_space<vmem>>, vector<8x16xf32>,
    %c0_42 = arith.constant 0 : index
    %c181 = arith.constant 181 : index
    %71 = vector.load %arg20[%c0_42, %c181] : memref<8x324xf32, #tpu.memory_space<vmem>>, vector<8x16xf32>
    tpu.vector_store %arg20[%c0_42, %c181], %49 {strides = array<i32>} : memref<8x324xf32, #tpu.memory_space<vmem>>, vector<8x16xf32>,
    %c0_43 = arith.constant 0 : index
    %c199 = arith.constant 199 : index
    %72 = vector.load %arg20[%c0_43, %c199] : memref<8x324xf32, #tpu.memory_space<vmem>>, vector<8x16xf32>
    tpu.vector_store %arg20[%c0_43, %c199], %51 {strides = array<i32>} : memref<8x324xf32, #tpu.memory_space<vmem>>, vector<8x16xf32>,
    %c0_44 = arith.constant 0 : index
    %c217 = arith.constant 217 : index
    %73 = vector.load %arg20[%c0_44, %c217] : memref<8x324xf32, #tpu.memory_space<vmem>>, vector<8x16xf32>
    tpu.vector_store %arg20[%c0_44, %c217], %53 {strides = array<i32>} : memref<8x324xf32, #tpu.memory_space<vmem>>, vector<8x16xf32>,
    %c0_45 = arith.constant 0 : index
    %c235 = arith.constant 235 : index
    %74 = vector.load %arg20[%c0_45, %c235] : memref<8x324xf32, #tpu.memory_space<vmem>>, vector<8x16xf32>
    tpu.vector_store %arg20[%c0_45, %c235], %55 {strides = array<i32>} : memref<8x324xf32, #tpu.memory_space<vmem>>, vector<8x16xf32>,
    %c0_46 = arith.constant 0 : index
    %c253 = arith.constant 253 : index
    %75 = vector.load %arg20[%c0_46, %c253] : memref<8x324xf32, #tpu.memory_space<vmem>>, vector<8x16xf32>
    tpu.vector_store %arg20[%c0_46, %c253], %57 {strides = array<i32>} : memref<8x324xf32, #tpu.memory_space<vmem>>, vector<8x16xf32>,
    %c0_47 = arith.constant 0 : index
    %c271 = arith.constant 271 : index
    %76 = vector.load %arg20[%c0_47, %c271] : memref<8x324xf32, #tpu.memory_space<vmem>>, vector<8x16xf32>
    tpu.vector_store %arg20[%c0_47, %c271], %59 {strides = array<i32>} : memref<8x324xf32, #tpu.memory_space<vmem>>, vector<8x16xf32>,
    %c0_48 = arith.constant 0 : index
    %c289 = arith.constant 289 : index
    %77 = vector.load %arg20[%c0_48, %c289] : memref<8x324xf32, #tpu.memory_space<vmem>>, vector<8x16xf32>
    tpu.vector_store %arg20[%c0_48, %c289], %61 {strides = array<i32>} : memref<8x324xf32, #tpu.memory_space<vmem>>, vector<8x16xf32>,
    %c0_49 = arith.constant 0 : index
    %c0_50 = arith.constant 0 : index
    %78 = vector.load %arg20[%c0_49, %c0_50] : memref<8x324xf32, #tpu.memory_space<vmem>>, vector<8x324xf32>
    %79 = vector.extract_strided_slice %78 {offsets = [0, 0], sizes = [8, 286], strides = [1, 1]} : vector<8x324xf32> to vector<8x286xf32>
    %80 = vector.extract_strided_slice %78 {offsets = [0, 1], sizes = [8, 286], strides = [1, 1]} : vector<8x324xf32> to vector<8x286xf32>
    %81 = vector.extract_strided_slice %78 {offsets = [0, 2], sizes = [8, 286], strides = [1, 1]} : vector<8x324xf32> to vector<8x286xf32>
    %82 = vector.extract_strided_slice %78 {offsets = [0, 18], sizes = [8, 286], strides = [1, 1]} : vector<8x324xf32> to vector<8x286xf32>
    %83 = vector.extract_strided_slice %78 {offsets = [0, 19], sizes = [8, 286], strides = [1, 1]} : vector<8x324xf32> to vector<8x286xf32>
    %84 = vector.extract_strided_slice %78 {offsets = [0, 20], sizes = [8, 286], strides = [1, 1]} : vector<8x324xf32> to vector<8x286xf32>
    %85 = vector.extract_strided_slice %78 {offsets = [0, 36], sizes = [8, 286], strides = [1, 1]} : vector<8x324xf32> to vector<8x286xf32>
    %86 = vector.extract_strided_slice %78 {offsets = [0, 37], sizes = [8, 286], strides = [1, 1]} : vector<8x324xf32> to vector<8x286xf32>
    %87 = vector.extract_strided_slice %78 {offsets = [0, 38], sizes = [8, 286], strides = [1, 1]} : vector<8x324xf32> to vector<8x286xf32>
    %88 = tpu.concatenate %79, %80, %81, %82, %83, %84, %85, %86, %87 in 0 : vector<8x286xf32>, vector<8x286xf32>, vector<8x286xf32>, vector<8x286xf32>, vector<8x286xf32>, vector<8x286xf32>, vector<8x286xf32>, vector<8x286xf32>, vector<8x286xf32> -> vector<72x286xf32>
    %c0_51 = arith.constant 0 : index
    %c0_52 = arith.constant 0 : index
    %89 = vector.load %arg5[%c0_51, %c0_52] : memref<16x72xf32, #tpu.memory_space<vmem>>, vector<16x72xf32>
    %cst_53 = arith.constant dense<0.000000e+00> : vector<16x286xf32>
    %90 = tpu.matmul %89, %88, %cst_53 {dimension_numbers = #tpu.dot_dimension_numbers<[1], [0], [0], [1], [0, 0, 1, 1], [], []>} : vector<16x72xf32>, vector<72x286xf32>, vector<16x286xf32> -> vector<16x286xf32>
    %c0_54 = arith.constant 0 : index
    %c0_55 = arith.constant 0 : index
    %91 = vector.load %arg6[%c0_54, %c0_55] : memref<16x1xf32, #tpu.memory_space<vmem>>, vector<16x1xf32>
    %92 = vector.broadcast %91 : vector<16x1xf32> to vector<16x286xf32>
    %93 = arith.mulf %90, %92 : vector<16x286xf32>
    %c0_56 = arith.constant 0 : index
    %c0_57 = arith.constant 0 : index
    %94 = vector.load %arg7[%c0_56, %c0_57] : memref<16x1xf32, #tpu.memory_space<vmem>>, vector<16x1xf32>
    %95 = vector.broadcast %94 : vector<16x1xf32> to vector<16x286xf32>
    %96 = arith.addf %93, %95 : vector<16x286xf32>
    %cst_58 = arith.constant 0.000000e+00 : f32
    %97 = vector.broadcast %cst_58 : f32 to vector<16x286xf32>
    %98 = arith.maximumf %96, %97 : vector<16x286xf32>
    %c0_59 = arith.constant 0 : index
    %c0_60 = arith.constant 0 : index
    %99 = vector.load %arg12[%c0_59, %c0_60] : memref<16x8xf32, #tpu.memory_space<vmem>>, vector<16x8xf32>
    %100 = vector.extract_strided_slice %98 {offsets = [0, 0], sizes = [16, 268], strides = [1, 1]} : vector<16x286xf32> to vector<16x268xf32>
    %101 = vector.extract_strided_slice %98 {offsets = [0, 18], sizes = [16, 268], strides = [1, 1]} : vector<16x286xf32> to vector<16x268xf32>
    %102 = arith.addf %100, %101 : vector<16x268xf32>
    %103 = vector.extract_strided_slice %102 {offsets = [0, 0], sizes = [16, 16], strides = [1, 1]} : vector<16x268xf32> to vector<16x16xf32>
    %cst_61 = arith.constant dense<0.000000e+00> : vector<16x8xf32>
    %104 = tpu.matmul %103, %99, %cst_61 {dimension_numbers = #tpu.dot_dimension_numbers<[1], [0], [0], [1], [0, 0, 1, 1], [], []>} : vector<16x16xf32>, vector<16x8xf32>, vector<16x8xf32> -> vector<16x8xf32>
    %105 = vector.extract_strided_slice %102 {offsets = [0, 36], sizes = [16, 16], strides = [1, 1]} : vector<16x268xf32> to vector<16x16xf32>
    %cst_62 = arith.constant dense<0.000000e+00> : vector<16x8xf32>
    %106 = tpu.matmul %105, %99, %cst_62 {dimension_numbers = #tpu.dot_dimension_numbers<[1], [0], [0], [1], [0, 0, 1, 1], [], []>} : vector<16x16xf32>, vector<16x8xf32>, vector<16x8xf32> -> vector<16x8xf32>
    %107 = vector.extract_strided_slice %102 {offsets = [0, 72], sizes = [16, 16], strides = [1, 1]} : vector<16x268xf32> to vector<16x16xf32>
    %cst_63 = arith.constant dense<0.000000e+00> : vector<16x8xf32>
    %108 = tpu.matmul %107, %99, %cst_63 {dimension_numbers = #tpu.dot_dimension_numbers<[1], [0], [0], [1], [0, 0, 1, 1], [], []>} : vector<16x16xf32>, vector<16x8xf32>, vector<16x8xf32> -> vector<16x8xf32>
    %109 = vector.extract_strided_slice %102 {offsets = [0, 108], sizes = [16, 16], strides = [1, 1]} : vector<16x268xf32> to vector<16x16xf32>
    %cst_64 = arith.constant dense<0.000000e+00> : vector<16x8xf32>
    %110 = tpu.matmul %109, %99, %cst_64 {dimension_numbers = #tpu.dot_dimension_numbers<[1], [0], [0], [1], [0, 0, 1, 1], [], []>} : vector<16x16xf32>, vector<16x8xf32>, vector<16x8xf32> -> vector<16x8xf32>
    %111 = vector.extract_strided_slice %102 {offsets = [0, 144], sizes = [16, 16], strides = [1, 1]} : vector<16x268xf32> to vector<16x16xf32>
    %cst_65 = arith.constant dense<0.000000e+00> : vector<16x8xf32>
    %112 = tpu.matmul %111, %99, %cst_65 {dimension_numbers = #tpu.dot_dimension_numbers<[1], [0], [0], [1], [0, 0, 1, 1], [], []>} : vector<16x16xf32>, vector<16x8xf32>, vector<16x8xf32> -> vector<16x8xf32>
    %113 = vector.extract_strided_slice %102 {offsets = [0, 180], sizes = [16, 16], strides = [1, 1]} : vector<16x268xf32> to vector<16x16xf32>
    %cst_66 = arith.constant dense<0.000000e+00> : vector<16x8xf32>
    %114 = tpu.matmul %113, %99, %cst_66 {dimension_numbers = #tpu.dot_dimension_numbers<[1], [0], [0], [1], [0, 0, 1, 1], [], []>} : vector<16x16xf32>, vector<16x8xf32>, vector<16x8xf32> -> vector<16x8xf32>
    %115 = vector.extract_strided_slice %102 {offsets = [0, 216], sizes = [16, 16], strides = [1, 1]} : vector<16x268xf32> to vector<16x16xf32>
    %cst_67 = arith.constant dense<0.000000e+00> : vector<16x8xf32>
    %116 = tpu.matmul %115, %99, %cst_67 {dimension_numbers = #tpu.dot_dimension_numbers<[1], [0], [0], [1], [0, 0, 1, 1], [], []>} : vector<16x16xf32>, vector<16x8xf32>, vector<16x8xf32> -> vector<16x8xf32>
    %117 = vector.extract_strided_slice %102 {offsets = [0, 252], sizes = [16, 16], strides = [1, 1]} : vector<16x268xf32> to vector<16x16xf32>
    %cst_68 = arith.constant dense<0.000000e+00> : vector<16x8xf32>
    %118 = tpu.matmul %117, %99, %cst_68 {dimension_numbers = #tpu.dot_dimension_numbers<[1], [0], [0], [1], [0, 0, 1, 1], [], []>} : vector<16x16xf32>, vector<16x8xf32>, vector<16x8xf32> -> vector<16x8xf32>
    %c0_69 = arith.constant 0 : index
    %c11 = arith.constant 11 : index
    %119 = vector.load %arg21[%c0_69, %c11] : memref<16x100xf32, #tpu.memory_space<vmem>>, vector<16x8xf32>
    tpu.vector_store %arg21[%c0_69, %c11], %104 {strides = array<i32>} : memref<16x100xf32, #tpu.memory_space<vmem>>, vector<16x8xf32>,
    %c0_70 = arith.constant 0 : index
    %c21 = arith.constant 21 : index
    %120 = vector.load %arg21[%c0_70, %c21] : memref<16x100xf32, #tpu.memory_space<vmem>>, vector<16x8xf32>
    tpu.vector_store %arg21[%c0_70, %c21], %106 {strides = array<i32>} : memref<16x100xf32, #tpu.memory_space<vmem>>, vector<16x8xf32>,
    %c0_71 = arith.constant 0 : index
    %c31 = arith.constant 31 : index
    %121 = vector.load %arg21[%c0_71, %c31] : memref<16x100xf32, #tpu.memory_space<vmem>>, vector<16x8xf32>
    tpu.vector_store %arg21[%c0_71, %c31], %108 {strides = array<i32>} : memref<16x100xf32, #tpu.memory_space<vmem>>, vector<16x8xf32>,
    %c0_72 = arith.constant 0 : index
    %c41 = arith.constant 41 : index
    %122 = vector.load %arg21[%c0_72, %c41] : memref<16x100xf32, #tpu.memory_space<vmem>>, vector<16x8xf32>
    tpu.vector_store %arg21[%c0_72, %c41], %110 {strides = array<i32>} : memref<16x100xf32, #tpu.memory_space<vmem>>, vector<16x8xf32>,
    %c0_73 = arith.constant 0 : index
    %c51 = arith.constant 51 : index
    %123 = vector.load %arg21[%c0_73, %c51] : memref<16x100xf32, #tpu.memory_space<vmem>>, vector<16x8xf32>
    tpu.vector_store %arg21[%c0_73, %c51], %112 {strides = array<i32>} : memref<16x100xf32, #tpu.memory_space<vmem>>, vector<16x8xf32>,
    %c0_74 = arith.constant 0 : index
    %c61 = arith.constant 61 : index
    %124 = vector.load %arg21[%c0_74, %c61] : memref<16x100xf32, #tpu.memory_space<vmem>>, vector<16x8xf32>
    tpu.vector_store %arg21[%c0_74, %c61], %114 {strides = array<i32>} : memref<16x100xf32, #tpu.memory_space<vmem>>, vector<16x8xf32>,
    %c0_75 = arith.constant 0 : index
    %c71 = arith.constant 71 : index
    %125 = vector.load %arg21[%c0_75, %c71] : memref<16x100xf32, #tpu.memory_space<vmem>>, vector<16x8xf32>
    tpu.vector_store %arg21[%c0_75, %c71], %116 {strides = array<i32>} : memref<16x100xf32, #tpu.memory_space<vmem>>, vector<16x8xf32>,
    %c0_76 = arith.constant 0 : index
    %c81 = arith.constant 81 : index
    %126 = vector.load %arg21[%c0_76, %c81] : memref<16x100xf32, #tpu.memory_space<vmem>>, vector<16x8xf32>
    tpu.vector_store %arg21[%c0_76, %c81], %118 {strides = array<i32>} : memref<16x100xf32, #tpu.memory_space<vmem>>, vector<16x8xf32>,
    %c0_77 = arith.constant 0 : index
    %c0_78 = arith.constant 0 : index
    %127 = vector.load %arg21[%c0_77, %c0_78] : memref<16x100xf32, #tpu.memory_space<vmem>>, vector<16x100xf32>
    %128 = vector.extract_strided_slice %127 {offsets = [0, 0], sizes = [16, 78], strides = [1, 1]} : vector<16x100xf32> to vector<16x78xf32>
    %129 = vector.extract_strided_slice %127 {offsets = [0, 1], sizes = [16, 78], strides = [1, 1]} : vector<16x100xf32> to vector<16x78xf32>
    %130 = vector.extract_strided_slice %127 {offsets = [0, 2], sizes = [16, 78], strides = [1, 1]} : vector<16x100xf32> to vector<16x78xf32>
    %131 = vector.extract_strided_slice %127 {offsets = [0, 10], sizes = [16, 78], strides = [1, 1]} : vector<16x100xf32> to vector<16x78xf32>
    %132 = vector.extract_strided_slice %127 {offsets = [0, 11], sizes = [16, 78], strides = [1, 1]} : vector<16x100xf32> to vector<16x78xf32>
    %133 = vector.extract_strided_slice %127 {offsets = [0, 12], sizes = [16, 78], strides = [1, 1]} : vector<16x100xf32> to vector<16x78xf32>
    %134 = vector.extract_strided_slice %127 {offsets = [0, 20], sizes = [16, 78], strides = [1, 1]} : vector<16x100xf32> to vector<16x78xf32>
    %135 = vector.extract_strided_slice %127 {offsets = [0, 21], sizes = [16, 78], strides = [1, 1]} : vector<16x100xf32> to vector<16x78xf32>
    %136 = vector.extract_strided_slice %127 {offsets = [0, 22], sizes = [16, 78], strides = [1, 1]} : vector<16x100xf32> to vector<16x78xf32>
    %137 = tpu.concatenate %128, %129, %130, %131, %132, %133, %134, %135, %136 in 0 : vector<16x78xf32>, vector<16x78xf32>, vector<16x78xf32>, vector<16x78xf32>, vector<16x78xf32>, vector<16x78xf32>, vector<16x78xf32>, vector<16x78xf32>, vector<16x78xf32> -> vector<144x78xf32>
    %c0_79 = arith.constant 0 : index
    %c0_80 = arith.constant 0 : index
    %138 = vector.load %arg8[%c0_79, %c0_80] : memref<16x144xf32, #tpu.memory_space<vmem>>, vector<16x144xf32>
    %cst_81 = arith.constant dense<0.000000e+00> : vector<16x78xf32>
    %139 = tpu.matmul %138, %137, %cst_81 {dimension_numbers = #tpu.dot_dimension_numbers<[1], [0], [0], [1], [0, 0, 1, 1], [], []>} : vector<16x144xf32>, vector<144x78xf32>, vector<16x78xf32> -> vector<16x78xf32>
    %c0_82 = arith.constant 0 : index
    %c0_83 = arith.constant 0 : index
    %140 = vector.load %arg9[%c0_82, %c0_83] : memref<16x1xf32, #tpu.memory_space<vmem>>, vector<16x1xf32>
    %141 = vector.broadcast %140 : vector<16x1xf32> to vector<16x78xf32>
    %142 = arith.mulf %139, %141 : vector<16x78xf32>
    %c0_84 = arith.constant 0 : index
    %c0_85 = arith.constant 0 : index
    %143 = vector.load %arg10[%c0_84, %c0_85] : memref<16x1xf32, #tpu.memory_space<vmem>>, vector<16x1xf32>
    %144 = vector.broadcast %143 : vector<16x1xf32> to vector<16x78xf32>
    %145 = arith.addf %142, %144 : vector<16x78xf32>
    %cst_86 = arith.constant 0.000000e+00 : f32
    %146 = vector.broadcast %cst_86 : f32 to vector<16x78xf32>
    %147 = arith.maximumf %145, %146 : vector<16x78xf32>
    %c0_87 = arith.constant 0 : index
    %c0_88 = arith.constant 0 : index
    %148 = vector.load %arg13[%c0_87, %c0_88] : memref<8x4xf32, #tpu.memory_space<vmem>>, vector<8x4xf32>
    %149 = vector.extract_strided_slice %147 {offsets = [0, 0], sizes = [16, 68], strides = [1, 1]} : vector<16x78xf32> to vector<16x68xf32>
    %150 = vector.extract_strided_slice %147 {offsets = [0, 10], sizes = [16, 68], strides = [1, 1]} : vector<16x78xf32> to vector<16x68xf32>
    %151 = arith.addf %149, %150 : vector<16x68xf32>
    %152 = vector.extract_strided_slice %151 {offsets = [0, 0], sizes = [16, 8], strides = [1, 1]} : vector<16x68xf32> to vector<16x8xf32>
    %cst_89 = arith.constant dense<0.000000e+00> : vector<16x4xf32>
    %153 = tpu.matmul %152, %148, %cst_89 {dimension_numbers = #tpu.dot_dimension_numbers<[1], [0], [0], [1], [0, 0, 1, 1], [], []>} : vector<16x8xf32>, vector<8x4xf32>, vector<16x4xf32> -> vector<16x4xf32>
    %154 = vector.extract_strided_slice %151 {offsets = [0, 20], sizes = [16, 8], strides = [1, 1]} : vector<16x68xf32> to vector<16x8xf32>
    %cst_90 = arith.constant dense<0.000000e+00> : vector<16x4xf32>
    %155 = tpu.matmul %154, %148, %cst_90 {dimension_numbers = #tpu.dot_dimension_numbers<[1], [0], [0], [1], [0, 0, 1, 1], [], []>} : vector<16x8xf32>, vector<8x4xf32>, vector<16x4xf32> -> vector<16x4xf32>
    %156 = vector.extract_strided_slice %151 {offsets = [0, 40], sizes = [16, 8], strides = [1, 1]} : vector<16x68xf32> to vector<16x8xf32>
    %cst_91 = arith.constant dense<0.000000e+00> : vector<16x4xf32>
    %157 = tpu.matmul %156, %148, %cst_91 {dimension_numbers = #tpu.dot_dimension_numbers<[1], [0], [0], [1], [0, 0, 1, 1], [], []>} : vector<16x8xf32>, vector<8x4xf32>, vector<16x4xf32> -> vector<16x4xf32>
    %158 = vector.extract_strided_slice %151 {offsets = [0, 60], sizes = [16, 8], strides = [1, 1]} : vector<16x68xf32> to vector<16x8xf32>
    %cst_92 = arith.constant dense<0.000000e+00> : vector<16x4xf32>
    %159 = tpu.matmul %158, %148, %cst_92 {dimension_numbers = #tpu.dot_dimension_numbers<[1], [0], [0], [1], [0, 0, 1, 1], [], []>} : vector<16x8xf32>, vector<8x4xf32>, vector<16x4xf32> -> vector<16x4xf32>
    %160 = tpu.concatenate %153, %155, %157, %159 in 1 : vector<16x4xf32>, vector<16x4xf32>, vector<16x4xf32>, vector<16x4xf32> -> vector<16x16xf32>
    %161 = vector.extract_strided_slice %160 {offsets = [0, 0], sizes = [1, 16], strides = [1, 1]} : vector<16x16xf32> to vector<1x16xf32>
    %162 = vector.extract_strided_slice %160 {offsets = [1, 0], sizes = [1, 16], strides = [1, 1]} : vector<16x16xf32> to vector<1x16xf32>
    %163 = vector.extract_strided_slice %160 {offsets = [2, 0], sizes = [1, 16], strides = [1, 1]} : vector<16x16xf32> to vector<1x16xf32>
    %164 = vector.extract_strided_slice %160 {offsets = [3, 0], sizes = [1, 16], strides = [1, 1]} : vector<16x16xf32> to vector<1x16xf32>
    %165 = vector.extract_strided_slice %160 {offsets = [4, 0], sizes = [1, 16], strides = [1, 1]} : vector<16x16xf32> to vector<1x16xf32>
    %166 = vector.extract_strided_slice %160 {offsets = [5, 0], sizes = [1, 16], strides = [1, 1]} : vector<16x16xf32> to vector<1x16xf32>
    %167 = vector.extract_strided_slice %160 {offsets = [6, 0], sizes = [1, 16], strides = [1, 1]} : vector<16x16xf32> to vector<1x16xf32>
    %168 = vector.extract_strided_slice %160 {offsets = [7, 0], sizes = [1, 16], strides = [1, 1]} : vector<16x16xf32> to vector<1x16xf32>
    %169 = vector.extract_strided_slice %160 {offsets = [8, 0], sizes = [1, 16], strides = [1, 1]} : vector<16x16xf32> to vector<1x16xf32>
    %170 = vector.extract_strided_slice %160 {offsets = [9, 0], sizes = [1, 16], strides = [1, 1]} : vector<16x16xf32> to vector<1x16xf32>
    %171 = vector.extract_strided_slice %160 {offsets = [10, 0], sizes = [1, 16], strides = [1, 1]} : vector<16x16xf32> to vector<1x16xf32>
    %172 = vector.extract_strided_slice %160 {offsets = [11, 0], sizes = [1, 16], strides = [1, 1]} : vector<16x16xf32> to vector<1x16xf32>
    %173 = vector.extract_strided_slice %160 {offsets = [12, 0], sizes = [1, 16], strides = [1, 1]} : vector<16x16xf32> to vector<1x16xf32>
    %174 = vector.extract_strided_slice %160 {offsets = [13, 0], sizes = [1, 16], strides = [1, 1]} : vector<16x16xf32> to vector<1x16xf32>
    %175 = vector.extract_strided_slice %160 {offsets = [14, 0], sizes = [1, 16], strides = [1, 1]} : vector<16x16xf32> to vector<1x16xf32>
    %176 = vector.extract_strided_slice %160 {offsets = [15, 0], sizes = [1, 16], strides = [1, 1]} : vector<16x16xf32> to vector<1x16xf32>
    %177 = tpu.concatenate %161, %162, %163, %164, %165, %166, %167, %168, %169, %170, %171, %172, %173, %174, %175, %176 in 1 : vector<1x16xf32>, vector<1x16xf32>, vector<1x16xf32>, vector<1x16xf32>, vector<1x16xf32>, vector<1x16xf32>, vector<1x16xf32>, vector<1x16xf32>, vector<1x16xf32>, vector<1x16xf32>, vector<1x16xf32>, vector<1x16xf32>, vector<1x16xf32>, vector<1x16xf32>, vector<1x16xf32>, vector<1x16xf32> -> vector<1x256xf32>
    %c0_93 = arith.constant 0 : index
    %c0_94 = arith.constant 0 : index
    %178 = vector.load %arg14[%c0_93, %c0_94] : memref<256x32xf32, #tpu.memory_space<vmem>>, vector<256x32xf32>
    %cst_95 = arith.constant dense<0.000000e+00> : vector<1x32xf32>
    %179 = tpu.matmul %177, %178, %cst_95 {dimension_numbers = #tpu.dot_dimension_numbers<[1], [0], [0], [1], [0, 0, 1, 1], [], []>} : vector<1x256xf32>, vector<256x32xf32>, vector<1x32xf32> -> vector<1x32xf32>
    %c0_96 = arith.constant 0 : index
    %c0_97 = arith.constant 0 : index
    %180 = vector.load %arg15[%c0_96, %c0_97] : memref<1x32xf32, #tpu.memory_space<vmem>>, vector<1x32xf32>
    %181 = arith.mulf %179, %180 : vector<1x32xf32>
    %c0_98 = arith.constant 0 : index
    %c0_99 = arith.constant 0 : index
    %182 = vector.load %arg16[%c0_98, %c0_99] : memref<1x32xf32, #tpu.memory_space<vmem>>, vector<1x32xf32>
    %183 = arith.addf %181, %182 : vector<1x32xf32>
    %cst_100 = arith.constant 0.000000e+00 : f32
    %184 = vector.broadcast %cst_100 : f32 to vector<1x32xf32>
    %185 = arith.maximumf %183, %184 : vector<1x32xf32>
    %c0_101 = arith.constant 0 : index
    %c0_102 = arith.constant 0 : index
    %186 = vector.load %arg17[%c0_101, %c0_102] : memref<32x10xf32, #tpu.memory_space<vmem>>, vector<32x10xf32>
    %cst_103 = arith.constant dense<0.000000e+00> : vector<1x10xf32>
    %187 = tpu.matmul %185, %186, %cst_103 {dimension_numbers = #tpu.dot_dimension_numbers<[1], [0], [0], [1], [0, 0, 1, 1], [], []>} : vector<1x32xf32>, vector<32x10xf32>, vector<1x10xf32> -> vector<1x10xf32>
    %c0_104 = arith.constant 0 : index
    %c0_105 = arith.constant 0 : index
    %188 = vector.load %arg18[%c0_104, %c0_105] : memref<1x10xf32, #tpu.memory_space<vmem>>, vector<1x10xf32>
    %189 = arith.addf %187, %188 : vector<1x10xf32>
    %c0_106 = arith.constant 0 : index
    %c0_107 = arith.constant 0 : index
    %c0_108 = arith.constant 0 : index
    %190 = vector.load %arg19[%c0_106, %c0_107, %c0_108] : memref<1x1x10xf32, #tpu.memory_space<vmem>>, vector<1x1x10xf32>
    %191 = vector.shape_cast %190 : vector<1x1x10xf32> to vector<1x10xf32>
    %192 = vector.shape_cast %189 : vector<1x10xf32> to vector<1x1x10xf32>
    tpu.vector_store %arg19[%c0_106, %c0_107, %c0_108], %192 {strides = array<i32>} : memref<1x1x10xf32, #tpu.memory_space<vmem>>, vector<1x1x10xf32>,
    return
  }
  func.func @transform_0(%arg0: i32) -> (i32, i32, i32) {
    %c0_i32 = arith.constant 0 : i32
    %c0_i32_0 = arith.constant 0 : i32
    %c0_i32_1 = arith.constant 0 : i32
    return %arg0, %c0_i32, %c0_i32_0 : i32, i32, i32
  }
  func.func @transform_1(%arg0: i32) -> (i32, i32) {
    %c0_i32 = arith.constant 0 : i32
    %c0_i32_0 = arith.constant 0 : i32
    %c0_i32_1 = arith.constant 0 : i32
    return %c0_i32, %c0_i32_0 : i32, i32
  }
  func.func @transform_2(%arg0: i32) -> (i32, i32) {
    %c0_i32 = arith.constant 0 : i32
    %c0_i32_0 = arith.constant 0 : i32
    %c0_i32_1 = arith.constant 0 : i32
    return %c0_i32, %c0_i32_0 : i32, i32
  }
  func.func @transform_3(%arg0: i32) -> (i32, i32) {
    %c0_i32 = arith.constant 0 : i32
    %c0_i32_0 = arith.constant 0 : i32
    %c0_i32_1 = arith.constant 0 : i32
    return %c0_i32, %c0_i32_0 : i32, i32
  }
  func.func @transform_4(%arg0: i32) -> (i32, i32) {
    %c0_i32 = arith.constant 0 : i32
    %c0_i32_0 = arith.constant 0 : i32
    %c0_i32_1 = arith.constant 0 : i32
    return %c0_i32, %c0_i32_0 : i32, i32
  }
  func.func @transform_5(%arg0: i32) -> (i32, i32) {
    %c0_i32 = arith.constant 0 : i32
    %c0_i32_0 = arith.constant 0 : i32
    %c0_i32_1 = arith.constant 0 : i32
    return %c0_i32, %c0_i32_0 : i32, i32
  }
  func.func @transform_6(%arg0: i32) -> (i32, i32) {
    %c0_i32 = arith.constant 0 : i32
    %c0_i32_0 = arith.constant 0 : i32
    %c0_i32_1 = arith.constant 0 : i32
    return %c0_i32, %c0_i32_0 : i32, i32
  }
  func.func @transform_7(%arg0: i32) -> (i32, i32) {
    %c0_i32 = arith.constant 0 : i32
    %c0_i32_0 = arith.constant 0 : i32
    %c0_i32_1 = arith.constant 0 : i32
    return %c0_i32, %c0_i32_0 : i32, i32
  }
  func.func @transform_8(%arg0: i32) -> (i32, i32) {
    %c0_i32 = arith.constant 0 : i32
    %c0_i32_0 = arith.constant 0 : i32
    %c0_i32_1 = arith.constant 0 : i32
    return %c0_i32, %c0_i32_0 : i32, i32
  }
  func.func @transform_9(%arg0: i32) -> (i32, i32) {
    %c0_i32 = arith.constant 0 : i32
    %c0_i32_0 = arith.constant 0 : i32
    %c0_i32_1 = arith.constant 0 : i32
    return %c0_i32, %c0_i32_0 : i32, i32
  }
  func.func @transform_10(%arg0: i32) -> (i32, i32) {
    %c0_i32 = arith.constant 0 : i32
    %c0_i32_0 = arith.constant 0 : i32
    %c0_i32_1 = arith.constant 0 : i32
    return %c0_i32, %c0_i32_0 : i32, i32
  }
  func.func @transform_11(%arg0: i32) -> (i32, i32) {
    %c0_i32 = arith.constant 0 : i32
    %c0_i32_0 = arith.constant 0 : i32
    %c0_i32_1 = arith.constant 0 : i32
    return %c0_i32, %c0_i32_0 : i32, i32
  }
  func.func @transform_12(%arg0: i32) -> (i32, i32) {
    %c0_i32 = arith.constant 0 : i32
    %c0_i32_0 = arith.constant 0 : i32
    %c0_i32_1 = arith.constant 0 : i32
    return %c0_i32, %c0_i32_0 : i32, i32
  }
  func.func @transform_13(%arg0: i32) -> (i32, i32) {
    %c0_i32 = arith.constant 0 : i32
    %c0_i32_0 = arith.constant 0 : i32
    %c0_i32_1 = arith.constant 0 : i32
    return %c0_i32, %c0_i32_0 : i32, i32
  }
  func.func @transform_14(%arg0: i32) -> (i32, i32) {
    %c0_i32 = arith.constant 0 : i32
    %c0_i32_0 = arith.constant 0 : i32
    %c0_i32_1 = arith.constant 0 : i32
    return %c0_i32, %c0_i32_0 : i32, i32
  }
  func.func @transform_15(%arg0: i32) -> (i32, i32) {
    %c0_i32 = arith.constant 0 : i32
    %c0_i32_0 = arith.constant 0 : i32
    %c0_i32_1 = arith.constant 0 : i32
    return %c0_i32, %c0_i32_0 : i32, i32
  }
  func.func @transform_16(%arg0: i32) -> (i32, i32) {
    %c0_i32 = arith.constant 0 : i32
    %c0_i32_0 = arith.constant 0 : i32
    %c0_i32_1 = arith.constant 0 : i32
    return %c0_i32, %c0_i32_0 : i32, i32
  }
  func.func @transform_17(%arg0: i32) -> (i32, i32) {
    %c0_i32 = arith.constant 0 : i32
    %c0_i32_0 = arith.constant 0 : i32
    %c0_i32_1 = arith.constant 0 : i32
    return %c0_i32, %c0_i32_0 : i32, i32
  }
  func.func @transform_18(%arg0: i32) -> (i32, i32, i32) {
    %c0_i32 = arith.constant 0 : i32
    %c0_i32_0 = arith.constant 0 : i32
    %c0_i32_1 = arith.constant 0 : i32
    return %arg0, %c0_i32, %c0_i32_0 : i32, i32, i32
  }
}

</mosaic_0001>

<bundles_post_ra>
// kernel: simple_cnn_3ch_forward.1
= control target key start
LH: loop header
LB: loop body
LE: loop exit
PB: predicated region body
PF: predicated region fallthrough
CT: control target
= control target key end

     0   :  { %s7028_s0 = inlined_call_operand.vmem [shape: f32[2,8,1156], index: 0, kind: input, shape index: {}]   ;;  %s7029_s1 = inlined_call_operand.vmem [shape: f32[8,72], index: 1, kind: input, shape index: {}]   ;;  %s7030_s2 = inlined_call_operand.vmem [shape: f32[8,1], index: 2, kind: input, shape index: {}]   ;;  %s7031_s3 = inlined_call_operand.vmem [shape: f32[8,1], index: 3, kind: input, shape index: {}]   ;;  %s7032_s4 = inlined_call_operand.vmem [shape: f32[16,72], index: 4, kind: input, shape index: {}]   ;;  %s7033_s5 = inlined_call_operand.vmem [shape: f32[16,1], index: 5, kind: input, shape index: {}]   ;;  %s7034_s6 = inlined_call_operand.vmem [shape: f32[16,1], index: 6, kind: input, shape index: {}]   ;;  %s7035_s7 = inlined_call_operand.vmem [shape: f32[16,144], index: 7, kind: input, shape index: {}]   ;;  %s7036_s8 = inlined_call_operand.vmem [shape: f32[16,1], index: 8, kind: input, shape index: {}]   ;;  %s7037_s9 = inlined_call_operand.vmem [shape: f32[16,1], index: 9, kind: input, shape index: {}]   ;;  %s7038_s10 = inlined_call_operand.vmem [shape: f32[32,16], index: 10, kind: input, shape index: {}]   ;;  %s7039_s11 = inlined_call_operand.vmem [shape: f32[16,8], index: 11, kind: input, shape index: {}]   ;;  %s7040_s12 = inlined_call_operand.vmem [shape: f32[8,4], index: 12, kind: input, shape index: {}]   ;;  %s7041_s13 = inlined_call_operand.vmem [shape: f32[256,32], index: 13, kind: input, shape index: {}]   ;;  %s7042_s14 = inlined_call_operand.vmem [shape: f32[1,32], index: 14, kind: input, shape index: {}]   ;;  %s7043_s15 = inlined_call_operand.vmem [shape: f32[1,32], index: 15, kind: input, shape index: {}]   ;;  %s7044_s16 = inlined_call_operand.vmem [shape: f32[32,10], index: 16, kind: input, shape index: {}]   ;;  %s7045_s17 = inlined_call_operand.vmem [shape: f32[1,10], index: 17, kind: input, shape index: {}]   ;;  %s7046_s18 = inlined_call_operand.hbm [shape: f32[2,1,10], index: 18, kind: output, shape index: {}]  }
   0x1   :  { %7087 = sst [smem:[#allocation12_spill]] %s7028_s0 }
   0x2   :  { %7088 = sst [smem:[#allocation13_spill]] %s7029_s1 }
   0x3   :  { %7089 = sst [smem:[#allocation14_spill]] %s7030_s2 }
   0x4   :  { %7090 = sst [smem:[#allocation15_spill]] %s7031_s3 }
   0x5   :  { %7091 = sst [smem:[#allocation16_spill]] %s7032_s4 }
   0x6   :  { %23 = vsyncpa [#allocation5], 0 }
   0x7   :  { %25 = vsyncpa [#allocation5 + $0x1], 0  ;;  %s6076_s27 = smov 0   ;;  %s6078_s28 = smov 0  }
   0x8   :  { %s6080_s29 = smov 0   ;;  %s6082_s30 = smov 0  }
   0x9 LB: > { %7092 = sst [smem:[#allocation7_spill]] %s5902_s27  ;;  %s6097_s0 = sadd.s32 4294967295, %s5914_s30   ;;  %s5914_s30 = sphi %s6082_s30, %s7128_s30   ;;  %s5910_s29 = sphi %s6080_s29, %s7130_s29   ;;  %s5906_s28 = sphi %s6078_s28, %s7132_s28   ;;  %s5902_s27 = sphi %s6076_s27, %s7131_s27  }
   0xa   : > { %7093 = sst [smem:[#allocation8_spill]] %s5910_s29  ;;  %s4629_s19 = sadd.s32 4294967294, %s5914_s30  }
   0xb   : > { %s6101_s1 = sadd.s32 1, %s5914_s30   ;;  %s421_s20 = sadd.s32 1, %s5910_s29 }
   0xc   : > { %7094 = sst [smem:[#allocation9_spill]] %s6101_s1  ;;  %s418_s21 = ssub.s32 %s5914_s30, %s6101_s1 }
   0xd   : > { %p431_p0 = scmp.ne.s32.totalorder %s5910_s29, %s5906_s28  ;;  %p419_p1 = scmp.eq.s32.totalorder %s418_s21, 0 }
   0xe   : > { %p432_p2 = scmp.eq.s32.totalorder %s6097_s0, 1  ;;  %p437_p3 = scmp.ne.s32.totalorder %s5906_s28, %s5902_s27 }
   0xf   : > { %p438_p4 = scmp.eq.s32.totalorder %s4629_s19, 1  ;;  %p4632_p7 = scmp.ge.s32.totalorder %s5914_s30, 1 }
  0x10   : > { %s6112_s22 = scalar_select %p419_p1, %s5910_s29, %s421_s20  }
  0x11   : > { %p6114_p5 = por %p432_p2, %p431_p0  ;;  %p6118_p6 = por %p438_p4, %p437_p3 }
  0x12   : > { %7095 = sst [smem:[#allocation10_spill]] %s6112_s22  ;;  %p515_p8 = scmp.lt.s32.totalorder %s5914_s30, 3 }
  0x13   : > { %s7097_s23 = scalar_select %p6118_p6, 1, 0 }
  0x14   : > { %p516_p9 = pnand %p4632_p7, %p515_p8 }
  0x15   : > { %7098 = sst [smem:[#allocation11_spill]] %s7097_s23  ;;  %p568_p10 = scmp.lt.s32.totalorder (!%p516_p9), %s6097_s0, 1  ;;  %v5923_v9 = vmov (!%p516_p9), 0.0   ;;  %v5925_v17 = vmov (!%p516_p9), 0   ;;  %vm617_vm0 = vcmask (!%p516_p9), 1039360   ;;  %vm653_vm1 = vcmask (!%p516_p9), 1031168  }
  0x16   : > { %519 = sbr.rel (%p516_p9) target bundleno = 3564 (0xdec), region = 92  ;;  %s7099_s20 = sld [smem:[#allocation12_spill]] (!%p516_p9)  ;;  %966 = vmatprep.mubr.f32.mxu0 (!%p516_p9), %v5923_v9  ;;  %573 = vst [vmem:[#allocation2] sm:$0xff] (!%p516_p9), %v5923_v9  ;;  %574 = vst [vmem:[#allocation2 + $0x8] sm:$0xff] (!%p516_p9), %v5923_v9  ;;  %1037 = vmatprep.mubr.f32.mxu1 (!%p516_p9), %v5923_v9  ;;  %vm689_vm2 = vcmask (!%p516_p9), 769024   ;;  %vm725_vm3 = vcmask (!%p516_p9), 760832  }
  0x17   : > { %s7047_s26 = smov (!%p516_p9), 94   ;;  %s7060_s19 = smov (!%p516_p9), 92   ;;  %5724 = vset.pattern.permute.xlu1 (!%p516_p9), %v5925_v17  ;;  %5725 = vset.pattern.permute.xlu0 (!%p516_p9), %v5925_v17  ;;  %vm761_vm4 = vcmask (!%p516_p9), 752640   ;;  %vm800_vm5 = vcmask (!%p516_p9), 490496   ;;  %vm839_vm6 = vcmask (!%p516_p9), 482304   ;;  %vm878_vm7 = vcmask (!%p516_p9), 474112  }
  0x18   : > { %s5922_s22 = smov (!%p516_p9), 59   ;;  %s7100_s29 = smov (!%p516_p9), 94   ;;  %vm898_vm8 = vcmask (!%p516_p9), 588800   ;;  %vm5927_vm9 = vmmov (!%p516_p9), 0   ;;  %vm7073_vm10 = vcmask (!%p516_p9), 261120   ;;  %vm2027_vm11 = vcmask (!%p516_p9), 228352  }
  0x19   : > { %s7105_s1 = sld [smem:[#allocation14_spill]] (!%p516_p9)  ;;  %s7106_s3 = sld [smem:[#allocation15_spill]] (!%p516_p9)  ;;  %vm2180_vm12 = vcmask (!%p516_p9), 162816   ;;  %vm2333_vm13 = vcmask (!%p516_p9), 97280   ;;  %vm2486_vm14 = vcmask (!%p516_p9), 31744   ;;  %vm2564_vm15 = vcmask (!%p516_p9), 285848  }
  0x1a   : > { %s5930_s23 = smov (!%p516_p9), 44   ;;  %s7067_s27 = smov (!%p516_p9), 96  }
  0x1b   : > { %s7110_s4 = sld [smem:[#allocation16_spill]] (!%p516_p9) }
  0x1d   : > { %s569_s24 = scalar_select %p568_p10, %s6097_s0, 1 }
  0x1f   : > { %s5480_s25 = smul.u32 80, %s569_s24  ;;  %s7050_s24 = smov 126   ;;  %v1256_v18 = vld [vmem:[%s7105_s1] sm:$0xff] }
  0x20   : > { %v1271_v19 = vld [vmem:[%s7106_s3] sm:$0xff]  ;;  %s7069_s1 = smov 88   ;;  %s7113_s3 = smov 20  }
  0x21   : > { %s6129_s21 = scalar_lea.vmem %s7099_s20, %s5480_s25  ;;  %s7058_s25 = smov 127  }
  0x22   : > { %v6132_v0 = vld [vmem:[%s6129_s21 + $0x8] sm:$0xff]  ;;  %v6135_v1 = vld [vmem:[%s6129_s21 + $0x10] sm:$0xff]  ;;  %v6138_v2 = vld [vmem:[%s6129_s21] sm:$0xff]  ;;  %s7052_s20 = smov 93  }
  0x23   : > { %v5594_v3 = vpack.i.bf16 %v6135_v1, %v6132_v0  ;;  %v6143_v4 = vld [vmem:[%s6129_s21 + $0x18] sm:$0xff]  ;;  %v6154_v6 = vld [vmem:[%s6129_s21 + $0x20] sm:$0xff]  ;;  %v6157_v7 = vld [vmem:[%s6129_s21 + $0x28] sm:$0xff] }
  0x24   : > { %v5589_v5 = vpack.i.bf16 %v6143_v4, %v6138_v2  ;;  %v5624_v8 = vpack.i.bf16 %v6157_v7, %v6154_v6  ;;  %v6185_v10 = vld [vmem:[%s6129_s21 + $0x30] sm:$0xff]  ;;  %v6188_v11 = vld [vmem:[%s6129_s21 + $0x38] sm:$0xff]  ;;  %v6202_v13 = vld [vmem:[%s6129_s21 + $0x40] sm:$0xff] }
  0x25   : > { %5595 = vrot.lane.b32.xlu1 %v5594_v3, %s7050_s24  ;;  %5585 = vrot.lane.b32.xlu0 %v5594_v3, %s7058_s25  ;;  %v5684_v12 = vpack.i.bf16 %v6188_v11, %v6185_v10  ;;  %v5709_v14 = vpack.i.bf16 %v6185_v10, %v6157_v7  ;;  %v5719_v15 = vpack.i.bf16 %v6202_v13, %v6188_v11  ;;  %v589_v16 = vld [vmem:[%s6129_s21 + $0x48] sm:$0xff]  ;;  %s7071_s21 = smov 112  }
  0x29   : > { %5600 = vrot.lane.b32.xlu1 %v5594_v3, %s7047_s26  ;;  %5590 = vrot.lane.b32.xlu0 %v5589_v5, %s7058_s25 }
  0x2d   : > { %5610 = vrot.lane.b32.xlu1 %v5589_v5, %s7047_s26  ;;  %5605 = vrot.lane.b32.xlu0 %v5589_v5, %s7050_s24  ;;  %s7054_s26 = smov 60  }
  0x31   : > { %5620 = vrot.lane.b32.xlu1 %v5594_v3, %s7060_s19  ;;  %5615 = vrot.lane.b32.xlu0 %v5594_v3, %s7052_s20 }
  0x35   : > { %5630 = vrot.lane.b32.xlu1 %v5589_v5, %s7052_s20  ;;  %5625 = vrot.lane.b32.xlu0 %v5624_v8, %s7058_s25 }
  0x39   : > { %5640 = vrot.lane.b32.xlu1 %v5594_v3, %s7054_s26  ;;  %5635 = vrot.lane.b32.xlu0 %v5589_v5, %s7060_s19 }
  0x3d   : > { %5650 = vrot.lane.b32.xlu1 %v5624_v8, %s7050_s24  ;;  %5645 = vrot.lane.b32.xlu0 %v5594_v3, %s5922_s22  ;;  %s7056_s24 = smov 58  }
  0x41   : > { %5660 = vrot.lane.b32.xlu1 %v5589_v5, %s7054_s26  ;;  %5655 = vrot.lane.b32.xlu0 %v5624_v8, %s7100_s29 }
  0x45   : > { %5670 = vrot.lane.b32.xlu1 %v5624_v8, %s7052_s20  ;;  %5665 = vrot.lane.b32.xlu0 %v5589_v5, %s5922_s22  ;;  %s7101_s20 = smov 126  }
  0x49   : > { %860 = vrot.lane.b32.xlu1 %v6132_v0, %s7056_s24  ;;  %5675 = vrot.lane.b32.xlu0 %v5624_v8, %s7060_s19 }
  0x4d   : > { %858 = vrot.lane.b32.xlu1 %v6138_v2, %s7056_s24  ;;  %862 = vrot.lane.b32.xlu0 %v6135_v1, %s7056_s24 }
  0x51   : > { %827 = vrot.lane.b32.xlu1 %v6154_v6, %s5922_s22  ;;  %5680 = vrot.lane.b32.xlu0 %v5624_v8, %s7054_s26  ;;  %s7102_s26 = smov 93  }
  0x55   : > { %864 = vrot.lane.b32.xlu1 %v6143_v4, %s7056_s24  ;;  %5685 = vrot.lane.b32.xlu0 %v5684_v12, %s7058_s25 }
  0x59   : > { %5690 = vrot.lane.b32.xlu1 %v5684_v12, %s7101_s20  ;;  %866 = vrot.lane.b32.xlu0 %v6154_v6, %s7056_s24  ;;  %s7103_s24 = smov 60  }
  0x5d   : > { %615 = vrot.lane.b32.xlu1 %v6202_v13, %s7058_s25  ;;  %5695 = vrot.lane.b32.xlu0 %v5684_v12, %s7100_s29  ;;  %s7104_s25 = smov 58  }
  0x61   : > { %5705 = vrot.lane.b32.xlu1 %v5684_v12, %s7060_s19  ;;  %5700 = vrot.lane.b32.xlu0 %v5684_v12, %s7102_s26 }
  0x65   : > { %687 = vrot.lane.b32.xlu1 %v6202_v13, %s7100_s29  ;;  %651 = vrot.lane.b32.xlu0 %v6202_v13, %s7101_s20 }
  0x69   : > { %5710 = vrot.lane.b32.xlu1 %v5709_v14, %s5922_s22  ;;  %792 = vrot.lane.b32.xlu0 %v6185_v10, %s7103_s24 }
  0x6d   : > { %759 = vrot.lane.b32.xlu1 %v6202_v13, %s7060_s19  ;;  %723 = vrot.lane.b32.xlu0 %v6202_v13, %s7102_s26  ;;  %s5933_s19 = smov 104   ;;  %s5934_s26 = smov 28  }
  0x71   : > { %870 = vrot.lane.b32.xlu1 %v6185_v10, %s7104_s25  ;;  %868 = vrot.lane.b32.xlu0 %v6157_v7, %s7104_s25 }
  0x75   : > { %5720 = vrot.lane.b32.xlu1 %v5719_v15, %s5922_s22  ;;  %5715 = vrot.lane.b32.xlu0 %v5719_v15, %s7103_s24 }
  0x79   : > { %874 = vrot.lane.b32.xlu1 %v6202_v13, %s7104_s25  ;;  %872 = vrot.lane.b32.xlu0 %v6188_v11, %s7104_s25 }
  0x7d   : > { %837 = vrot.lane.b32.xlu1 %v589_v16, %s5922_s22  ;;  %798 = vrot.lane.b32.xlu0 %v589_v16, %s7103_s24  ;;  %s7107_s22 = sld [smem:[#allocation13_spill]] }
  0x81   : > { %876 = vrot.lane.b32.xlu0 %v589_v16, %s7104_s25  ;;  %1259 = vperm.xlu1 %5724, %v1256_v18   ;;  %s5932_s25 = smov 36  }
  0x85   : > { %1274 = vperm.xlu0 %5725, %v1271_v19  }
  0x97   : > { %v6244_v20 = vpop.permute.xlu1 %5595  ;;  %v5586_v21 = vpop.permute.xlu0 %5585 }
  0x98   : > { %v5588_v22 = vunpack.i.h.bf16 %v5586_v21  ;;  %v5587_v23 = vunpack.i.l.bf16 %v5586_v21  ;;  %v5598_v24 = vunpack.i.h.bf16 %v6244_v20  ;;  %v5597_v25 = vunpack.i.l.bf16 %v6244_v20 }
  0x9a   : > { %v619_v26 = vsel %vm617_vm0, %v5587_v23, %v5588_v22  ;;  %v655_v34 = vsel %vm653_vm1, %v5597_v25, %v5598_v24 }
  0x9b   : > { %v6249_v27 = vpop.permute.xlu1 %5600  ;;  %v5591_v28 = vpop.permute.xlu0 %5590  ;;  %v5179_v29 = vpack.c.bf16 %v619_v26, %v6132_v0 }
  0x9c   : > { %v5603_v30 = vunpack.i.h.bf16 %v6249_v27  ;;  %v5602_v31 = vunpack.i.l.bf16 %v6249_v27  ;;  %v5592_v32 = vunpack.i.l.bf16 %v5591_v28  ;;  %v5593_v51 = vunpack.i.h.bf16 %v5591_v28 }
  0x9d   : > { %5180 = vmatprep.subr.bf16.mxu0 %v5179_v29 }
  0x9e   : > { %v618_v33 = vsel %vm617_vm0, %v5592_v32, %v5587_v23  ;;  %v691_v35 = vsel %vm689_vm2, %v5602_v31, %v5603_v30  ;;  %v620_v58 = vsel %vm617_vm0, %v5588_v22, %v5593_v51 }
  0x9f   : > { %v6261_v36 = vpop.permute.xlu1 %5610  ;;  %v6263_v37 = vpop.permute.xlu0 %5605  ;;  %v5181_v38 = vpack.c.bf16 %v618_v33, %v6138_v2  ;;  %v5183_v39 = vpack.c.bf16 %v691_v35, %v655_v34  ;;  %v5197_v2 = vpack.c.bf16 %v620_v58, %v6135_v1 }
  0xa0   : > { %v5612_v40 = vunpack.i.l.bf16 %v6261_v36  ;;  %v5607_v41 = vunpack.i.l.bf16 %v6263_v37  ;;  %v5613_v17 = vunpack.i.h.bf16 %v6261_v36  ;;  %v5608_v18 = vunpack.i.h.bf16 %v6263_v37 }
  0xa1   : > { %5182 = vmatpush1.bf16.msra.mxu0 %v5181_v38 }
  0xa2   : > { %5184 = vmatprep.subr.bf16.mxu0 %v5183_v39  ;;  %v654_v42 = vsel %vm653_vm1, %v5607_v41, %v5597_v25  ;;  %v690_v43 = vsel %vm689_vm2, %v5612_v40, %v5602_v31  ;;  %v656_v29 = vsel %vm653_vm1, %v5598_v24, %v5608_v18  ;;  %v692_v31 = vsel %vm689_vm2, %v5603_v30, %v5613_v17 }
  0xa3   : > { %v6270_v44 = vpop.permute.xlu1 %5620  ;;  %v6272_v45 = vpop.permute.xlu0 %5615  ;;  %v5185_v46 = vpack.c.bf16 %v690_v43, %v654_v42  ;;  %v5201_v38 = vpack.c.bf16 %v692_v31, %v656_v29 }
  0xa4   : > { %v5623_v47 = vunpack.i.h.bf16 %v6270_v44  ;;  %v5622_v48 = vunpack.i.l.bf16 %v6270_v44  ;;  %v5618_v49 = vunpack.i.h.bf16 %v6272_v45  ;;  %v5617_v50 = vunpack.i.l.bf16 %v6272_v45 }
  0xa5   : > { %5186 = vmatpush1.bf16.msra.mxu0 %v5185_v46 }
  0xa6   : > { %v727_v52 = vsel %vm725_vm3, %v5617_v50, %v5618_v49  ;;  %v763_v53 = vsel %vm761_vm4, %v5622_v48, %v5623_v47 }
  0xa7   : > { %v6284_v54 = vpop.permute.xlu1 %5630  ;;  %v6286_v55 = vpop.permute.xlu0 %5625  ;;  %v5187_v56 = vpack.c.bf16 %v763_v53, %v727_v52 }
  0xa8   : > { %v5627_v57 = vunpack.i.l.bf16 %v6286_v55  ;;  %v5632_v59 = vunpack.i.l.bf16 %v6284_v54  ;;  %v5633_v40 = vunpack.i.h.bf16 %v6284_v54 }
  0xa9   : > { %5188 = vmatprep.subr.bf16.mxu0 %v5187_v56 }
  0xaa   : > { %v621_v60 = vsel %vm617_vm0, %v5593_v51, %v5627_v57  ;;  %v726_v8 = vsel %vm725_vm3, %v5632_v59, %v5617_v50  ;;  %v728_v56 = vsel %vm725_vm3, %v5618_v49, %v5633_v40  ;;  %v6356_v59 = vld [vmem:[%s7107_s22] sm:$0xff]  ;;  %s7079_s22 = smov 20  }
  0xab   : > { %v6294_v61 = vpop.permute.xlu1 %5640  ;;  %v5636_v62 = vpop.permute.xlu0 %5635  ;;  %v5195_v63 = vpack.c.bf16 %v621_v60, %v6143_v4 }
  0xac   : > { %v5637_v0 = vunpack.i.l.bf16 %v5636_v62  ;;  %v5643_v3 = vunpack.i.h.bf16 %v6294_v61  ;;  %v5642_v5 = vunpack.i.l.bf16 %v6294_v61  ;;  %v5638_v24 = vunpack.i.h.bf16 %v5636_v62 }
  0xad   : > { %5196 = vmatprep.subr.bf16.mxu1 %v5195_v63 }
  0xae   : > { %5198 = vmatpush1.bf16.msra.mxu1 %v5197_v2  ;;  %v762_v12 = vsel %vm761_vm4, %v5637_v0, %v5622_v48  ;;  %v802_v21 = vsel %vm800_vm5, %v5642_v5, %v5643_v3  ;;  %v764_v48 = vsel %vm761_vm4, %v5623_v47, %v5638_v24  ;;  %v5628_v0 = vunpack.i.h.bf16 %v6286_v55 }
  0xaf   : > { %v6302_v14 = vpop.permute.xlu1 %5650  ;;  %v6304_v15 = vpop.permute.xlu0 %5645  ;;  %v5189_v16 = vpack.c.bf16 %v762_v12, %v726_v8  ;;  %v5205_v47 = vpack.c.bf16 %v764_v48, %v728_v56 }
  0xb0   : > { %v5648_v4 = vunpack.i.h.bf16 %v6304_v15  ;;  %v5647_v1 = vunpack.i.l.bf16 %v6304_v15  ;;  %v5652_v19 = vunpack.i.l.bf16 %v6302_v14 }
  0xb1   : > { %5190 = vmatpush1.bf16.msra.mxu0 %v5189_v16 }
  0xb2   : > { %v841_v22 = vsel %vm839_vm6, %v5647_v1, %v5648_v4  ;;  %v657_v33 = vsel %vm653_vm1, %v5608_v18, %v5652_v19 }
  0xb3   : > { %v5661_v23 = vpop.permute.xlu1 %5660  ;;  %v6315_v25 = vpop.permute.xlu0 %5655  ;;  %v5191_v26 = vpack.c.bf16 %v841_v22, %v802_v21 }
  0xb4   : > { %v5657_v28 = vunpack.i.l.bf16 %v6315_v25  ;;  %v5662_v32 = vunpack.i.l.bf16 %v5661_v23  ;;  %v5663_v62 = vunpack.i.h.bf16 %v5661_v23  ;;  %v5658_v31 = vunpack.i.h.bf16 %v6315_v25 }
  0xb5   : > { %5192 = vmatprep.subr.bf16.mxu0 %v5191_v26 }
  0xb6   : > { %v693_v34 = vsel %vm689_vm2, %v5613_v17, %v5657_v28  ;;  %v801_v30 = vsel %vm800_vm5, %v5662_v32, %v5642_v5  ;;  %v5653_v32 = vunpack.i.h.bf16 %v6302_v14 }
  0xb7   : > { %v6330_v35 = vpop.permute.xlu1 %5670  ;;  %v5666_v36 = vpop.permute.xlu0 %5665  ;;  %v5199_v37 = vpack.c.bf16 %v693_v34, %v657_v33 }
  0xb8   : > { %v5667_v20 = vunpack.i.l.bf16 %v5666_v36  ;;  %v5672_v27 = vunpack.i.l.bf16 %v6330_v35  ;;  %v5668_v60 = vunpack.i.h.bf16 %v5666_v36 }
  0xb9   : > { %5200 = vmatprep.subr.bf16.mxu1 %v5199_v37  ;;  %v694_v37 = vsel %vm689_vm2, %v5657_v28, %v5658_v31 }
  0xba   : > { %5202 = vmatpush1.bf16.msra.mxu1 %v5201_v38  ;;  %v840_v39 = vsel %vm839_vm6, %v5667_v20, %v5647_v1  ;;  %v729_v50 = vsel %vm725_vm3, %v5633_v40, %v5672_v27  ;;  %v842_v2 = vsel %vm839_vm6, %v5648_v4, %v5668_v60  ;;  %v803_v1 = vsel %vm800_vm5, %v5643_v3, %v5663_v62 }
  0xbb   : > { %v861_v41 = vpop.permute.xlu1 %860  ;;  %v6336_v42 = vpop.permute.xlu0 %5675  ;;  %v5193_v43 = vpack.c.bf16 %v840_v39, %v801_v30  ;;  %v5209_v18 = vpack.c.bf16 %v842_v2, %v803_v1  ;;  %v622_v4 = vsel %vm617_vm0, %v5627_v57, %v5628_v0  ;;  %v658_v40 = vsel %vm653_vm1, %v5652_v19, %v5653_v32 }
  0xbc   : > { %v5677_v46 = vunpack.i.l.bf16 %v6336_v42  ;;  %v5213_v3 = vpack.c.bf16 %v622_v4, %v6154_v6  ;;  %v5678_v20 = vunpack.i.h.bf16 %v6336_v42 }
  0xbd   : > { %5194 = vmatpush1.bf16.msra.mxu0 %v5193_v43 }
  0xbe   : > { %v765_v51 = vsel %vm761_vm4, %v5638_v24, %v5677_v46 }
  0xbf   : > { %v859_v52 = vpop.permute.xlu1 %858  ;;  %v863_v53 = vpop.permute.xlu0 %862  ;;  %v5203_v54 = vpack.c.bf16 %v765_v51, %v729_v50 }
  0xc0   : > { %v880_v58 = vsel %vm878_vm7, %v861_v41, %v863_v53  ;;  %v879_v44 = vsel %vm878_vm7, %v859_v52, %v861_v41  ;;  %v5673_v41 = vunpack.i.h.bf16 %v6330_v35 }
  0xc1   : > { %918 = vmatprep.subr.mxu0 %v880_v58  ;;  %5204 = vmatprep.subr.bf16.mxu1 %v5203_v54 }
  0xc2   : > { %919 = vmatpush1.msra.mxu0 %v879_v44  ;;  %5206 = vmatpush1.bf16.msra.mxu1 %v5205_v47 }
  0xc3   : > { %v6358_v45 = vpop.permute.xlu1 %827  ;;  %v6360_v49 = vpop.permute.xlu0 %5680  ;;  %4634 = vmatmul.mubr.msk.f32.vlgmr.msra.gmra.mrb[0].mxu0 %vm898_vm8, %v6356_v59 }
  0xc4   : > { %v5682_v63 = vunpack.i.l.bf16 %v6360_v49  ;;  %1108 = vmatprep.mubr.f32.mxu0 %v5923_v9  ;;  %v843_v5 = vsel %vm839_vm6, %v5668_v60, %v6358_v45 }
  0xc6   : > { %v804_v8 = vsel %vm800_vm5, %v5663_v62, %v5682_v63 }
  0xc7   : > { %v865_v12 = vpop.permute.xlu1 %864  ;;  %v5686_v15 = vpop.permute.xlu0 %5685  ;;  %v5207_v16 = vpack.c.bf16 %v843_v5, %v804_v8 }
  0xc8   : > { %v5687_v17 = vunpack.i.l.bf16 %v5686_v15  ;;  %v5688_v22 = vunpack.i.h.bf16 %v5686_v15  ;;  %v881_v55 = vsel %vm878_vm7, %v863_v53, %v865_v12  ;;  %v730_v53 = vsel %vm725_vm3, %v5672_v27, %v5673_v41 }
  0xc9   : > { %5208 = vmatprep.subr.bf16.mxu1 %v5207_v16  ;;  %v5683_v27 = vunpack.i.h.bf16 %v6360_v49 }
  0xca   : > { %5210 = vmatpush1.bf16.msra.mxu1 %v5209_v18  ;;  %v623_v21 = vsel %vm617_vm0, %v5628_v0, %v5687_v17  ;;  %v624_v33 = vsel %vm617_vm0, %v5687_v17, %v5688_v22 }
  0xcb   : > { %v5691_v23 = vpop.permute.xlu1 %5690  ;;  %v6380_v26 = vpop.permute.xlu0 %866  ;;  %v5211_v29 = vpack.c.bf16 %v623_v21, %v6157_v7  ;;  %v5229_v24 = vpack.c.bf16 %v624_v33, %v6185_v10  ;;  %v766_v10 = vsel %vm761_vm4, %v5677_v46, %v5678_v20  ;;  %v805_v16 = vsel %vm800_vm5, %v5682_v63, %v5683_v27 }
  0xcc   : > { %v882_v61 = vsel %vm878_vm7, %v865_v12, %v6380_v26  ;;  %v5692_v57 = vunpack.i.l.bf16 %v5691_v23  ;;  %v5693_v52 = vunpack.i.h.bf16 %v5691_v23  ;;  %v5221_v47 = vpack.c.bf16 %v766_v10, %v730_v53 }
  0xcd   : > { %989 = vmatprep.subr.mxu1 %v882_v61  ;;  %5212 = vmatprep.subr.bf16.mxu0 %v5211_v29 }
  0xce   : > { %990 = vmatpush1.msra.mxu1 %v881_v55  ;;  %5214 = vmatpush1.bf16.msra.mxu0 %v5213_v3  ;;  %v659_v30 = vsel %vm653_vm1, %v5653_v32, %v5692_v57  ;;  %v660_v60 = vsel %vm653_vm1, %v5692_v57, %v5693_v52 }
  0xcf   : > { %v6390_v34 = vpop.permute.xlu1 %615  ;;  %v5696_v7 = vpop.permute.xlu0 %5695  ;;  %4635 = vmatmul.mubr.msk.f32.vlgmr.msra.gmra.mrb[0].mxu1 %vm898_vm8, %v6356_v59 }
  0xd0   : > { %v625_v6 = vsel %vm617_vm0, %v5688_v22, %v6390_v34  ;;  %v5697_v36 = vunpack.i.l.bf16 %v5696_v7  ;;  %1179 = vmatprep.mubr.f32.mxu1 %v5923_v9  ;;  %v5698_v43 = vunpack.i.h.bf16 %v5696_v7  ;;  %v5244_v33 = vpack.c.bf16 %v6390_v34, %v6202_v13 }
  0xd1   : > { %v5227_v38 = vpack.c.bf16 %v625_v6, %v6188_v11  ;;  %v5217_v11 = vpack.c.bf16 %v694_v37, %v658_v40 }
  0xd2   : > { %v695_v39 = vsel %vm689_vm2, %v5658_v31, %v5697_v36  ;;  %v696_v54 = vsel %vm689_vm2, %v5697_v36, %v5698_v43  ;;  %v5926_v36 = vmov 0.0|0.0  }
  0xd3   : > { %v5706_v25 = vpop.permute.xlu1 %5705  ;;  %v5701_v48 = vpop.permute.xlu0 %5700  ;;  %5228 = vmatprep.subr.bf16.mxu1 %v5227_v38  ;;  %v5215_v28 = vpack.c.bf16 %v695_v39, %v659_v30  ;;  %v5233_v62 = vpack.c.bf16 %v696_v54, %v660_v60  ;;  %v1295_v54 = vld [vmem:[%s7038_s10] sm:$0xff] }
  0xd4   : > { %v5707_v50 = vunpack.i.l.bf16 %v5706_v25  ;;  %v5702_v51 = vunpack.i.l.bf16 %v5701_v48  ;;  %5230 = vmatpush1.bf16.msra.mxu1 %v5229_v24  ;;  %v5708_v0 = vunpack.i.h.bf16 %v5706_v25  ;;  %v5703_v2 = vunpack.i.h.bf16 %v5701_v48 }
  0xd5   : > { %5216 = vmatprep.subr.bf16.mxu0 %v5215_v28 }
  0xd6   : > { %5218 = vmatpush1.bf16.msra.mxu0 %v5217_v11  ;;  %v731_v14 = vsel %vm725_vm3, %v5673_v41, %v5702_v51  ;;  %v767_v19 = vsel %vm761_vm4, %v5678_v20, %v5707_v50  ;;  %v768_v4 = vsel %vm761_vm4, %v5707_v50, %v5708_v0  ;;  %v732_v21 = vsel %vm725_vm3, %v5702_v51, %v5703_v2 }
  0xd7   : > { %v6418_v56 = vpop.permute.xlu1 %687  ;;  %v6420_v58 = vpop.permute.xlu0 %651  ;;  %v5219_v42 = vpack.c.bf16 %v767_v19, %v731_v14 }
  0xd8   : > { %v697_v46 = vsel %vm689_vm2, %v5698_v43, %v6418_v56  ;;  %v661_v44 = vsel %vm653_vm1, %v5693_v52, %v6420_v58  ;;  %v5247_v13 = vpack.c.bf16 %v6418_v56, %v6420_v58  ;;  %v1296_v56 = vld [vmem:[%s7038_s10 + $0x8] sm:$0xff] }
  0xd9   : > { %5220 = vmatprep.subr.bf16.mxu0 %v5219_v42  ;;  %v5231_v35 = vpack.c.bf16 %v697_v46, %v661_v44  ;;  %v6480_v58 = vpack.c.bf16 %v1296_v56, %v1295_v54  ;;  %v1298_v42 = vld [vmem:[%s7038_s10 + $0x18] sm:$0xff] }
  0xda   : > { %5222 = vmatpush1.bf16.msra.mxu0 %v5221_v47 }
  0xdb   : > { %v5711_v5 = vpop.permute.xlu1 %5710  ;;  %v793_v8 = vpop.permute.xlu0 %792  ;;  %5232 = vmatprep.subr.bf16.mxu1 %v5231_v35 }
  0xdc   : > { %v5713_v12 = vunpack.i.h.bf16 %v5711_v5  ;;  %v5712_v15 = vunpack.i.l.bf16 %v5711_v5  ;;  %5234 = vmatpush1.bf16.msra.mxu1 %v5233_v62  ;;  %v806_v17 = vsel %vm800_vm5, %v5683_v27, %v793_v8 }
  0xde   : > { %v844_v1 = vsel %vm839_vm6, %v6358_v45, %v5712_v15  ;;  %v845_v18 = vsel %vm839_vm6, %v5712_v15, %v5713_v12  ;;  %v5237_v45 = vpack.c.bf16 %v768_v4, %v732_v21 }
  0xdf   : > { %v760_v22 = vpop.permute.xlu1 %759  ;;  %v724_v23 = vpop.permute.xlu0 %723  ;;  %v5223_v29 = vpack.c.bf16 %v845_v18, %v806_v17  ;;  %v5225_v61 = vpack.c.bf16 %v844_v1, %v805_v16 }
  0xe0   : > { %v769_v3 = vsel %vm761_vm4, %v5708_v0, %v760_v22  ;;  %v733_v49 = vsel %vm725_vm3, %v5703_v2, %v724_v23  ;;  %v5250_v28 = vpack.c.bf16 %v760_v22, %v724_v23  ;;  %vm2570_vm3 = vcmask 433448  }
  0xe1   : > { %5224 = vmatprep.subr.bf16.mxu0 %v5223_v29  ;;  %v5235_v63 = vpack.c.bf16 %v769_v3, %v733_v49 }
  0xe2   : > { %5226 = vmatpush1.bf16.msra.mxu0 %v5225_v61 }
  0xe3   : > { %v871_v31 = vpop.permute.xlu1 %870  ;;  %v869_v55 = vpop.permute.xlu0 %868  ;;  %5236 = vmatprep.subr.bf16.mxu1 %v5235_v63 }
  0xe4   : > { %5238 = vmatpush1.bf16.msra.mxu1 %v5237_v45  ;;  %v884_v57 = vsel %vm878_vm7, %v869_v55, %v871_v31  ;;  %v883_v32 = vsel %vm878_vm7, %v6380_v26, %v869_v55 }
  0xe5   : > { %1060 = vmatprep.subr.mxu0 %v884_v57 }
  0xe6   : > { %1061 = vmatpush1.msra.mxu0 %v883_v32 }
  0xe7   : > { %v5721_v7 = vpop.permute.xlu1 %5720  ;;  %v5716_v6 = vpop.permute.xlu0 %5715  ;;  %4636 = vmatmul.mubr.msk.f32.vlgmr.msra.gmra.mrb[2].mxu0 %vm898_vm8, %v6356_v59  ;;  %5243 = vmatprep.subr.bf16.mxu0 %v5926_v36 }
  0xe8   : > { %v5723_v37 = vunpack.i.h.bf16 %v5721_v7  ;;  %v5722_v20 = vunpack.i.l.bf16 %v5721_v7  ;;  %v5718_v38 = vunpack.i.h.bf16 %v5716_v6  ;;  %v5717_v24 = vunpack.i.l.bf16 %v5716_v6  ;;  %5245 = vmatpush3.bf16.msra.mxu0 %v5244_v33  ;;  %4892 = vmatprep.mubr.msk.f32.mxu0 %vm5927_vm9, %v5923_v9 }
  0xe9   : > { %5246 = vmatprep.subr.bf16.mxu0 %v5926_v36 }
  0xea   : > { %v846_v26 = vsel %vm839_vm6, %v5713_v12, %v5722_v20  ;;  %v807_v34 = vsel %vm800_vm5, %v793_v8, %v5717_v24  ;;  %v808_v30 = vsel %vm800_vm5, %v5717_v24, %v5718_v38  ;;  %v847_v39 = vsel %vm839_vm6, %v5722_v20, %v5723_v37 }
  0xeb   : > { %v875_v40 = vpop.permute.xlu1 %874  ;;  %v873_v41 = vpop.permute.xlu0 %872  ;;  %v5239_v43 = vpack.c.bf16 %v847_v39, %v808_v30  ;;  %v5241_v25 = vpack.c.bf16 %v846_v26, %v807_v34 }
  0xec   : > { %5248 = vmatpush3.bf16.msra.mxu0 %v5247_v13  ;;  %v886_v48 = vsel %vm878_vm7, %v873_v41, %v875_v40  ;;  %v885_v14 = vsel %vm878_vm7, %v871_v31, %v873_v41 }
  0xed   : > { %5240 = vmatprep.subr.bf16.mxu1 %v5239_v43  ;;  %5249 = vmatprep.subr.bf16.mxu0 %v5926_v36 }
  0xee   : > { %5242 = vmatpush1.bf16.msra.mxu1 %v5241_v25 }
  0xef   : > { %v838_v50 = vpop.permute.xlu1 %837  ;;  %v799_v51 = vpop.permute.xlu0 %798  ;;  %1131 = vmatprep.subr.mxu1 %v886_v48 }
  0xf0   : > { %v848_v11 = vsel %vm839_vm6, %v5723_v37, %v838_v50  ;;  %v809_v10 = vsel %vm800_vm5, %v5718_v38, %v799_v51  ;;  %5251 = vmatpush3.bf16.msra.mxu0 %v5250_v28  ;;  %vm2576_vm5 = vcmask 581048   ;;  %vm2582_vm6 = vcmask 728648  }
  0xf1   : > { %v5253_v52 = vpack.c.bf16 %v848_v11, %v809_v10  ;;  %5252 = vmatprep.subr.bf16.mxu0 %v5926_v36 }
  0xf2   : > { %1132 = vmatpush1.msra.mxu1 %v885_v14 }
  0xf3   : > { %4637 = vmatmul.mubr.msk.f32.vlgmr.msra.gmra.mrb[2].mxu1 %vm898_vm8, %v6356_v59  ;;  %5255 = vmatprep.subr.bf16.mxu1 %v5926_v36  ;;  %v877_v19 = vpop.permute.xlu0 %876 }
  0xf4   : > { %5254 = vmatpush3.bf16.msra.mxu0 %v5253_v52  ;;  %4903 = vmatprep.mubr.msk.f32.mxu1 %vm5927_vm9, %v5923_v9  ;;  %v887_v53 = vsel %vm878_vm7, %v875_v40, %v877_v19  ;;  %vm2588_vm7 = vcmask 876248  }
  0xf5   : > { %4890 = vmatprep.subr.mxu0 %v5923_v9  ;;  %5257 = vmatpush3.bf16.msra.mxu1 %v6480_v58 }
  0xf6   : > { %5258 = vmatprep.subr.bf16.mxu1 %v5926_v36 }
  0xf8   : > { %4891 = vmatpush3.msra.mxu0 %v887_v53 }
  0xf9   : > { %4893 = vmatmul.mubr.msk.f32.vlgmr.msra.gmra.mrb[4].mxu0 %vm898_vm8, %v6356_v59  ;;  %5273 = vmatprep.subr.bf16.mxu0 %v5926_v36  ;;  %v1297_v59 = vld [vmem:[%s7038_s10 + $0x10] sm:$0xff] }
  0xfa   : > { %4936 = vmatprep.mubr.msk.f32.mxu0 %vm5927_vm9, %v5923_v9  ;;  %5275 = vmatpush3.bf16.msra.mxu0 %v6480_v58  ;;  %v6492_v46 = vpack.c.bf16 %v1298_v42, %v1297_v59 }
  0xfb   : > { %5276 = vmatprep.subr.bf16.mxu0 %v5926_v36 }
  0xfc   : > { %5260 = vmatpush3.bf16.msra.mxu1 %v6492_v46 }
  0xfd   : > { %5261 = vmatprep.subr.bf16.mxu1 %v5926_v36 }
  0xfe   : > { %5278 = vmatpush3.bf16.msra.mxu0 %v6492_v46 }
  0xff   : > { %5285 = vmatprep.subr.bf16.mxu0 %v5926_v36 }
 0x100   : > { %v1260_v44 = vpop.permute.xlu1 %1259 }
 0x104   : > { %v1275_v60 = vpop.permute.xlu0 %1274 }
 0x196   : > { %v968_v47 = vpop.f32.mrb[0].mxu0 }
 0x197   : > { %v1262_v35 = vmul.f32 %v1260_v44, %v968_v47  ;;  %v970_v27 = vpop.f32.mrb[1].mxu0 }
 0x198   : > { %v1263_v62 = vmul.f32 %v1260_v44, %v970_v27 }
 0x199   : > { %v1277_v0 = vadd.f32 %v1275_v60, %v1262_v35 }
 0x19a   : > { %v1278_v2 = vadd.f32 %v1275_v60, %v1263_v62 }
 0x19b   : > { %v1286_v5 = vmax.f32 %v1277_v0, 0.0 }
 0x19c   : > { %v1287_v8 = vmax.f32 %v1278_v2, 0.0 }
 0x19d   : > { %1308 = vrot.lane.b32.xlu1 %v1286_v5, %s7100_s29 }
 0x1a1   : > { %1310 = vrot.lane.b32.xlu1 %v1287_v8, %s7100_s29 }
 0x1a2   : > { %v1039_v12 = vpop.f32.mrb[0].mxu1 }
 0x1a3   : > { %v1264_v15 = vmul.f32 %v1260_v44, %v1039_v12  ;;  %v1041_v16 = vpop.f32.mrb[1].mxu1 }
 0x1a4   : > { %v1265_v1 = vmul.f32 %v1260_v44, %v1041_v16 }
 0x1a5   : > { %v1279_v17 = vadd.f32 %v1275_v60, %v1264_v15 }
 0x1a6   : > { %v1280_v18 = vadd.f32 %v1275_v60, %v1265_v1 }
 0x1a7   : > { %v1288_v4 = vmax.f32 %v1279_v17, 0.0  ;;  %v6601_v17 = vld [vmem:[#allocation2] sm:$0xff] }
 0x1a8   : > { %v1289_v21 = vmax.f32 %v1280_v18, 0.0 }
 0x1a9   : > { %1312 = vrot.lane.b32.xlu0 %v1288_v4, %s7100_s29 }
 0x1aa   : > { %1314 = vrot.lane.b32.xlu1 %v1289_v21, %s7100_s29 }
 0x1ba   : > { %v1110_v22 = vpop.f32.mrb[2].mxu0 }
 0x1bb   : > { %v1266_v23 = vmul.f32 %v1260_v44, %v1110_v22  ;;  %v1112_v29 = vpop.f32.mrb[3].mxu0 }
 0x1bc   : > { %v1267_v61 = vmul.f32 %v1260_v44, %v1112_v29 }
 0x1bd   : > { %v1281_v3 = vadd.f32 %v1275_v60, %v1266_v23 }
 0x1be   : > { %v6502_v49 = vadd.f32 %v1275_v60, %v1267_v61 }
 0x1bf   : > { %v1290_v63 = vmax.f32 %v1281_v3, 0.0 }
 0x1c0   : > { %v1291_v45 = vmax.f32 %v6502_v49, 0.0 }
 0x1c1   : > { %1316 = vrot.lane.b32.xlu0 %v1290_v63, %s7100_s29 }
 0x1c2   : > { %1318 = vrot.lane.b32.xlu1 %v1291_v45, %s7100_s29 }
 0x1c6   : > { %v1181_v31 = vpop.f32.mrb[2].mxu1 }
 0x1c7   : > { %v1268_v55 = vmul.f32 %v1260_v44, %v1181_v31  ;;  %v1183_v57 = vpop.f32.mrb[3].mxu1 }
 0x1c8   : > { %v1269_v32 = vmul.f32 %v1260_v44, %v1183_v57 }
 0x1c9   : > { %v1283_v33 = vadd.f32 %v1275_v60, %v1268_v55 }
 0x1ca   : > { %v6507_v7 = vadd.f32 %v1275_v60, %v1269_v32 }
 0x1cb   : > { %v1292_v6 = vmax.f32 %v1283_v33, 0.0 }
 0x1cc   : > { %v1293_v37 = vmax.f32 %v6507_v7, 0.0  ;;  %v1252_v20 = vpop.f32.mrb[4].mxu0 }
 0x1cd   : > { %v1270_v38 = vmul.f32 %v1260_v44, %v1252_v20  ;;  %1320 = vrot.lane.b32.xlu0 %v1292_v6, %s7100_s29  ;;  %v4894_v24 = vpop.f32.mrb[5].mxu0 }
 0x1ce   : > { %1322 = vrot.lane.b32.xlu1 %v1293_v37, %s7100_s29 }
 0x1cf   : > { %v6514_v13 = vadd.f32 %v1275_v60, %v1270_v38 }
 0x1d1   : > { %v1294_v26 = vmax.f32 %v6514_v13, 0.0 }
 0x1d3   : > { %1324 = vrot.lane.b32.xlu0 %v1294_v26, %s7100_s29  ;;  %s5928_s29 = smov 52  }
 0x20f   : > { %v1309_v34 = vpop.permute.xlu1 %1308 }
 0x213   : > { %v1311_v30 = vpop.permute.xlu1 %1310 }
 0x214   : > { %v1326_v39 = vsel %vm689_vm2, %v1309_v34, %v1311_v30 }
 0x215   : > { %v1343_v40 = vadd.f32 %v1326_v39, %v1286_v5 }
 0x217   : > { %4904 = vmatmul.mubr.msk.f32.vlgmr.msra.gmra.mrb[4].mxu1 %vm7073_vm10, %v1343_v40  ;;  %1426 = vrot.lane.b32.xlu1 %v1343_v40, %s7103_s24  ;;  %s5929_s24 = smov 120  }
 0x218   : > { %5263 = vmatpush3.bf16.msra.mxu1 %v6480_v58  ;;  %4914 = vmatprep.mubr.msk.f32.mxu1 %vm5927_vm9, %v5923_v9 }
 0x219   : > { %5264 = vmatprep.subr.bf16.mxu1 %v5926_v36 }
 0x21b   : > { %v1313_v41 = vpop.permute.xlu0 %1312 }
 0x21c   : > { %v1327_v43 = vsel %vm689_vm2, %v1311_v30, %v1313_v41  ;;  %v1315_v25 = vpop.permute.xlu1 %1314  ;;  %5266 = vmatpush3.bf16.msra.mxu1 %v6492_v46 }
 0x21d   : > { %v1344_v48 = vadd.f32 %v1327_v43, %v1287_v8  ;;  %5267 = vmatprep.subr.bf16.mxu1 %v5926_v36  ;;  %v1328_v28 = vsel %vm689_vm2, %v1313_v41, %v1315_v25 }
 0x21e   : > { %v1345_v50 = vadd.f32 %v1328_v28, %v1288_v4 }
 0x21f   : > { %1575 = vrot.lane.b32.xlu1 %v1344_v48, %s5928_s29  ;;  %1501 = vrot.lane.b32.xlu0 %v1344_v48, %s5929_s24  ;;  %s7068_s29 = smov 12   ;;  %s7066_s24 = smov 80  }
 0x223   : > { %1724 = vrot.lane.b32.xlu1 %v1345_v50, %s5930_s23  ;;  %1650 = vrot.lane.b32.xlu0 %v1345_v50, %s7071_s21  ;;  %s5940_s23 = smov 72   ;;  %s7074_s21 = smov 107  }
 0x233   : > { %v1317_v51 = vpop.permute.xlu0 %1316 }
 0x234   : > { %v1329_v11 = vsel %vm689_vm2, %v1315_v25, %v1317_v51  ;;  %v1319_v10 = vpop.permute.xlu1 %1318 }
 0x235   : > { %v1346_v52 = vadd.f32 %v1329_v11, %v1289_v21  ;;  %v1330_v14 = vsel %vm689_vm2, %v1317_v51, %v1319_v10 }
 0x236   : > { %v1347_v19 = vadd.f32 %v1330_v14, %v1290_v63 }
 0x237   : > { %1873 = vrot.lane.b32.xlu1 %v1346_v52, %s5932_s25  ;;  %1799 = vrot.lane.b32.xlu0 %v1346_v52, %s5933_s19  ;;  %s7081_s25 = smov 4   ;;  %s5942_s19 = smov 19  }
 0x23b   : > { %2023 = vrot.lane.b32.xlu1 %v1347_v19, %s5934_s26  ;;  %1948 = vrot.lane.b32.xlu0 %v1347_v19, %s7067_s27  ;;  %s5946_s27 = smov 91  }
 0x23f   : > { %v1321_v53 = vpop.permute.xlu0 %1320 }
 0x240   : > { %v1331_v54 = vsel %vm689_vm2, %v1319_v10, %v1321_v53  ;;  %v1323_v56 = vpop.permute.xlu1 %1322 }
 0x241   : > { %v1348_v59 = vadd.f32 %v1331_v54, %v1291_v45  ;;  %v1332_v42 = vsel %vm689_vm2, %v1321_v53, %v1323_v56 }
 0x242   : > { %v1349_v44 = vadd.f32 %v1332_v42, %v1292_v6 }
 0x243   : > { %2101 = vrot.lane.b32.xlu1 %v1348_v59, %s7069_s1  ;;  %2025 = vrot.lane.b32.xlu0 %v1348_v59, %s5934_s26  ;;  %s5943_s26 = smov 37   ;;  %s5952_s1 = smov 125  }
 0x245   : > { %v1325_v47 = vpop.permute.xlu0 %1324 }
 0x246   : > { %v1333_v60 = vsel %vm689_vm2, %v1323_v56, %v1325_v47  ;;  %v1351_v27 = vadd.f32 %v1325_v47, %v1294_v26  ;;  %vm575_vm2 = vcmask 556032  }
 0x247   : > { %2178 = vrot.lane.b32.xlu1 %v1349_v44, %s7079_s22  ;;  %2176 = vrot.lane.b32.xlu0 %v1348_v59, %s7079_s22  ;;  %v1350_v35 = vadd.f32 %v1333_v60, %v1293_v37  ;;  %576 = vst.msk [vmem:[#allocation2 + $0x10] sm:$0xff] %vm575_vm2, %v6601_v17  ;;  %vm2620_vm2 = vcmask 564648   ;;  %s7114_s22 = smov 112  }
 0x24b   : > { %2329 = vrot.lane.b32.xlu1 %v1349_v44, %s7068_s29  ;;  %2254 = vrot.lane.b32.xlu0 %v1349_v44, %s7066_s24  ;;  %s5945_s24 = smov 55  }
 0x24f   : > { %2407 = vrot.lane.b32.xlu1 %v1350_v35, %s5940_s23  ;;  %2331 = vrot.lane.b32.xlu0 %v1350_v35, %s7068_s29  ;;  %s5944_s23 = smov 73   ;;  %s5950_s29 = smov 89  }
 0x253   : > { %2484 = vrot.lane.b32.xlu1 %v1351_v27, %s7081_s25  ;;  %2482 = vrot.lane.b32.xlu0 %v1350_v35, %s7081_s25  ;;  %s5961_s25 = smov 76  }
 0x289   : > { %v1427_v62 = vpop.permute.xlu1 %1426 }
 0x28a   : > { %4915 = vmatmul.mubr.msk.f32.vlgmr.msra.gmra.mrb[6].mxu1 %vm7073_vm10, %v1427_v62 }
 0x28b   : > { %5269 = vmatpush3.bf16.msra.mxu1 %v6480_v58  ;;  %4925 = vmatprep.mubr.msk.f32.mxu1 %vm5927_vm9, %v5923_v9 }
 0x28c   : > { %5270 = vmatprep.subr.bf16.mxu1 %v5926_v36 }
 0x28f   : > { %5272 = vmatpush3.bf16.msra.mxu1 %v6492_v46 }
 0x290   : > { %5279 = vmatprep.subr.bf16.mxu1 %v5926_v36 }
 0x291   : > { %v1576_v0 = vpop.permute.xlu1 %1575  ;;  %v1502_v2 = vpop.permute.xlu0 %1501 }
 0x292   : > { %4926 = vmatmul.mubr.msk.f32.vlgmr.msra.gmra.mrb[8].mxu1 %vm7073_vm10, %v1502_v2  ;;  %4937 = vmatmul.mubr.msk.f32.vlgmr.msra.gmra.mrb[6].mxu0 %vm7073_vm10, %v1576_v0 }
 0x293   : > { %5281 = vmatpush3.bf16.msra.mxu1 %v6480_v58  ;;  %5287 = vmatpush3.bf16.msra.mxu0 %v6480_v58 }
 0x294   : > { %5288 = vmatprep.subr.bf16.mxu0 %v5926_v36  ;;  %5282 = vmatprep.subr.bf16.mxu1 %v5926_v36 }
 0x295   : > { %4947 = vmatprep.mubr.msk.f32.mxu1 %vm5927_vm9, %v5923_v9  ;;  %4958 = vmatprep.mubr.msk.f32.mxu0 %vm5927_vm9, %v5923_v9  ;;  %v1725_v5 = vpop.permute.xlu1 %1724  ;;  %v1651_v8 = vpop.permute.xlu0 %1650 }
 0x297   : > { %5284 = vmatpush3.bf16.msra.mxu1 %v6492_v46  ;;  %5290 = vmatpush3.bf16.msra.mxu0 %v6492_v46 }
 0x298   : > { %5291 = vmatprep.subr.bf16.mxu1 %v5926_v36  ;;  %5297 = vmatprep.subr.bf16.mxu0 %v5926_v36 }
 0x29a   : > { %4948 = vmatmul.mubr.msk.f32.vlgmr.msra.gmra.mrb[10].mxu1 %vm7073_vm10, %v1651_v8  ;;  %4959 = vmatmul.mubr.msk.f32.vlgmr.msra.gmra.mrb[8].mxu0 %vm7073_vm10, %v1725_v5 }
 0x29b   : > { %5293 = vmatpush3.bf16.msra.mxu1 %v6480_v58  ;;  %5299 = vmatpush3.bf16.msra.mxu0 %v6480_v58 }
 0x29c   : > { %5294 = vmatprep.subr.bf16.mxu1 %v5926_v36  ;;  %5300 = vmatprep.subr.bf16.mxu0 %v5926_v36 }
 0x29d   : > { %4980 = vmatprep.mubr.msk.f32.mxu0 %vm5927_vm9, %v5923_v9  ;;  %4969 = vmatprep.mubr.msk.f32.mxu1 %vm5927_vm9, %v5923_v9 }
 0x29f   : > { %5296 = vmatpush3.bf16.msra.mxu1 %v6492_v46  ;;  %5302 = vmatpush3.bf16.msra.mxu0 %v6492_v46 }
 0x2a0   : > { %5303 = vmatprep.subr.bf16.mxu1 %v5926_v36  ;;  %5309 = vmatprep.subr.bf16.mxu0 %v5926_v36 }
 0x2a9   : > { %v1874_v12 = vpop.permute.xlu1 %1873  ;;  %v1800_v15 = vpop.permute.xlu0 %1799 }
 0x2aa   : > { %4970 = vmatmul.mubr.msk.f32.vlgmr.msra.gmra.mrb[12].mxu1 %vm7073_vm10, %v1800_v15  ;;  %4981 = vmatmul.mubr.msk.f32.vlgmr.msra.gmra.mrb[10].mxu0 %vm7073_vm10, %v1874_v12 }
 0x2ab   : > { %5305 = vmatpush3.bf16.msra.mxu1 %v6480_v58  ;;  %5311 = vmatpush3.bf16.msra.mxu0 %v6480_v58 }
 0x2ac   : > { %5306 = vmatprep.subr.bf16.mxu1 %v5926_v36  ;;  %4991 = vmatprep.mubr.msk.f32.mxu1 %vm5927_vm9, %v5923_v9 }
 0x2ad   : > { %5312 = vmatprep.subr.bf16.mxu0 %v5926_v36  ;;  %5002 = vmatprep.mubr.msk.f32.mxu0 %vm5927_vm9, %v5923_v9  ;;  %v2024_v16 = vpop.permute.xlu1 %2023  ;;  %v1949_v1 = vpop.permute.xlu0 %1948 }
 0x2af   : > { %5308 = vmatpush3.bf16.msra.mxu1 %v6492_v46  ;;  %5314 = vmatpush3.bf16.msra.mxu0 %v6492_v46 }
 0x2b0   : > { %5315 = vmatprep.subr.bf16.mxu1 %v5926_v36  ;;  %5321 = vmatprep.subr.bf16.mxu0 %v5926_v36 }
 0x2b2   : > { %4992 = vmatmul.mubr.msk.f32.vlgmr.msra.gmra.mrb[14].mxu1 %vm7073_vm10, %v1949_v1 }
 0x2b3   : > { %5317 = vmatpush3.bf16.msra.mxu1 %v6480_v58  ;;  %5013 = vmatprep.mubr.msk.f32.mxu1 %vm5927_vm9, %v6601_v17 }
 0x2b4   : > { %5318 = vmatprep.subr.bf16.mxu1 %v5926_v36 }
 0x2b5   : > { %v2102_v9 = vpop.permute.xlu1 %2101  ;;  %v2026_v18 = vpop.permute.xlu0 %2025 }
 0x2b6   : > { %v2028_v4 = vsel %vm2027_vm11, %v2024_v16, %v2026_v18  ;;  %vm2602_vm11 = vcmask 121856  }
 0x2b7   : > { %5320 = vmatpush3.bf16.msra.mxu1 %v6492_v46  ;;  %5003 = vmatmul.mubr.msk.f32.vlgmr.msra.gmra.mrb[12].mxu0 %vm7073_vm10, %v2028_v4 }
 0x2b8   : > { %5323 = vmatpush3.bf16.msra.mxu0 %v6480_v58  ;;  %5327 = vmatprep.subr.bf16.mxu1 %v5926_v36 }
 0x2b9   : > { %v2179_v21 = vpop.permute.xlu1 %2178  ;;  %v2177_v22 = vpop.permute.xlu0 %2176  ;;  %5324 = vmatprep.subr.bf16.mxu0 %v5926_v36  ;;  %5024 = vmatprep.mubr.msk.f32.mxu0 %vm5927_vm9, %v6601_v17 }
 0x2ba   : > { %5014 = vmatmul.mubr.msk.f32.vlgmr.msra.gmra.mrb[16].mxu1 %vm7073_vm10, %v2102_v9  ;;  %v2181_v29 = vsel %vm2180_vm12, %v2177_v22, %v2179_v21  ;;  %vm2608_vm12 = vcmask 269448   ;;  %v6675_v22 = vld [vmem:[%s7110_s4] sm:$0xff] }
 0x2bb   : > { %5329 = vmatpush3.bf16.msra.mxu1 %v6480_v58  ;;  %5035 = vmatprep.mubr.msk.f32.mxu1 %vm5927_vm9, %v6601_v17 }
 0x2bc   : > { %5326 = vmatpush3.bf16.msra.mxu0 %v6492_v46  ;;  %5330 = vmatprep.subr.bf16.mxu1 %v5926_v36 }
 0x2bd   : > { %v2255_v23 = vpop.permute.xlu0 %2254  ;;  %5333 = vmatprep.subr.bf16.mxu0 %v5926_v36  ;;  %v2330_v61 = vpop.permute.xlu1 %2329 }
 0x2bf   : > { %5025 = vmatmul.mubr.msk.f32.vlgmr.msra.gmra.mrb[14].mxu0 %vm7073_vm10, %v2181_v29  ;;  %5332 = vmatpush3.bf16.msra.mxu1 %v6492_v46  ;;  %v2937_v29 = vld [vmem:[%s7034_s6] sm:$0xff] }
 0x2c0   : > { %5335 = vmatpush3.bf16.msra.mxu0 %v6480_v58  ;;  %5339 = vmatprep.subr.bf16.mxu1 %v5926_v36 }
 0x2c1   : > { %5336 = vmatprep.subr.bf16.mxu0 %v5926_v36  ;;  %5046 = vmatprep.mubr.msk.f32.mxu0 %vm5927_vm9, %v6601_v17  ;;  %v2332_v3 = vpop.permute.xlu0 %2331  ;;  %v2408_v49 = vpop.permute.xlu1 %2407 }
 0x2c2   : > { %5036 = vmatmul.mubr.msk.f32.vlgmr.msra.gmra.mrb[18].mxu1 %vm7073_vm10, %v2255_v23  ;;  %v2334_v63 = vsel %vm2333_vm13, %v2330_v61, %v2332_v3  ;;  %v2919_v23 = vld [vmem:[%s7033_s5] sm:$0xff]  ;;  %v2920_v61 = vld [vmem:[%s7033_s5 + $0x8] sm:$0xff] }
 0x2c3   : > { %5341 = vmatpush3.bf16.msra.mxu1 %v6480_v58  ;;  %5057 = vmatprep.mubr.msk.f32.mxu1 %vm5927_vm9, %v6601_v17  ;;  %v2938_v3 = vld [vmem:[%s7034_s6 + $0x8] sm:$0xff] }
 0x2c4   : > { %5338 = vmatpush3.bf16.msra.mxu0 %v6492_v46  ;;  %5342 = vmatprep.subr.bf16.mxu1 %v5926_v36 }
 0x2c5   : > { %5345 = vmatprep.subr.bf16.mxu0 %v5926_v36  ;;  %v2485_v45 = vpop.permute.xlu1 %2484  ;;  %v2483_v31 = vpop.permute.xlu0 %2482 }
 0x2c6   : > { %v2487_v55 = vsel %vm2486_vm14, %v2483_v31, %v2485_v45 }
 0x2c7   : > { %5047 = vmatmul.mubr.msk.f32.vlgmr.msra.gmra.mrb[16].mxu0 %vm7073_vm10, %v2334_v63  ;;  %5344 = vmatpush3.bf16.msra.mxu1 %v6492_v46 }
 0x2c8   : > { %5347 = vmatpush3.bf16.msra.mxu0 %v6480_v58  ;;  %5068 = vmatprep.mubr.msk.f32.mxu0 %vm5927_vm9, %v6601_v17 }
 0x2c9   : > { %5348 = vmatprep.subr.bf16.mxu0 %v5926_v36 }
 0x2ca   : > { %5058 = vmatmul.mubr.msk.f32.vlgmr.msra.gmra.mrb[20].mxu1 %vm7073_vm10, %v2408_v49 }
 0x2cb   : > { %2831 = vmatprep.mubr.f32.mxu1 %v6601_v17 }
 0x2cc   : > { %5350 = vmatpush3.bf16.msra.mxu0 %v6492_v46 }
 0x2cf   : > { %5069 = vmatmul.mubr.msk.f32.vlgmr.msra.gmra.mrb[18].mxu0 %vm7073_vm10, %v2487_v55  ;;  %vm2632_vm10 = vcmask 859848  }
 0x2d0   : > { %5089 = vmatprep.mubr.msk.f32.mxu0 %vm898_vm8, %v6675_v22 }
 0x2ea   : > { %v1422_v57 = vpop.f32.mrb[4].mxu1 }
 0x2eb   : > { %v4905_v58 = vpop.f32.mrb[5].mxu1  ;;  %2561 = vrot.lane.b32.xlu0 %v1422_v57, %s5942_s19  ;;  %s7108_s19 = smov 127  }
 0x35d   : > { %v1496_v32 = vpop.f32.mrb[6].mxu1  ;;  %v2562_v33 = vpop.permute.xlu0 %2561 }
 0x35e   : > { %2565 = vst.msk [vmem:[#allocation2] sm:$0xff] %vm2564_vm15, %v2562_v33  ;;  %v4916_v7 = vpop.f32.mrb[7].mxu1  ;;  %2567 = vrot.lane.b32.xlu0 %v1496_v32, %s5943_s26  ;;  %s5947_s26 = smov 17   ;;  %vm2614_vm15 = vcmask 417048  }
 0x365   : > { %v1571_v6 = vpop.f32.mrb[8].mxu1  ;;  %v1645_v37 = vpop.f32.mrb[6].mxu0 }
 0x366   : > { %v4927_v20 = vpop.f32.mrb[9].mxu1  ;;  %2579 = vrot.lane.b32.xlu0 %v1645_v37, %s5944_s23  ;;  %v4938_v46 = vpop.f32.mrb[7].mxu0  ;;  %s5949_s23 = smov 35  }
 0x36a   : > { %2573 = vrot.lane.b32.xlu0 %v1571_v6, %s5945_s24  ;;  %s5948_s24 = smov 53  }
 0x36d   : > { %v1720_v38 = vpop.f32.mrb[10].mxu1  ;;  %v1794_v24 = vpop.f32.mrb[8].mxu0 }
 0x36e   : > { %2585 = vrot.lane.b32.xlu1 %v1720_v38, %s5946_s27  ;;  %v4949_v13 = vpop.f32.mrb[11].mxu1  ;;  %v4960_v26 = vpop.f32.mrb[9].mxu0 }
 0x37d   : > { %v1869_v34 = vpop.f32.mrb[12].mxu1  ;;  %v1943_v30 = vpop.f32.mrb[10].mxu0 }
 0x37e   : > { %v4971_v39 = vpop.f32.mrb[13].mxu1  ;;  %2597 = vrot.lane.b32.xlu0 %v1869_v34, %s7108_s19  ;;  %2605 = vrot.lane.b32.xlu1 %v1943_v30, %s5947_s26  ;;  %v4982_v40 = vpop.f32.mrb[11].mxu0  ;;  %s7075_s26 = smov 71  }
 0x385   : > { %v2018_v41 = vpop.f32.mrb[14].mxu1 }
 0x386   : > { %v4993_v43 = vpop.f32.mrb[15].mxu1 }
 0x38a   : > { %v2097_v25 = vpop.f32.mrb[12].mxu0 }
 0x38b   : > { %2617 = vrot.lane.b32.xlu1 %v2097_v25, %s5948_s24  ;;  %v5004_v48 = vpop.f32.mrb[13].mxu0  ;;  %s5953_s24 = smov 15  }
 0x38d   : > { %v2171_v28 = vpop.f32.mrb[16].mxu1 }
 0x38e   : > { %v5015_v50 = vpop.f32.mrb[17].mxu1 }
 0x38f   : > { %2611 = vrot.lane.b32.xlu1 %v2018_v41, %s5949_s23  ;;  %s5955_s23 = smov 109  }
 0x392   : > { %v2250_v51 = vpop.f32.mrb[14].mxu0 }
 0x393   : > { %v5026_v11 = vpop.f32.mrb[15].mxu0  ;;  %2629 = vrot.lane.b32.xlu1 %v2250_v51, %s5950_s29  ;;  %s5956_s29 = smov 33  }
 0x395   : > { %v2324_v10 = vpop.f32.mrb[18].mxu1 }
 0x396   : > { %v5037_v52 = vpop.f32.mrb[19].mxu1 }
 0x397   : > { %2623 = vrot.lane.b32.xlu1 %v2171_v28, %s7075_s26  ;;  %s7111_s26 = smov 110  }
 0x39a   : > { %v2403_v14 = vpop.f32.mrb[16].mxu0 }
 0x39b   : > { %2641 = vrot.lane.b32.xlu0 %v2403_v14, %s5952_s1  ;;  %v5048_v19 = vpop.f32.mrb[17].mxu0  ;;  %s7083_s1 = smov 110  }
 0x39d   : > { %v2477_v53 = vpop.f32.mrb[20].mxu1 }
 0x39e   : > { %v5059_v54 = vpop.f32.mrb[21].mxu1  ;;  %2649 = vrot.lane.b32.xlu1 %v2477_v53, %s5953_s24  ;;  %s7109_s24 = smov 92  }
 0x39f   : > { %2635 = vrot.lane.b32.xlu0 %v2324_v10, %s7074_s21  ;;  %s5965_s21 = smov 41  }
 0x3a2   : > { %v2556_v56 = vpop.f32.mrb[18].mxu0 }
 0x3a3   : > { %2591 = vrot.lane.b32.xlu0 %v1794_v24, %s5955_s23  ;;  %2655 = vrot.lane.b32.xlu1 %v2556_v56, %s5956_s29  ;;  %v5070_v59 = vpop.f32.mrb[19].mxu0  ;;  %s7077_s29 = smov 108  }
 0x3d0   : > { %v2568_v42 = vpop.permute.xlu0 %2567 }
 0x3d1   : > { %2571 = vst.msk [vmem:[#allocation2] sm:$0xff] %vm2570_vm3, %v2568_v42  ;;  %vm2626_vm3 = vcmask 712248  }
 0x3d8   : > { %v2580_v44 = vpop.permute.xlu0 %2579 }
 0x3dc   : > { %v2574_v47 = vpop.permute.xlu0 %2573 }
 0x3dd   : > { %2577 = vst.msk [vmem:[#allocation2] sm:$0xff] %vm2576_vm5, %v2574_v47  ;;  %vm2646_vm5 = vcmask 105472  }
 0x3de   : > { %2583 = vst.msk [vmem:[#allocation2] sm:$0xff] %vm2582_vm6, %v2580_v44  ;;  %vm2652_vm6 = vcmask 253048  }
 0x3e0   : > { %v2586_v60 = vpop.permute.xlu1 %2585 }
 0x3e1   : > { %2589 = vst.msk [vmem:[#allocation2] sm:$0xff] %vm2588_vm7, %v2586_v60  ;;  %vm2638_vm7 = vcmask 1007448  }
 0x3f0   : > { %v2598_v35 = vpop.permute.xlu0 %2597  ;;  %v2606_v27 = vpop.permute.xlu1 %2605 }
 0x3f1   : > { %2603 = vst.msk [vmem:[#allocation2 + $0x8] sm:$0xff] %vm2602_vm11, %v2598_v35  ;;  %vm2644_vm11 = vcmask 1048552  }
 0x3f2   : > { %2609 = vst.msk [vmem:[#allocation2 + $0x8] sm:$0xff] %vm2608_vm12, %v2606_v27  ;;  %vm2594_vm12 = vcmask 1023848  }
 0x3fd   : > { %v2618_v62 = vpop.permute.xlu1 %2617 }
 0x401   : > { %v2612_v0 = vpop.permute.xlu1 %2611 }
 0x402   : > { %2615 = vst.msk [vmem:[#allocation2 + $0x8] sm:$0xff] %vm2614_vm15, %v2612_v0  ;;  %vm2658_vm15 = vcmask 400648  }
 0x403   : > { %2621 = vst.msk [vmem:[#allocation2 + $0x8] sm:$0xff] %vm2620_vm2, %v2618_v62  ;;  %vm2600_vm2 = vcmask 1048568  }
 0x405   : > { %v2630_v2 = vpop.permute.xlu1 %2629 }
 0x409   : > { %v2624_v5 = vpop.permute.xlu1 %2623 }
 0x40a   : > { %2627 = vst.msk [vmem:[#allocation2 + $0x8] sm:$0xff] %vm2626_vm3, %v2624_v5  ;;  %vm2718_vm3 = vcmask 883712  }
 0x40b   : > { %2633 = vst.msk [vmem:[#allocation2 + $0x8] sm:$0xff] %vm2632_vm10, %v2630_v2  ;;  %vm2694_vm10 = vcmask 900096  }
 0x40d   : > { %v2642_v8 = vpop.permute.xlu0 %2641 }
 0x40e   : > { %2647 = vst.msk [vmem:[#allocation2 + $0x10] sm:$0xff] %vm2646_vm5, %v2642_v8  ;;  %vm2741_vm5 = vcmask 744448  }
 0x410   : > { %v2650_v12 = vpop.permute.xlu1 %2649 }
 0x411   : > { %2653 = vst.msk [vmem:[#allocation2 + $0x10] sm:$0xff] %vm2652_vm6, %v2650_v12  ;;  %v2636_v15 = vpop.permute.xlu0 %2635  ;;  %vm3678_vm6 = vcmask 154712  }
 0x412   : > { %2639 = vst.msk [vmem:[#allocation2 + $0x8] sm:$0xff] %vm2638_vm7, %v2636_v15  ;;  %vm3689_vm7 = vcmask 236712  }
 0x413   : > { %2645 = vst.msk [vmem:[#allocation2 + $0x8] sm:$0xff] %vm2644_vm11, %v2642_v8  ;;  %vm3700_vm11 = vcmask 318712  }
 0x415   : > { %v2592_v16 = vpop.permute.xlu0 %2591  ;;  %v2656_v1 = vpop.permute.xlu1 %2655 }
 0x416   : > { %2595 = vst.msk [vmem:[#allocation2] sm:$0xff] %vm2594_vm12, %v2592_v16  ;;  %vm3711_vm12 = vcmask 400712  }
 0x417   : > { %2659 = vst.msk [vmem:[#allocation2 + $0x10] sm:$0xff] %vm2658_vm15, %v2656_v1  ;;  %vm3722_vm15 = vcmask 482712  }
 0x418   : > { %2601 = vst.msk [vmem:[#allocation2] sm:$0xff] %vm2600_vm2, %v2598_v35  ;;  %vm3733_vm2 = vcmask 564712  }
 0x41a   : > { %v2661_v4 = vld [vmem:[#allocation2 + $0x8] sm:$0xff] }
 0x41e   : > { %v2662_v18 = vld [vmem:[#allocation2 + $0x10] sm:$0xff] }
 0x41f   : > { %v6652_v9 = vld [vmem:[#allocation2] sm:$0xff]  ;;  %v5736_v21 = vpack.i.bf16 %v2662_v18, %v2661_v4 }
 0x420   : > { %2677 = vrot.lane.b32.xlu0 %v6652_v9, %s7101_s20  ;;  %2666 = vrot.lane.b32.xlu1 %v6652_v9, %s7108_s19 }
 0x424   : > { %2700 = vrot.lane.b32.xlu0 %v6652_v9, %s5955_s23  ;;  %2688 = vrot.lane.b32.xlu1 %v6652_v9, %s7083_s1 }
 0x428   : > { %2724 = vrot.lane.b32.xlu0 %v6652_v9, %s7109_s24  ;;  %2712 = vrot.lane.b32.xlu1 %v6652_v9, %s7077_s29 }
 0x42c   : > { %5737 = vrot.lane.b32.xlu1 %v5736_v21, %s7083_s1  ;;  %5727 = vrot.lane.b32.xlu0 %v5736_v21, %s7108_s19  ;;  %s5962_s1 = smov 40  }
 0x430   : > { %5747 = vrot.lane.b32.xlu1 %v5736_v21, %s7077_s29  ;;  %5732 = vrot.lane.b32.xlu0 %v5736_v21, %s7101_s20  ;;  %s5959_s29 = smov 90  }
 0x434   : > { %5757 = vrot.lane.b32.xlu1 %v5736_v21, %s5946_s27  ;;  %5742 = vrot.lane.b32.xlu0 %v5736_v21, %s5955_s23  ;;  %s7112_s23 = smov 4  }
 0x438   : > { %2735 = vrot.lane.b32.xlu1 %v6652_v9, %s5946_s27  ;;  %5752 = vrot.lane.b32.xlu0 %v5736_v21, %s7109_s24  ;;  %s5960_s27 = smov 56  }
 0x43c   : > { %2751 = vrot.lane.b32.xlu1 %v2662_v18, %s5959_s29  ;;  %2749 = vrot.lane.b32.xlu0 %v2661_v4, %s5959_s29 }
 0x440   : > { %2923 = vperm.xlu1 %5724, %v2919_v23   ;;  %2747 = vrot.lane.b32.xlu0 %v6652_v9, %s5959_s29  ;;  %s5964_s29 = smov 21  }
 0x444   : > { %2941 = vperm.xlu1 %5724, %v2937_v29   ;;  %2928 = vperm.xlu0 %5725, %v2920_v61   ;;  %v2760_v29 = vld [vmem:[%s7110_s4 + $0x8] sm:$0xff]  ;;  %s5974_s4 = smov 68  }
 0x448   : > { %2946 = vperm.xlu0 %5725, %v2938_v3  }
 0x492   : > { %v2678_v49 = vpop.permute.xlu0 %2677  ;;  %v2667_v63 = vpop.permute.xlu1 %2666 }
 0x496   : > { %v2701_v45 = vpop.permute.xlu0 %2700  ;;  %v2689_v31 = vpop.permute.xlu1 %2688 }
 0x49a   : > { %v2725_v55 = vpop.permute.xlu0 %2724  ;;  %v2713_v57 = vpop.permute.xlu1 %2712 }
 0x49e   : > { %v5728_v58 = vpop.permute.xlu0 %5727  ;;  %v5738_v32 = vpop.permute.xlu1 %5737 }
 0x49f   : > { %v5730_v33 = vunpack.i.h.bf16 %v5728_v58  ;;  %v5729_v7 = vunpack.i.l.bf16 %v5728_v58  ;;  %v5740_v6 = vunpack.i.h.bf16 %v5738_v32  ;;  %v5739_v37 = vunpack.i.l.bf16 %v5738_v32 }
 0x4a1   : > { %v5367_v20 = vpack.c.bf16 %v5730_v33, %v2662_v18  ;;  %v2672_v46 = vsel %vm617_vm0, %v2667_v63, %v5729_v7  ;;  %v2673_v38 = vsel %vm617_vm0, %v5729_v7, %v5730_v33  ;;  %v2695_v40 = vsel %vm2694_vm10, %v2689_v31, %v5739_v37  ;;  %v2962_v63 = vld [vmem:[%s7039_s11 + $0x8] sm:$0xff] }
 0x4a2   : > { %v5353_v24 = vpack.c.bf16 %v2672_v46, %v6652_v9  ;;  %v5733_v13 = vpop.permute.xlu0 %5732  ;;  %v5748_v26 = vpop.permute.xlu1 %5747  ;;  %v5351_v34 = vpack.c.bf16 %v2673_v38, %v2661_v4  ;;  %v2696_v43 = vsel %vm2694_vm10, %v5739_v37, %v5740_v6  ;;  %vm2706_vm0 = vcmask 891904  }
 0x4a3   : > { %v5735_v30 = vunpack.i.h.bf16 %v5733_v13  ;;  %v5734_v39 = vunpack.i.l.bf16 %v5733_v13  ;;  %5368 = vmatprep.subr.bf16.mxu0 %v5367_v20  ;;  %v5749_v41 = vunpack.i.l.bf16 %v5748_v26  ;;  %v5750_v28 = vunpack.i.h.bf16 %v5748_v26 }
 0x4a4   : > { %5352 = vmatprep.subr.bf16.mxu1 %v5351_v34  ;;  %5370 = vmatpush3.bf16.msra.mxu0 %v5367_v20 }
 0x4a5   : > { %v2683_v25 = vsel %vm653_vm1, %v2678_v49, %v5734_v39  ;;  %v5371_v48 = vpack.c.bf16 %v5740_v6, %v5735_v30  ;;  %5354 = vmatpush1.bf16.msra.mxu1 %v5353_v24  ;;  %v2684_v50 = vsel %vm653_vm1, %v5734_v39, %v5735_v30  ;;  %v2719_v53 = vsel %vm2718_vm3, %v2713_v57, %v5749_v41  ;;  %v2961_v49 = vld [vmem:[%s7039_s11] sm:$0xff] }
 0x4a6   : > { %v5357_v51 = vpack.c.bf16 %v2695_v40, %v2683_v25  ;;  %v5743_v11 = vpop.permute.xlu0 %5742  ;;  %v5758_v10 = vpop.permute.xlu1 %5757  ;;  %v5355_v52 = vpack.c.bf16 %v2696_v43, %v2684_v50  ;;  %v2720_v47 = vsel %vm2718_vm3, %v5749_v41, %v5750_v28  ;;  %vm2753_vm1 = vcmask 736256  }
 0x4a7   : > { %v5745_v14 = vunpack.i.h.bf16 %v5743_v11  ;;  %v5744_v19 = vunpack.i.l.bf16 %v5743_v11  ;;  %5372 = vmatprep.subr.bf16.mxu0 %v5371_v48  ;;  %v5760_v54 = vunpack.i.h.bf16 %v5758_v10  ;;  %v5759_v56 = vunpack.i.l.bf16 %v5758_v10 }
 0x4a8   : > { %5356 = vmatprep.subr.bf16.mxu1 %v5355_v52  ;;  %5374 = vmatpush3.bf16.msra.mxu0 %v5371_v48  ;;  %vm3755_vm3 = vcmask 728712  }
 0x4a9   : > { %v2707_v59 = vsel %vm2706_vm0, %v2701_v45, %v5744_v19  ;;  %v5375_v42 = vpack.c.bf16 %v5750_v28, %v5745_v14  ;;  %5358 = vmatpush1.bf16.msra.mxu1 %v5357_v51  ;;  %v2708_v44 = vsel %vm2706_vm0, %v5744_v19, %v5745_v14  ;;  %v2743_v5 = vsel %vm2741_vm5, %v5759_v56, %v5760_v54 }
 0x4aa   : > { %v5361_v60 = vpack.c.bf16 %v2719_v53, %v2707_v59  ;;  %v5753_v35 = vpop.permute.xlu0 %5752  ;;  %v2736_v27 = vpop.permute.xlu1 %2735  ;;  %v5359_v62 = vpack.c.bf16 %v2720_v47, %v2708_v44  ;;  %v6724_v45 = vpack.c.bf16 %v2962_v63, %v2961_v49 }
 0x4ab   : > { %v5755_v0 = vunpack.i.h.bf16 %v5753_v35  ;;  %v5754_v2 = vunpack.i.l.bf16 %v5753_v35  ;;  %5376 = vmatprep.subr.bf16.mxu0 %v5375_v42  ;;  %v2742_v15 = vsel %vm2741_vm5, %v2736_v27, %v5759_v56  ;;  %vm4359_vm5 = vcmask 523264  }
 0x4ac   : > { %5360 = vmatprep.subr.bf16.mxu1 %v5359_v62  ;;  %5378 = vmatpush3.bf16.msra.mxu0 %v5375_v42 }
 0x4ad   : > { %v5379_v8 = vpack.c.bf16 %v5760_v54, %v5755_v0  ;;  %v2730_v12 = vsel %vm761_vm4, %v2725_v55, %v5754_v2  ;;  %5362 = vmatpush1.bf16.msra.mxu1 %v5361_v60  ;;  %v2731_v16 = vsel %vm761_vm4, %v5754_v2, %v5755_v0  ;;  %vm2997_vm4 = vcmask 130048  }
 0x4ae   : > { %v5365_v1 = vpack.c.bf16 %v2742_v15, %v2730_v12  ;;  %v2750_v9 = vpop.permute.xlu0 %2749  ;;  %v2752_v18 = vpop.permute.xlu1 %2751  ;;  %v5363_v4 = vpack.c.bf16 %v2743_v5, %v2731_v16 }
 0x4af   : > { %5380 = vmatprep.subr.bf16.mxu0 %v5379_v8  ;;  %v2755_v21 = vsel %vm2753_vm1, %v2750_v9, %v2752_v18 }
 0x4b0   : > { %5364 = vmatprep.subr.bf16.mxu1 %v5363_v4  ;;  %5382 = vmatpush3.bf16.msra.mxu0 %v5379_v8 }
 0x4b1   : > { %5366 = vmatpush1.bf16.msra.mxu1 %v5365_v1  ;;  %5087 = vmatprep.subr.mxu0 %v2752_v18 }
 0x4b2   : > { %v2748_v23 = vpop.permute.xlu0 %2747  ;;  %2783 = vmatprep.subr.mxu1 %v2755_v21 }
 0x4b3   : > { %v2754_v61 = vsel %vm2753_vm1, %v2748_v23, %v2750_v9  ;;  %vm4361_vm1 = vcmask 654336  }
 0x4b4   : > { %5088 = vmatpush3.msra.mxu0 %v2752_v18 }
 0x4b5   : > { %2784 = vmatpush1.msra.mxu1 %v2754_v61  ;;  %5090 = vmatmul.mubr.msk.f32.vlgmr.msra.gmra.mrb[20].mxu0 %vm898_vm8, %v2760_v29 }
 0x4b6   : > { %4655 = vmatmul.mubr.msk.f32.vlgmr.msra.gmra.mrb[22].mxu1 %vm898_vm8, %v6675_v22  ;;  %5384 = vmatprep.subr.bf16.mxu0 %v6724_v45 }
 0x4b7   : > { %2837 = vmatprep.mubr.f32.mxu1 %v6601_v17  ;;  %5396 = vmatprep.subr.bf16.mxu1 %v6724_v45 }
 0x4b8   : > { %5386 = vmatpush3.bf16.msra.mxu0 %v6724_v45  ;;  %5398 = vmatpush3.bf16.msra.mxu1 %v6724_v45 }
 0x4b9   : > { %5388 = vmatprep.subr.bf16.mxu0 %v6724_v45  ;;  %5404 = vmatprep.subr.bf16.mxu1 %v6724_v45 }
 0x4ba   : > { %4656 = vmatmul.mubr.msk.f32.gmra.mrb[24].mxu1 %vm898_vm8, %v2760_v29  ;;  %vm577_vm8 = vcmask 818176  }
 0x4bb   : > { %579 = vst.msk [vmem:[#allocation3 + $0x8] sm:$0xff] %vm577_vm8, %v6601_v17  ;;  %578 = vst.msk [vmem:[#allocation3] sm:$0xff] %vm577_vm8, %v6601_v17  ;;  %vm4365_vm8 = vcmask 916480  }
 0x4bf   : > { %v2924_v3 = vpop.permute.xlu1 %2923 }
 0x4c3   : > { %v2929_v31 = vpop.permute.xlu0 %2928  ;;  %v2942_v33 = vpop.permute.xlu1 %2941 }
 0x4c7   : > { %v2947_v26 = vpop.permute.xlu0 %2946 }
 0x588   : > { %v5091_v55 = vpop.f32.mrb[20].mxu0 }
 0x589   : > { %v2833_v22 = vpop.f32.mrb[22].mxu1  ;;  %v2910_v57 = vpop.f32.mrb[21].mxu0  ;;  %v2936_v34 = vmul.f32 %v5091_v55, %v2929_v31 }
 0x58a   : > { %v2931_v58 = vmul.f32 %v2924_v3, %v2833_v22  ;;  %v2835_v32 = vpop.f32.mrb[23].mxu1  ;;  %v2933_v38 = vmul.f32 %v2924_v3, %v2910_v57 }
 0x58b   : > { %v2932_v7 = vmul.f32 %v2924_v3, %v2835_v32  ;;  %v2954_v48 = vadd.f32 %v2947_v26, %v2936_v34 }
 0x58c   : > { %v2949_v6 = vadd.f32 %v2942_v33, %v2931_v58  ;;  %v2951_v43 = vadd.f32 %v2942_v33, %v2933_v38 }
 0x58d   : > { %v2950_v37 = vadd.f32 %v2942_v33, %v2932_v7  ;;  %v2839_v20 = vpop.f32.mrb[24].mxu1  ;;  %v2960_v51 = vmax.f32 %v2954_v48, 0.0 }
 0x58e   : > { %v2955_v46 = vmax.f32 %v2949_v6, 0.0  ;;  %v2934_v24 = vmul.f32 %v2929_v31, %v2839_v20  ;;  %v2841_v13 = vpop.f32.mrb[25].mxu1  ;;  %v2957_v50 = vmax.f32 %v2951_v43, 0.0 }
 0x58f   : > { %v2956_v30 = vmax.f32 %v2950_v37, 0.0  ;;  %v2935_v39 = vmul.f32 %v2929_v31, %v2841_v13 }
 0x590   : > { %v2952_v40 = vadd.f32 %v2947_v26, %v2934_v24  ;;  %2969 = vrot.lane.b32.xlu1 %v2955_v46, %s7111_s26 }
 0x591   : > { %v2953_v41 = vadd.f32 %v2947_v26, %v2935_v39  ;;  %2971 = vrot.lane.b32.xlu0 %v2956_v30, %s7111_s26 }
 0x592   : > { %v2958_v25 = vmax.f32 %v2952_v40, 0.0 }
 0x593   : > { %v2959_v28 = vmax.f32 %v2953_v41, 0.0 }
 0x594   : > { %2975 = vrot.lane.b32.xlu1 %v2958_v25, %s7111_s26 }
 0x595   : > { %2977 = vrot.lane.b32.xlu0 %v2959_v28, %s7111_s26 }
 0x598   : > { %2973 = vrot.lane.b32.xlu1 %v2957_v50, %s7111_s26 }
 0x599   : > { %2979 = vrot.lane.b32.xlu0 %v2960_v51, %s7111_s26  ;;  %s5966_s26 = smov 31  }
 0x602   : > { %v2970_v11 = vpop.permute.xlu1 %2969 }
 0x603   : > { %v2972_v10 = vpop.permute.xlu0 %2971 }
 0x604   : > { %v2981_v52 = vsel %vm2694_vm10, %v2970_v11, %v2972_v10 }
 0x605   : > { %v2991_v14 = vadd.f32 %v2981_v52, %v2955_v46 }
 0x606   : > { %v2976_v19 = vpop.permute.xlu1 %2975 }
 0x607   : > { %5096 = vmatprep.mubr.msk.f32.mxu0 %vm2997_vm4, %v2991_v14  ;;  %v2978_v53 = vpop.permute.xlu0 %2977 }
 0x608   : > { %v2983_v54 = vsel %vm2694_vm10, %v2976_v19, %v2978_v53 }
 0x609   : > { %v2994_v56 = vadd.f32 %v2983_v54, %v2958_v25 }
 0x60a   : > { %v2974_v59 = vpop.permute.xlu1 %2973 }
 0x60b   : > { %v2982_v42 = vsel %vm2694_vm10, %v2972_v10, %v2974_v59  ;;  %v2993_v44 = vadd.f32 %v2974_v59, %v2957_v50  ;;  %5097 = vmatmul.mubr.msk.f32.vlgmr.msra.gmra.mrb[22].mxu0 %vm2997_vm4, %v2994_v56  ;;  %v2980_v60 = vpop.permute.xlu0 %2979  ;;  %v3896_v59 = vld [vmem:[%s7036_s8 + $0x8] sm:$0xff] }
 0x60c   : > { %v2992_v47 = vadd.f32 %v2982_v42, %v2956_v30  ;;  %5390 = vmatpush3.bf16.msra.mxu0 %v6724_v45  ;;  %v2984_v35 = vsel %vm2694_vm10, %v2978_v53, %v2980_v60  ;;  %v2996_v62 = vadd.f32 %v2980_v60, %v2960_v51  ;;  %vm3744_vm10 = vcmask 646712   ;;  %v3895_v42 = vld [vmem:[%s7036_s8] sm:$0xff]  ;;  %v3811_v60 = vld [vmem:[%s7035_s7 + $0x8] sm:$0xff] }
 0x60d   : > { %3583 = vrot.lane.b32.xlu1 %v2993_v44, %s7112_s23  ;;  %5392 = vmatprep.subr.bf16.mxu0 %v6724_v45  ;;  %v2995_v27 = vadd.f32 %v2984_v35, %v2959_v28  ;;  %v3910_v44 = vld [vmem:[%s7037_s9 + $0x8] sm:$0xff] }
 0x60e   : > { %3581 = vrot.lane.b32.xlu0 %v2992_v47, %s7112_s23 }
 0x611   : > { %3079 = vrot.lane.b32.xlu1 %v2991_v14, %s7109_s24 }
 0x612   : > { %3081 = vrot.lane.b32.xlu0 %v2994_v56, %s7109_s24  ;;  %s5963_s24 = smov 11  }
 0x615   : > { %3162 = vrot.lane.b32.xlu1 %v2991_v14, %s5960_s27 }
 0x616   : > { %3164 = vrot.lane.b32.xlu0 %v2994_v56, %s5960_s27  ;;  %s5967_s27 = smov 61  }
 0x619   : > { %3245 = vrot.lane.b32.xlu1 %v2991_v14, %s7113_s3 }
 0x61a   : > { %3247 = vrot.lane.b32.xlu0 %v2994_v56, %s7113_s3  ;;  %s5968_s3 = smov 51  }
 0x61d   : > { %3330 = vrot.lane.b32.xlu1 %v2992_v47, %s7114_s22 }
 0x61e   : > { %3332 = vrot.lane.b32.xlu0 %v2995_v27, %s7114_s22 }
 0x621   : > { %3413 = vrot.lane.b32.xlu1 %v2992_v47, %s5961_s25 }
 0x622   : > { %3415 = vrot.lane.b32.xlu0 %v2995_v27, %s5961_s25  ;;  %s7115_s25 = smov 71  }
 0x625   : > { %3496 = vrot.lane.b32.xlu1 %v2992_v47, %s5962_s1  ;;  %v3909_v47 = vld [vmem:[%s7037_s9] sm:$0xff] }
 0x626   : > { %3498 = vrot.lane.b32.xlu0 %v2995_v27, %s5962_s1  ;;  %s5969_s1 = smov 81  }
 0x629   : > { %3585 = vrot.lane.b32.xlu1 %v2995_v27, %s7112_s23 }
 0x62a   : > { %3587 = vrot.lane.b32.xlu0 %v2996_v62, %s7112_s23 }
 0x67f   : > { %v3584_v0 = vpop.permute.xlu1 %3583 }
 0x680   : > { %v3582_v2 = vpop.permute.xlu0 %3581 }
 0x681   : > { %v3589_v23 = vsel %vm2486_vm14, %v3582_v2, %v3584_v0 }
 0x683   : > { %v3080_v5 = vpop.permute.xlu1 %3079 }
 0x684   : > { %5103 = vmatprep.mubr.msk.f32.mxu0 %vm2997_vm4, %v3080_v5  ;;  %v3082_v8 = vpop.permute.xlu0 %3081 }
 0x685   : > { %5104 = vmatmul.mubr.msk.f32.vlgmr.msra.gmra.mrb[24].mxu0 %vm2997_vm4, %v3082_v8 }
 0x686   : > { %5394 = vmatpush3.bf16.msra.mxu0 %v6724_v45 }
 0x687   : > { %v3163_v12 = vpop.permute.xlu1 %3162  ;;  %5400 = vmatprep.subr.bf16.mxu0 %v6724_v45 }
 0x688   : > { %5110 = vmatprep.mubr.msk.f32.mxu0 %vm2997_vm4, %v3163_v12  ;;  %v3165_v15 = vpop.permute.xlu0 %3164 }
 0x689   : > { %5111 = vmatmul.mubr.msk.f32.vlgmr.msra.gmra.mrb[26].mxu0 %vm2997_vm4, %v3165_v15 }
 0x68a   : > { %5402 = vmatpush3.bf16.msra.mxu0 %v6724_v45 }
 0x68b   : > { %v3246_v16 = vpop.permute.xlu1 %3245  ;;  %5408 = vmatprep.subr.bf16.mxu0 %v6724_v45 }
 0x68c   : > { %5117 = vmatprep.mubr.msk.f32.mxu1 %vm2997_vm4, %v3246_v16  ;;  %v3248_v1 = vpop.permute.xlu0 %3247 }
 0x68d   : > { %5118 = vmatmul.mubr.msk.f32.vlgmr.msra.gmra.mrb[26].mxu1 %vm2997_vm4, %v3248_v1 }
 0x68e   : > { %5406 = vmatpush3.bf16.msra.mxu1 %v6724_v45 }
 0x68f   : > { %v3331_v9 = vpop.permute.xlu1 %3330  ;;  %5412 = vmatprep.subr.bf16.mxu1 %v6724_v45 }
 0x690   : > { %v3333_v18 = vpop.permute.xlu0 %3332  ;;  %5124 = vmatprep.mubr.msk.f32.mxu0 %vm2997_vm4, %v3331_v9 }
 0x691   : > { %5125 = vmatmul.mubr.msk.f32.vlgmr.msra.gmra.mrb[28].mxu0 %vm2997_vm4, %v3333_v18 }
 0x692   : > { %5410 = vmatpush3.bf16.msra.mxu0 %v6724_v45 }
 0x693   : > { %v3414_v4 = vpop.permute.xlu1 %3413  ;;  %5415 = vmatprep.subr.bf16.mxu0 %v5926_v36 }
 0x694   : > { %v3416_v21 = vpop.permute.xlu0 %3415  ;;  %5131 = vmatprep.mubr.msk.f32.mxu1 %vm2997_vm4, %v3414_v4 }
 0x695   : > { %5132 = vmatmul.mubr.msk.f32.vlgmr.msra.gmra.mrb[28].mxu1 %vm2997_vm4, %v3416_v21 }
 0x696   : > { %5145 = vmatprep.mubr.msk.f32.mxu1 %vm2997_vm4, %v3589_v23  ;;  %5414 = vmatpush3.bf16.msra.mxu1 %v6724_v45 }
 0x697   : > { %v3497_v29 = vpop.permute.xlu1 %3496 }
 0x698   : > { %v3499_v61 = vpop.permute.xlu0 %3498  ;;  %5138 = vmatprep.mubr.msk.f32.mxu0 %vm2997_vm4, %v3497_v29 }
 0x699   : > { %5139 = vmatmul.mubr.msk.f32.vlgmr.msra.gmra.mrb[30].mxu0 %vm2997_vm4, %v3499_v61 }
 0x69a   : > { %4675 = vmatprep.mubr.msk.f32.mxu0 %vm2997_vm4, %v3811_v60 }
 0x69b   : > { %v3586_v3 = vpop.permute.xlu1 %3585 }
 0x69c   : > { %v3588_v49 = vpop.permute.xlu0 %3587 }
 0x69d   : > { %v3590_v63 = vsel %vm2486_vm14, %v3586_v3, %v3588_v49 }
 0x69e   : > { %5146 = vmatmul.mubr.msk.f32.vlgmr.msra.gmra.mrb[30].mxu1 %vm2997_vm4, %v3590_v63 }
 0x6de   : > { %v5098_v31 = vpop.f32.mrb[22].mxu0 }
 0x6df   : > { %v3070_v55 = vpop.f32.mrb[23].mxu0  ;;  %3674 = vrot.lane.b32.xlu0 %v5098_v31, %s5963_s24 }
 0x6e0   : > { %3672 = vrot.lane.b32.xlu1 %v3070_v55, %s5963_s24  ;;  %s5970_s24 = smov 117  }
 0x751   : > { %v3675_v22 = vpop.permute.xlu0 %3674 }
 0x752   : > { %3680 = vst.msk [vmem:[#allocation3 + $0x8] sm:$0xff] %vm3678_vm6, %v3675_v22  ;;  %v3673_v45 = vpop.permute.xlu1 %3672 }
 0x753   : > { %3679 = vst.msk [vmem:[#allocation3] sm:$0xff] %vm3678_vm6, %v3673_v45 }
 0x758   : > { %v5105_v57 = vpop.f32.mrb[24].mxu0 }
 0x759   : > { %3685 = vrot.lane.b32.xlu0 %v5105_v57, %s5964_s29  ;;  %v3153_v58 = vpop.f32.mrb[25].mxu0 }
 0x75a   : > { %3683 = vrot.lane.b32.xlu1 %v3153_v58, %s5964_s29  ;;  %s7085_s29 = smov 118  }
 0x75c   : > { %v5112_v32 = vpop.f32.mrb[26].mxu0 }
 0x75d   : > { %v3236_v33 = vpop.f32.mrb[27].mxu0 }
 0x760   : > { %v5119_v7 = vpop.f32.mrb[26].mxu1 }
 0x761   : > { %3707 = vrot.lane.b32.xlu0 %v5119_v7, %s5965_s21  ;;  %v3319_v6 = vpop.f32.mrb[27].mxu1 }
 0x762   : > { %3705 = vrot.lane.b32.xlu1 %v3319_v6, %s5965_s21  ;;  %s7116_s21 = smov 108  }
 0x764   : > { %v5126_v37 = vpop.f32.mrb[28].mxu0 }
 0x765   : > { %3696 = vrot.lane.b32.xlu0 %v5112_v32, %s5966_s26  ;;  %v3404_v20 = vpop.f32.mrb[29].mxu0 }
 0x766   : > { %3694 = vrot.lane.b32.xlu1 %v3236_v33, %s5966_s26  ;;  %s5972_s26 = smov 116  }
 0x768   : > { %v5133_v46 = vpop.f32.mrb[28].mxu1 }
 0x769   : > { %3729 = vrot.lane.b32.xlu0 %v5133_v46, %s5967_s27  ;;  %v3487_v38 = vpop.f32.mrb[29].mxu1  ;;  %v3813_v46 = vld [vmem:[%s7035_s7 + $0x18] sm:$0xff] }
 0x76a   : > { %3727 = vrot.lane.b32.xlu1 %v3487_v38, %s5967_s27  ;;  %s5973_s27 = smov 106   ;;  %v3812_v38 = vld [vmem:[%s7035_s7 + $0x10] sm:$0xff] }
 0x76c   : > { %v5140_v24 = vpop.f32.mrb[30].mxu0 }
 0x76d   : > { %3718 = vrot.lane.b32.xlu0 %v5126_v37, %s5968_s3  ;;  %v3570_v13 = vpop.f32.mrb[31].mxu0 }
 0x76e   : > { %3716 = vrot.lane.b32.xlu1 %v3404_v20, %s5968_s3  ;;  %s7117_s3 = smov 107   ;;  %v3810_v20 = vld [vmem:[%s7035_s7] sm:$0xff] }
 0x771   : > { %3740 = vrot.lane.b32.xlu0 %v5140_v24, %s7115_s25  ;;  %v5147_v26 = vpop.f32.mrb[30].mxu1 }
 0x772   : > { %3738 = vrot.lane.b32.xlu1 %v3570_v13, %s7115_s25  ;;  %v3661_v34 = vpop.f32.mrb[31].mxu1  ;;  %v3925_v13 = vld [vmem:[%s7040_s12] sm:$0xff]  ;;  %s5976_s25 = smov 32  }
 0x773   : > { %5148 = vmatprep.subr.mxu1 %v3925_v13 }
 0x774   : > { %5149 = vmatpush3.msra.mxu1 %v3925_v13 }
 0x775   : > { %3751 = vrot.lane.b32.xlu0 %v5147_v26, %s5969_s1  ;;  %5153 = vmatprep.subr.mxu1 %v3925_v13 }
 0x776   : > { %3749 = vrot.lane.b32.xlu1 %v3661_v34, %s5969_s1 }
 0x7cb   : > { %v3686_v30 = vpop.permute.xlu0 %3685 }
 0x7cc   : > { %3691 = vst.msk [vmem:[#allocation3 + $0x8] sm:$0xff] %vm3689_vm7, %v3686_v30  ;;  %v3684_v39 = vpop.permute.xlu1 %3683 }
 0x7cd   : > { %3690 = vst.msk [vmem:[#allocation3] sm:$0xff] %vm3689_vm7, %v3684_v39  ;;  %vm4559_vm7 = vcmask 73728  }
 0x7d3   : > { %v3708_v40 = vpop.permute.xlu0 %3707 }
 0x7d4   : > { %v3706_v41 = vpop.permute.xlu1 %3705 }
 0x7d7   : > { %v3697_v43 = vpop.permute.xlu0 %3696 }
 0x7d8   : > { %3702 = vst.msk [vmem:[#allocation3 + $0x8] sm:$0xff] %vm3700_vm11, %v3697_v43  ;;  %v3695_v25 = vpop.permute.xlu1 %3694 }
 0x7d9   : > { %3701 = vst.msk [vmem:[#allocation3] sm:$0xff] %vm3700_vm11, %v3695_v25 }
 0x7da   : > { %3713 = vst.msk [vmem:[#allocation3 + $0x8] sm:$0xff] %vm3711_vm12, %v3708_v40  ;;  %3712 = vst.msk [vmem:[#allocation3] sm:$0xff] %vm3711_vm12, %v3706_v41 }
 0x7db   : > { %v3730_v48 = vpop.permute.xlu0 %3729 }
 0x7dc   : > { %v3728_v28 = vpop.permute.xlu1 %3727 }
 0x7df   : > { %v3719_v50 = vpop.permute.xlu0 %3718 }
 0x7e0   : > { %3724 = vst.msk [vmem:[#allocation3 + $0x8] sm:$0xff] %vm3722_vm15, %v3719_v50  ;;  %v3717_v51 = vpop.permute.xlu1 %3716 }
 0x7e1   : > { %3723 = vst.msk [vmem:[#allocation3] sm:$0xff] %vm3722_vm15, %v3717_v51 }
 0x7e2   : > { %3735 = vst.msk [vmem:[#allocation3 + $0x8] sm:$0xff] %vm3733_vm2, %v3730_v48  ;;  %3734 = vst.msk [vmem:[#allocation3] sm:$0xff] %vm3733_vm2, %v3728_v28 }
 0x7e3   : > { %v3741_v11 = vpop.permute.xlu0 %3740 }
 0x7e4   : > { %3746 = vst.msk [vmem:[#allocation3 + $0x8] sm:$0xff] %vm3744_vm10, %v3741_v11  ;;  %v3739_v10 = vpop.permute.xlu1 %3738 }
 0x7e5   : > { %3745 = vst.msk [vmem:[#allocation3] sm:$0xff] %vm3744_vm10, %v3739_v10 }
 0x7e7   : > { %v3752_v52 = vpop.permute.xlu0 %3751 }
 0x7e8   : > { %3757 = vst.msk [vmem:[#allocation3 + $0x8] sm:$0xff] %vm3755_vm3, %v3752_v52  ;;  %v3750_v14 = vpop.permute.xlu1 %3749 }
 0x7e9   : > { %3756 = vst.msk [vmem:[#allocation3] sm:$0xff] %vm3755_vm3, %v3750_v14 }
 0x7ef   : > { %v3759_v19 = vld [vmem:[#allocation3 + $0x8] sm:$0xff] }
 0x7f0   : > { %v3758_v53 = vld [vmem:[#allocation3] sm:$0xff] }
 0x7f1   : > { %v5766_v54 = vpack.i.bf16 %v3759_v19, %v3758_v53  ;;  %v5416_v56 = vpack.c.bf16 %v3759_v19, %v3758_v53 }
 0x7f3   : > { %5767 = vrot.lane.b32.xlu0 %v5766_v54, %s7101_s20  ;;  %5762 = vrot.lane.b32.xlu1 %v5766_v54, %s7108_s19  ;;  %s5977_s20 = smov 16  }
 0x7f4   : > { %5417 = vmatpush1.bf16.msra.mxu0 %v5416_v56 }
 0x7f5   : > { %5418 = vmatprep.subr.bf16.mxu0 %v5926_v36 }
 0x7f7   : > { %5777 = vrot.lane.b32.xlu0 %v5766_v54, %s5970_s24  ;;  %5772 = vrot.lane.b32.xlu1 %v5766_v54, %s7085_s29  ;;  %s7120_s29 = smov 12  }
 0x7fb   : > { %5787 = vrot.lane.b32.xlu0 %v5766_v54, %s7116_s21  ;;  %5782 = vrot.lane.b32.xlu1 %v5766_v54, %s5972_s26  ;;  %s5978_s26 = smov 64  }
 0x7ff   : > { %5797 = vrot.lane.b32.xlu0 %v5766_v54, %s5973_s27  ;;  %5792 = vrot.lane.b32.xlu1 %v5766_v54, %s7117_s3  ;;  %s7118_s27 = smov 118   ;;  %s7119_s3 = smov 88  }
 0x803   : > { %3904 = vperm.xlu0 %5725, %v3896_v59   ;;  %3899 = vperm.xlu1 %5724, %v3895_v42  }
 0x807   : > { %3918 = vperm.xlu0 %5725, %v3910_v44   ;;  %3913 = vperm.xlu1 %5724, %v3909_v47  }
 0x865   : > { %v5768_v35 = vpop.permute.xlu0 %5767  ;;  %v5763_v27 = vpop.permute.xlu1 %5762 }
 0x866   : > { %v5765_v62 = vunpack.i.h.bf16 %v5763_v27  ;;  %v5764_v0 = vunpack.i.l.bf16 %v5763_v27  ;;  %v5770_v2 = vunpack.i.h.bf16 %v5768_v35  ;;  %v5769_v5 = vunpack.i.l.bf16 %v5768_v35 }
 0x868   : > { %v5419_v8 = vpack.c.bf16 %v5765_v62, %v5764_v0  ;;  %v5422_v15 = vpack.c.bf16 %v5770_v2, %v5769_v5 }
 0x869   : > { %v5773_v12 = vpop.permute.xlu1 %5772  ;;  %v5778_v9 = vpop.permute.xlu0 %5777 }
 0x86a   : > { %5420 = vmatpush1.bf16.msra.mxu0 %v5419_v8  ;;  %v5775_v16 = vunpack.i.h.bf16 %v5773_v12  ;;  %v5774_v1 = vunpack.i.l.bf16 %v5773_v12  ;;  %v5780_v18 = vunpack.i.h.bf16 %v5778_v9  ;;  %v5779_v4 = vunpack.i.l.bf16 %v5778_v9 }
 0x86b   : > { %5421 = vmatprep.subr.bf16.mxu0 %v5926_v36 }
 0x86c   : > { %v5425_v21 = vpack.c.bf16 %v5775_v16, %v5774_v1  ;;  %v5428_v29 = vpack.c.bf16 %v5780_v18, %v5779_v4  ;;  %v4391_v16 = vld [vmem:[%s7041_s13 + $0x88] sm:$0xff]  ;;  %v4374_v1 = vld [vmem:[%s7041_s13] sm:$0xff]  ;;  %v4392_v4 = vld [vmem:[%s7041_s13 + $0x90] sm:$0xff] }
 0x86d   : > { %v5783_v23 = vpop.permute.xlu1 %5782  ;;  %v5788_v49 = vpop.permute.xlu0 %5787  ;;  %v4375_v18 = vld [vmem:[%s7041_s13 + $0x8] sm:$0xff] }
 0x86e   : > { %5423 = vmatpush1.bf16.msra.mxu0 %v5422_v15  ;;  %v5785_v61 = vunpack.i.h.bf16 %v5783_v23  ;;  %v5784_v3 = vunpack.i.l.bf16 %v5783_v23  ;;  %v5790_v63 = vunpack.i.h.bf16 %v5788_v49  ;;  %v5789_v31 = vunpack.i.l.bf16 %v5788_v49  ;;  %v4390_v15 = vld [vmem:[%s7041_s13 + $0x80] sm:$0xff] }
 0x86f   : > { %5424 = vmatprep.subr.bf16.mxu0 %v5926_v36  ;;  %v5442_v9 = vpack.c.bf16 %v4391_v16, %v4390_v15  ;;  %v5444_v23 = vpack.c.bf16 %v4375_v18, %v4374_v1  ;;  %v4394_v49 = vld [vmem:[%s7041_s13 + $0xa0] sm:$0xff]  ;;  %v4387_v16 = vld [vmem:[%s7041_s13 + $0x68] sm:$0xff]  ;;  %v4404_v1 = vld [vmem:[%s7041_s13 + $0xf0] sm:$0xff] }
 0x870   : > { %v5431_v55 = vpack.c.bf16 %v5785_v61, %v5784_v3  ;;  %v5434_v45 = vpack.c.bf16 %v5790_v63, %v5789_v31  ;;  %v4376_v61 = vld [vmem:[%s7041_s13 + $0x10] sm:$0xff]  ;;  %v4377_v3 = vld [vmem:[%s7041_s13 + $0x18] sm:$0xff]  ;;  %v4395_v63 = vld [vmem:[%s7041_s13 + $0xa8] sm:$0xff] }
 0x871   : > { %v5793_v22 = vpop.permute.xlu1 %5792  ;;  %v5798_v32 = vpop.permute.xlu0 %5797  ;;  %v5448_v31 = vpack.c.bf16 %v4377_v3, %v4376_v61  ;;  %v4386_v15 = vld [vmem:[%s7041_s13 + $0x60] sm:$0xff] }
 0x872   : > { %5426 = vmatpush1.bf16.msra.mxu0 %v5425_v21  ;;  %v5795_v57 = vunpack.i.h.bf16 %v5793_v22  ;;  %v5794_v58 = vunpack.i.l.bf16 %v5793_v22  ;;  %v5800_v33 = vunpack.i.h.bf16 %v5798_v32  ;;  %v5799_v7 = vunpack.i.l.bf16 %v5798_v32  ;;  %v4393_v21 = vld [vmem:[%s7041_s13 + $0x98] sm:$0xff]  ;;  %v4378_v22 = vld [vmem:[%s7041_s13 + $0x20] sm:$0xff] }
 0x873   : > { %5427 = vmatprep.subr.bf16.mxu0 %v5926_v36  ;;  %v5468_v61 = vpack.c.bf16 %v4387_v16, %v4386_v15  ;;  %v4476_v16 = vld [vmem:[%s7042_s14] sm:$0x1] }
 0x874   : > { %v5437_v6 = vpack.c.bf16 %v5795_v57, %v5794_v58  ;;  %v5440_v37 = vpack.c.bf16 %v5800_v33, %v5799_v7  ;;  %v4396_v57 = vld [vmem:[%s7041_s13 + $0xb0] sm:$0xff]  ;;  %v4397_v58 = vld [vmem:[%s7041_s13 + $0xb8] sm:$0xff] }
 0x875   : > { %v5454_v33 = vpack.c.bf16 %v4397_v58, %v4396_v57  ;;  %v4380_v7 = vld [vmem:[%s7041_s13 + $0x30] sm:$0xff] }
 0x876   : > { %5429 = vmatpush1.bf16.msra.mxu0 %v5428_v29  ;;  %v5446_v29 = vpack.c.bf16 %v4393_v21, %v4392_v4  ;;  %v4388_v4 = vld [vmem:[%s7041_s13 + $0x70] sm:$0xff]  ;;  %v4389_v21 = vld [vmem:[%s7041_s13 + $0x78] sm:$0xff] }
 0x877   : > { %5430 = vmatprep.subr.bf16.mxu0 %v5926_v36 }
 0x87a   : > { %5432 = vmatpush1.bf16.msra.mxu0 %v5431_v55  ;;  %v5450_v55 = vpack.c.bf16 %v4395_v63, %v4394_v49 }
 0x87b   : > { %5433 = vmatprep.subr.bf16.mxu0 %v5926_v36 }
 0x87e   : > { %5435 = vmatpush1.bf16.msra.mxu0 %v5434_v45  ;;  %v4379_v45 = vld [vmem:[%s7041_s13 + $0x28] sm:$0xff] }
 0x87f   : > { %5436 = vmatprep.subr.bf16.mxu0 %v5926_v36  ;;  %v5452_v32 = vpack.c.bf16 %v4379_v45, %v4378_v22  ;;  %v5472_v22 = vpack.c.bf16 %v4389_v21, %v4388_v4  ;;  %v4485_v21 = vld [vmem:[%s7045_s17] sm:$0x1] }
 0x882   : > { %5438 = vmatpush1.bf16.msra.mxu0 %v5437_v6  ;;  %v3900_v24 = vpop.permute.xlu1 %3899  ;;  %v3905_v26 = vpop.permute.xlu0 %3904  ;;  %v4381_v6 = vld [vmem:[%s7041_s13 + $0x38] sm:$0xff] }
 0x883   : > { %5439 = vmatprep.subr.bf16.mxu0 %v5926_v36 }
 0x886   : > { %5441 = vmatpush1.bf16.msra.mxu0 %v5440_v37  ;;  %v3914_v40 = vpop.permute.xlu1 %3913  ;;  %v3919_v50 = vpop.permute.xlu0 %3918  ;;  %v5456_v37 = vpack.c.bf16 %v4381_v6, %v4380_v7 }
 0x887   : > { %5474 = vmatprep.subr.bf16.mxu0 %v5926_v36 }
 0x889   : > { %3885 = vmatmul.mubr.f32.vlgmr.msra.gmra.mrb[32].mxu0 %v3810_v20 }
 0x88a   : > { %4676 = vmatprep.mubr.msk.f32.mxu0 %vm2997_vm4, %v3813_v46 }
 0x88d   : > { %3890 = vmatmul.mubr.f32.gmra.mrb[34].mxu0 %v3812_v38 }
 0x88e   : > { %5176 = vmatprep.mubr.msk.f32.mxu0 %vm5927_vm9, %v6601_v17  ;;  %vm3936_vm9 = vcmask 64512  }
 0x95c   : > { %v3886_v34 = vpop.f32.mrb[32].mxu0 }
 0x95d   : > { %v3907_v30 = vmul.f32 %v3900_v24, %v3886_v34  ;;  %v3888_v39 = vpop.f32.mrb[33].mxu0  ;;  %v4398_v24 = vld [vmem:[%s7041_s13 + $0xc0] sm:$0xff] }
 0x95e   : > { %v4383_v39 = vld [vmem:[%s7041_s13 + $0x48] sm:$0xff] }
 0x95f   : > { %v3921_v41 = vadd.f32 %v3914_v40, %v3907_v30  ;;  %v4382_v30 = vld [vmem:[%s7041_s13 + $0x40] sm:$0xff] }
 0x960   : > { %v3891_v43 = vpop.f32.mrb[34].mxu0 }
 0x961   : > { %v3923_v25 = vmax.f32 %v3921_v41, 0.0  ;;  %v3908_v48 = vmul.f32 %v3905_v26, %v3891_v43  ;;  %v3893_v28 = vpop.f32.mrb[35].mxu0  ;;  %v5460_v43 = vpack.c.bf16 %v4383_v39, %v4382_v30 }
 0x962   : > { %v4400_v28 = vld [vmem:[%s7041_s13 + $0xd0] sm:$0xff] }
 0x963   : > { %v3922_v17 = vadd.f32 %v3919_v50, %v3908_v48  ;;  %3928 = vrot.lane.b32.xlu1 %v3923_v25, %s7118_s27  ;;  %v4401_v50 = vld [vmem:[%s7041_s13 + $0xd8] sm:$0xff] }
 0x965   : > { %v3924_v51 = vmax.f32 %v3922_v17, 0.0 }
 0x967   : > { %3930 = vrot.lane.b32.xlu0 %v3924_v51, %s7118_s27  ;;  %s5979_s27 = smov 48  }
 0x9d5   : > { %v3929_v11 = vpop.permute.xlu1 %3928 }
 0x9d6   : > { %v3934_v10 = vadd.f32 %v3929_v11, %v3923_v25 }
 0x9d8   : > { %4018 = vrot.lane.b32.xlu1 %v3934_v10, %s7116_s21  ;;  %5150 = vmatprep.mubr.msk.f32.mxu1 %vm3936_vm9, %v3934_v10 }
 0x9d9   : > { %v3931_v52 = vpop.permute.xlu0 %3930 }
 0x9da   : > { %v3935_v14 = vadd.f32 %v3931_v52, %v3924_v51  ;;  %v4384_v52 = vld [vmem:[%s7041_s13 + $0x50] sm:$0xff] }
 0x9dc   : > { %4101 = vrot.lane.b32.xlu1 %v3934_v10, %s7119_s3  ;;  %4020 = vrot.lane.b32.xlu0 %v3935_v14, %s7116_s21  ;;  %s5975_s21 = smov 8  }
 0x9dd   : > { %5151 = vmatmul.mubr.msk.f32.vlgmr.msra.gmra.mrb[32].mxu1 %vm3936_vm9, %v3935_v14 }
 0x9de   : > { %5154 = vmatpush3.msra.mxu1 %v3925_v13 }
 0x9df   : > { %5158 = vmatprep.subr.mxu1 %v3925_v13 }
 0x9e0   : > { %4184 = vrot.lane.b32.xlu1 %v3934_v10, %s5974_s4  ;;  %4103 = vrot.lane.b32.xlu0 %v3935_v14, %s7119_s3  ;;  %v5462_v10 = vpack.c.bf16 %v4401_v50, %v4400_v28  ;;  %s7121_s3 = smov 96  }
 0x9e4   : > { %4186 = vrot.lane.b32.xlu0 %v3935_v14, %s5974_s4  ;;  %v4385_v14 = vld [vmem:[%s7041_s13 + $0x58] sm:$0xff]  ;;  %s7122_s4 = smov 80  }
 0xa4a   : > { %v4019_v19 = vpop.permute.xlu1 %4018 }
 0xa4b   : > { %5155 = vmatprep.mubr.msk.f32.mxu1 %vm3936_vm9, %v4019_v19 }
 0xa4e   : > { %v4102_v53 = vpop.permute.xlu1 %4101  ;;  %v4021_v54 = vpop.permute.xlu0 %4020 }
 0xa4f   : > { %5156 = vmatmul.mubr.msk.f32.vlgmr.msra.gmra.mrb[34].mxu1 %vm3936_vm9, %v4021_v54  ;;  %v5464_v54 = vpack.c.bf16 %v4385_v14, %v4384_v52 }
 0xa50   : > { %5159 = vmatpush3.msra.mxu1 %v3925_v13  ;;  %5160 = vmatprep.mubr.msk.f32.mxu1 %vm3936_vm9, %v4102_v53 }
 0xa51   : > { %5163 = vmatprep.subr.mxu1 %v3925_v13 }
 0xa52   : > { %v4185_v56 = vpop.permute.xlu1 %4184  ;;  %v4104_v59 = vpop.permute.xlu0 %4103 }
 0xa53   : > { %5161 = vmatmul.mubr.msk.f32.vlgmr.msra.gmra.mrb[36].mxu1 %vm3936_vm9, %v4104_v59 }
 0xa54   : > { %5164 = vmatpush3.msra.mxu1 %v3925_v13  ;;  %5165 = vmatprep.mubr.msk.f32.mxu1 %vm3936_vm9, %v4185_v56  ;;  %v4399_v13 = vld [vmem:[%s7041_s13 + $0xc8] sm:$0xff] }
 0xa55   : > { %5443 = vmatprep.subr.bf16.mxu1 %v5442_v9  ;;  %v5458_v34 = vpack.c.bf16 %v4399_v13, %v4398_v24  ;;  %v4405_v9 = vld [vmem:[%s7041_s13 + $0xf8] sm:$0xff] }
 0xa56   : > { %v4187_v42 = vpop.permute.xlu0 %4186  ;;  %v5470_v3 = vpack.c.bf16 %v4405_v9, %v4404_v1 }
 0xa57   : > { %5166 = vmatmul.mubr.msk.f32.vlgmr.msra.gmra.mrb[38].mxu1 %vm3936_vm9, %v4187_v42 }
 0xa58   : > { %5445 = vmatpush3.bf16.msra.mxu1 %v5444_v23 }
 0xa59   : > { %5447 = vmatprep.subr.bf16.mxu1 %v5446_v29 }
 0xa5c   : > { %5449 = vmatpush3.bf16.msra.mxu1 %v5448_v31 }
 0xa5d   : > { %5451 = vmatprep.subr.bf16.mxu1 %v5450_v55 }
 0xa60   : > { %5453 = vmatpush3.bf16.msra.mxu1 %v5452_v32 }
 0xa61   : > { %5455 = vmatprep.subr.bf16.mxu1 %v5454_v33 }
 0xa64   : > { %5457 = vmatpush3.bf16.msra.mxu1 %v5456_v37 }
 0xa65   : > { %5459 = vmatprep.subr.bf16.mxu1 %v5458_v34 }
 0xa68   : > { %5461 = vmatpush3.bf16.msra.mxu1 %v5460_v43 }
 0xa69   : > { %5463 = vmatprep.subr.bf16.mxu1 %v5462_v10 }
 0xa6c   : > { %5465 = vmatpush3.bf16.msra.mxu1 %v5464_v54 }
 0xab0   : > { %v6844_v44 = vpop.f32.mrb[32].mxu1 }
 0xab1   : > { %v4009_v47 = vpop.f32.mrb[33].mxu1 }
 0xb22   : > { %v5157_v60 = vpop.f32.mrb[34].mxu1 }
 0xb23   : > { %v4092_v35 = vpop.f32.mrb[35].mxu1 }
 0xb24   : > { %v5801_v27 = vpack.i.bf16 %v4092_v35, %v5157_v60 }
 0xb26   : > { %5802 = vrot.lane.b32.xlu1 %v5801_v27, %s7112_s23  ;;  %v5162_v62 = vpop.f32.mrb[36].mxu1 }
 0xb27   : > { %v4175_v0 = vpop.f32.mrb[37].mxu1 }
 0xb28   : > { %v5806_v2 = vpack.i.bf16 %v4175_v0, %v5162_v62  ;;  %v4402_v62 = vld [vmem:[%s7041_s13 + $0xe0] sm:$0xff]  ;;  %v4403_v0 = vld [vmem:[%s7041_s13 + $0xe8] sm:$0xff] }
 0xb29   : > { %v5466_v18 = vpack.c.bf16 %v4403_v0, %v4402_v62  ;;  %v4482_v62 = vld [vmem:[%s7044_s16 + $0x8] sm:$0xff] }
 0xb2a   : > { %5807 = vrot.lane.b32.xlu0 %v5806_v2, %s5975_s21  ;;  %v5167_v5 = vpop.f32.mrb[38].mxu1 }
 0xb2b   : > { %v4258_v8 = vpop.f32.mrb[39].mxu1  ;;  %5467 = vmatprep.subr.bf16.mxu1 %v5466_v18 }
 0xb2c   : > { %v5811_v12 = vpack.i.bf16 %v4258_v8, %v5167_v5  ;;  %5469 = vmatpush3.bf16.msra.mxu1 %v5468_v61 }
 0xb2d   : > { %5471 = vmatprep.subr.bf16.mxu1 %v5470_v3 }
 0xb2e   : > { %5812 = vrot.lane.b32.xlu1 %v5811_v12, %s7120_s29  ;;  %s4686_s29 = sshll.u32 %s6097_s0, 4  ;;  %s5980_s0 = smov [#allocation4]  }
 0xb2f   : > { %s6986_s24 = scalar_lea.hbm %s7046_s18, %s4686_s29 }
 0xb30   : > { %5473 = vmatpush3.bf16.msra.mxu1 %v5472_v22 }
 0xb98   : > { %v5803_v20 = vpop.permute.xlu1 %5802 }
 0xb99   : > { %v5805_v46 = vunpack.i.h.bf16 %v5803_v20  ;;  %v5804_v26 = vunpack.i.l.bf16 %v5803_v20 }
 0xb9b   : > { %v4291_v25 = vsel %vm2486_vm14, %v4009_v47, %v5805_v46  ;;  %v4292_v17 = vsel %vm2486_vm14, %v6844_v44, %v5804_v26  ;;  %vm7123_vm14 = vcmask 261120  }
 0xb9c   : > { %v5808_v38 = vpop.permute.xlu0 %5807  ;;  %vm7124_vm0 = vmmov %vm7123_vm14 }
 0xb9d   : > { %v5810_v40 = vunpack.i.h.bf16 %v5808_v38  ;;  %v5809_v41 = vunpack.i.l.bf16 %v5808_v38  ;;  %vm7125_vm6 = vmmov %vm7124_vm0 }
 0xb9f   : > { %v4293_v19 = vsel %vm3936_vm9, %v4291_v25, %v5810_v40  ;;  %v4294_v53 = vsel %vm3936_vm9, %v4292_v17, %v5809_v41 }
 0xba0   : > { %v5813_v48 = vpop.permute.xlu1 %5812 }
 0xba1   : > { %v5815_v51 = vunpack.i.h.bf16 %v5813_v48  ;;  %v5814_v11 = vunpack.i.l.bf16 %v5813_v48 }
 0xba3   : > { %v4295_v56 = vsel %vm2333_vm13, %v4293_v19, %v5815_v51  ;;  %v4296_v59 = vsel %vm2333_vm13, %v4294_v53, %v5814_v11  ;;  %vm4357_vm13 = vcmask 392192  }
 0xba4   : > { %v4302_v42 = vrot.slane %v4295_v56, 2  ;;  %v4331_v44 = vrot.slane %v4296_v59, 2  ;;  %v4298_v47 = vrot.slane %v4295_v56, 1  ;;  %v4327_v60 = vrot.slane %v4296_v59, 1 }
 0xba5   : > { %v4310_v35 = vrot.slane %v4295_v56, 4  ;;  %v4339_v27 = vrot.slane %v4296_v59, 4  ;;  %v4306_v8 = vrot.slane %v4295_v56, 3  ;;  %v4335_v12 = vrot.slane %v4296_v59, 3 }
 0xba6   : > { %v5821_v2 = vpack.i.bf16 %v4302_v42, %v4331_v44  ;;  %v5816_v5 = vpack.i.bf16 %v4298_v47, %v4327_v60  ;;  %v4318_v23 = vrot.slane %v4295_v56, 6  ;;  %v4347_v29 = vrot.slane %v4296_v59, 6 }
 0xba7   : > { %v5831_v49 = vpack.i.bf16 %v4310_v35, %v4339_v27  ;;  %v5826_v63 = vpack.i.bf16 %v4306_v8, %v4335_v12  ;;  %v4314_v31 = vrot.slane %v4295_v56, 5  ;;  %v4343_v55 = vrot.slane %v4296_v59, 5  ;;  %v4481_v27 = vld [vmem:[%s7044_s16] sm:$0xff] }
 0xba8   : > { %5822 = vrot.lane.b32.xlu1 %v5821_v2, %s5976_s25  ;;  %5817 = vrot.lane.b32.xlu0 %v5816_v5, %s5977_s20  ;;  %v5841_v45 = vpack.i.bf16 %v4318_v23, %v4347_v29  ;;  %v4322_v58 = vrot.slane %v4295_v56, 7  ;;  %v4351_v32 = vrot.slane %v4296_v59, 7  ;;  %v5475_v0 = vpack.c.bf16 %v4482_v62, %v4481_v27  ;;  %v4483_v2 = vld [vmem:[%s7044_s16 + $0x10] sm:$0xff]  ;;  %v4484_v5 = vld [vmem:[%s7044_s16 + $0x18] sm:$0xff] }
 0xba9   : > { %v5836_v57 = vpack.i.bf16 %v4314_v31, %v4343_v55  ;;  %v5478_v8 = vpack.c.bf16 %v4484_v5, %v4483_v2 }
 0xbaa   : > { %v5846_v33 = vpack.i.bf16 %v4322_v58, %v4351_v32  ;;  %5476 = vmatpush3.bf16.msra.mxu0 %v5475_v0 }
 0xbab   : > { %5477 = vmatprep.subr.bf16.mxu0 %v5926_v36  ;;  %v4478_v36 = vld [vmem:[%s7043_s15] sm:$0x1] }
 0xbac   : > { %5832 = vrot.lane.b32.xlu1 %v5831_v49, %s5978_s26  ;;  %5827 = vrot.lane.b32.xlu0 %v5826_v63, %s5979_s27  ;;  %s5856_s27 = sshll.u32 %s5980_s0, 4  ;;  %s5857_s27 = int_to_ptr.vmem [resolvable:$false] %s5856_s27 }
 0xbae   : > { %5479 = vmatpush3.bf16.msra.mxu0 %v5478_v8 }
 0xbb0   : > { %5842 = vrot.lane.b32.xlu1 %v5841_v45, %s7121_s3  ;;  %5837 = vrot.lane.b32.xlu0 %v5836_v57, %s7122_s4  ;;  %s566_s4 = sand.u32 1, %s5906_s28   ;;  %s5858_s3 = scalar_lea.vmem %s5857_s27, 32 }
 0xbb1   : > { %s567_s25 = scalar_lea.vmem [#allocation4], %s566_s4  ;;  %s4562_s23 = scalar_lea.sflag [#allocation5], %s566_s4 }
 0xbb2   : > { %s4574_s20 = sshll.u32 %s567_s25, 4  ;;  %s6988_s20 = int_to_ptr.vmem [resolvable:$true] %s4574_s20 }
 0xbb3   : > { %s5852_s26 = scalar_lea.vmem %s6988_s20, 16  ;;  %p5859_p0 = scmp.lt.s32.totalorder %s6988_s20, %s5857_s27 }
 0xbb4   : > { %5847 = vrot.lane.b32.xlu0 %v5846_v33, %s7114_s22  ;;  %p5853_p11 = scmp.ne.s32.totalorder %s6988_s20, %s5852_s26  ;;  %p5860_p1 = scmp.lt.s32.totalorder %s5858_s3, %s5852_s26 }
 0xbb6   : > { %p5854_p12 = pnand %p5853_p11, %p6114_p5  ;;  %p5861_p2 = por %p5860_p1, %p5859_p0 }
 0xbb8   : > { %p5855_p13 = pneg %p5854_p12 }
 0xbba   : > { %p5862_p3 = pnand %p5861_p2, %p5855_p13 }
 0xc1a   : > { %v5823_v7 = vpop.permute.xlu1 %5822  ;;  %v5818_v6 = vpop.permute.xlu0 %5817 }
 0xc1b   : > { %v5820_v37 = vunpack.i.h.bf16 %v5818_v6  ;;  %v5819_v20 = vunpack.i.l.bf16 %v5818_v6  ;;  %v5825_v46 = vunpack.i.h.bf16 %v5823_v7  ;;  %v5824_v38 = vunpack.i.l.bf16 %v5823_v7 }
 0xc1d   : > { %v4355_v24 = vsel %vm2997_vm4, %v4295_v56, %v5820_v37  ;;  %v4367_v13 = vsel %vm2997_vm4, %v4296_v59, %v5819_v20  ;;  %vm4363_vm4 = vcmask 785408  }
 0xc1e   : > { %v5833_v26 = vpop.permute.xlu1 %5832  ;;  %v5828_v34 = vpop.permute.xlu0 %5827  ;;  %v4356_v43 = vsel %vm7123_vm14, %v4355_v24, %v5825_v46  ;;  %v4368_v25 = vsel %vm7124_vm0, %v4367_v13, %v5824_v38 }
 0xc1f   : > { %v5830_v30 = vunpack.i.h.bf16 %v5828_v34  ;;  %v5829_v39 = vunpack.i.l.bf16 %v5828_v34  ;;  %v5835_v40 = vunpack.i.h.bf16 %v5833_v26  ;;  %v5834_v41 = vunpack.i.l.bf16 %v5833_v26 }
 0xc21   : > { %v4358_v48 = vsel %vm4357_vm13, %v4356_v43, %v5830_v30  ;;  %v4369_v28 = vsel %vm4357_vm13, %v4368_v25, %v5829_v39 }
 0xc22   : > { %v5843_v50 = vpop.permute.xlu1 %5842  ;;  %v5838_v17 = vpop.permute.xlu0 %5837  ;;  %v4360_v14 = vsel %vm4359_vm5, %v4358_v48, %v5835_v40  ;;  %v4370_v19 = vsel %vm4359_vm5, %v4369_v28, %v5834_v41 }
 0xc23   : > { %v5840_v51 = vunpack.i.h.bf16 %v5838_v17  ;;  %v5839_v11 = vunpack.i.l.bf16 %v5838_v17  ;;  %v5845_v10 = vunpack.i.h.bf16 %v5843_v50  ;;  %v5844_v52 = vunpack.i.l.bf16 %v5843_v50 }
 0xc25   : > { %v4362_v53 = vsel %vm4361_vm1, %v4360_v14, %v5840_v51  ;;  %v4371_v54 = vsel %vm4361_vm1, %v4370_v19, %v5839_v11 }
 0xc26   : > { %v5848_v56 = vpop.permute.xlu0 %5847  ;;  %v4372_v44 = vsel %vm4363_vm4, %v4371_v54, %v5844_v52  ;;  %v4364_v47 = vsel %vm4363_vm4, %v4362_v53, %v5845_v10 }
 0xc27   : > { %v5850_v59 = vunpack.i.h.bf16 %v5848_v56  ;;  %v5849_v42 = vunpack.i.l.bf16 %v5848_v56 }
 0xc29   : > { %v4373_v60 = vsel %vm4365_vm8, %v4372_v44, %v5849_v42  ;;  %v4366_v35 = vsel %vm4365_vm8, %v4364_v47, %v5850_v59 }
 0xc2a   : > { %4470 = vmatprep.mubr.f32.mxu1 %v4373_v60 }
 0xc2b   : > { %4471 = vmatmul.mubr.f32.vlgmr.msra.gmra.mrb[40].mxu1 %v4366_v35 }
 0xcfe   : > { %v4866_v12 = vpop.f32.mrb[40].mxu1 }
 0xcff   : > { %v4867_v15 = vpop.f32.mrb[41].mxu1 }
 0xd00   : > { %v4868_v1 = vadd.f32 %v4867_v15, %v4866_v12 }
 0xd02   : > { %v4477_v9 = vmul.f32 %v4868_v1, %v4476_v16 }
 0xd04   : > { %v4479_v18 = vadd.f32 %v4478_v36, %v4477_v9 }
 0xd06   : > { %v4480_v4 = vmax.f32 %v4479_v18, 0.0 }
 0xd08   : > { %5177 = vmatmul.mubr.msk.f32.vlgmr.msra.gmra.mrb[36].mxu0 %vm7125_vm6, %v4480_v4 }
 0xddb   : > { %v4555_v23 = vpop.f32.mrb[36].mxu0 }
 0xddc   : > { %v4556_v29 = vadd.f32 %v4555_v23, %v4485_v21  ;;  %v5178_v61 = vpop.f32.mrb[37].mxu0 }
 0xdde   : > { %4560 = vst.msk [vmem:[%s567_s25] sm:$0x1] %vm4559_vm7, %v4556_v29 }
 0xddf   : > { %5865 = shalt.err (!%p5862_p3)
}
 0xde0   : > { %s5866_s4 = scalar_lea.hbm %s6986_s24, 16  ;;  %s5870_s29 = scalar_lea.hbm %s7046_s18, 32 }
 0xde1   : > { %p5867_p4 = scmp.ne.s32.totalorder %s6986_s24, %s5866_s4  ;;  %p5871_p9 = scmp.lt.u32.totalorder %s6986_s24, %s7046_s18 }
 0xde2   : > { %p5872_p10 = scmp.lt.u32.totalorder %s5870_s29, %s5866_s4  ;;  %p5874_p12 = scmp.lt.u32.totalorder %s5866_s4, %s6986_s24 }
 0xde3   : > { %p5868_p7 = pnand %p5867_p4, %p6114_p5 }
 0xde4   : > { %p5873_p11 = por %p5872_p10, %p5871_p9 }
 0xde5   : > { %p5869_p8 = pneg %p5868_p7 }
 0xde6   : > { %p5875_p13 = por %p5874_p12, %p5873_p11 }
 0xde8   : > { %p5876_p0 = pnand %p5875_p13, %p5869_p8 }
 0xdea   : > { %5879 = shalt.err (!%p5876_p0)
}
 0xdeb   : > { %5481 = dma.vmem_to_hbm [thread:$0]  (%p6114_p5), %s6988_s20, 16, %s6986_s24, %s4562_s23  }
 0xdec PF: > { %s7126_s1 = sld [smem:[#allocation7_spill]]  ;;  %p5487_p1 = scmp.ge.s32.totalorder %s5914_s30, 2 }
 0xdee   : > { %p5484_p2 = pnand %p5487_p1, %p6118_p6 }
 0xdf2   : > { %s4586_s0 = sand.u32 1, %s7126_s1  }
 0xdf3   : > { %s4587_s27 = scalar_lea.sflag [#allocation5], %s4586_s0 }
 0xdf4   : > { %5897 = dma.done.wait (!%p5484_p2), %s4587_s27, 16  }
 0xdf5   : > { %5899 = vsyncadd (!%p5484_p2), %s4587_s27, 4294967280  ;;  %s7128_s30 = sld [smem:[#allocation9_spill]]  ;;  %s7129_s3 = sld [smem:[#allocation8_spill]] }
 0xdf6   : > { %s7130_s29 = sld [smem:[#allocation10_spill]]  ;;  %s7131_s27 = smov %s5906_s28 }
 0xdfb   : > { %p28_p3 = scmp.ge.s32.totalorder %s7128_s30, 4   ;;  %s7132_s28 = smov %s7129_s3 }
 0xdfd   :  { %30 = sbr.rel (!%p28_p3) target bundleno = 9 (0x9), region = 127 }
 0xe04   :  { %4591 = vsyncpa [#allocation5], 1 }
 0xe05   :  { %4593 = vsyncpa [#allocation5 + $0x1], 1 }

</bundles_post_ra>
